<compile_context>
chip_gen: v6e
topology: v6e:2x2x1
jax: 0.10.0
libtpu: 0.0.40
codegen_flags: <defaults>
</compile_context>

<pallas_src>
import functools

import jax
import jax.numpy as jnp
from jax import lax
from jax.experimental import pallas as pl
from jax.experimental.pallas import tpu as pltpu


def _cdiv(a, b):
    return -(-a // b)


def _linear_block_kernel(x_ref, w_ref, bias_ref, o_ref, *, KH, KW, HO, WO, Bblk):
    # x_ref:    (Bblk, H, W, Cp)   packed input tile (Cp = packed channels on lanes)
    # w_ref:    (KH*KW, Cp)        depthwise filter, tap-major, BN scale pre-folded
    # bias_ref: (1, Cp)            folded BN bias = beta - mean * gamma / sqrt(var+eps)
    # o_ref:    (Bblk, HO, WO, Cp) output tile
    w = w_ref[...].astype(jnp.float32)        # single hoisted load of all taps
    bias = bias_ref[0].astype(jnp.float32)    # (Cp,)

    def body(b, carry):
        # One packed batch element per iteration keeps the live set to roughly
        # x_kw (H*W*Cp) + acc (HO*W*Cp) vregs -> no spill traffic in the tap loop.
        x_kw = x_ref[b].astype(jnp.float32)   # (H, W, Cp)
        Wdim = x_kw.shape[1]

        # Tap (kh=0, kw=0) initializes the accumulator (no zero-materialize pass).
        acc = x_kw[0:HO, :, :] * w[0, :]
        for kh in range(1, KH):
            acc = acc + x_kw[kh:kh + HO, :, :] * w[kh * KW, :]

        # Chained kw shifts: one sublane rotation (XLU) per kw applied to the previous
        # shifted copy, so the original x's live range ends after kw=0.
        for kw in range(1, KW):
            x_kw = pltpu.roll(x_kw, shift=Wdim - 1, axis=1)
            # Now x_kw[:, j, :] == x[:, (j + kw) % Wdim, :]; wrapped cols j >= WO are
            # never stored.
            for kh in range(KH):
                acc = acc + x_kw[kh:kh + HO, :, :] * w[kh * KW + kw, :]

        # Bias epilogue on the full-width accumulator; slice to WO only at the store
        # (avoids a sublane repack of the whole accumulator before the VPU pass).
        y = acc + bias
        o_ref[b] = y[:, :WO, :].astype(o_ref.dtype)
        return carry

    lax.fori_loop(0, Bblk, body, 0)


def linear_block_forward(x_nchw, conv_w, gamma, beta, running_mean, running_var,
                         *, kernel=(5, 5), stride=(1, 1), padding=(0, 0), eps=1e-4):
    """x_nchw: (N, C, H, W) float32.  conv_w: (C, 1, KH, KW) depthwise weight."""
    assert stride == (1, 1) and padding == (0, 0), "only default stride/padding supported"
    N, C, H, W = x_nchw.shape
    KH, KW = kernel
    HO = H - KH + 1
    WO = W - KW + 1

    # ---- lane packing: fold G batch elements into the channel/lane axis -------------
    # Packed channel index = g*C + c. If 128 % C != 0 the packed lane count is < 128
    # and stores degrade to masked partial stores (correct, just slower).
    if C >= 128:
        G = 1
    else:
        G = max(1, min(128 // C, N))
        # Keep at least 2 packed batch elements so the grid can have >= 2 parallel
        # steps (both v7x TensorCores busy); only triggers when G would swallow all of N.
        if _cdiv(N, G) < 2 and N >= 2:
            G = _cdiv(N, 2)
    NB = _cdiv(N, G)
    N_pad = NB * G
    Cp = G * C

    # ---- batch-block size: biggest block that fits a conservative VMEM budget -------
    # Double-buffered footprint ~= 2 * Bblk * (in_block + out_block); 8 MiB budget fits
    # under every generation's default scoped VMEM (16 MiB v5e, 32 MiB v6e/v7x).
    per_b_bytes = (H * W + HO * WO) * Cp * 4
    budget = 8 << 20
    Bblk = max(1, min(NB, budget // (2 * per_b_bytes)))
    if NB >= 2:
        Bblk = min(Bblk, _cdiv(NB, 2))    # guarantee >= 2 grid steps (megacore sharding)
    NBp = _cdiv(NB, Bblk) * Bblk
    n_steps = NBp // Bblk

    # ---- pack NCHW -> (NBp, H, W, Cp) with a single transpose -----------------------
    if N_pad != N:
        x_nchw = jnp.pad(x_nchw, ((0, N_pad - N), (0, 0), (0, 0), (0, 0)))
    x = x_nchw.reshape(NB, G, C, H, W)
    x = jnp.transpose(x, (0, 3, 4, 1, 2)).reshape(NB, H, W, Cp)
    if NBp != NB:
        x = jnp.pad(x, ((0, NBp - NB), (0, 0), (0, 0), (0, 0)))

    # ---- fold BatchNorm (inference) into per-channel weights / bias -----------------
    scale = gamma / jnp.sqrt(running_var + eps)          # (C,)
    bias = beta - running_mean * scale                   # (C,)
    # Depthwise weight (C,1,KH,KW) -> (KH*KW, C) tap-major; fold scale (exact) and
    # tile G times along lanes to match the packed channel order g*C + c.
    w = jnp.transpose(conv_w[:, 0, :, :], (1, 2, 0)).reshape(KH * KW, C)
    w = w * scale[None, :]
    w_p = jnp.tile(w, (1, G)).astype(jnp.float32)        # (KH*KW, Cp)
    bias_p = jnp.tile(bias, (G,)).reshape(1, Cp).astype(jnp.float32)

    kernel_fn = functools.partial(_linear_block_kernel,
                                  KH=KH, KW=KW, HO=HO, WO=WO, Bblk=Bblk)

    elt = 4  # float32 bytes
    cost = pl.CostEstimate(
        flops=2 * KH * KW * NBp * HO * WO * Cp + NBp * HO * WO * Cp,
        transcendentals=0,
        bytes_accessed=(NBp * H * W * Cp + NBp * HO * WO * Cp
                        + KH * KW * Cp + Cp) * elt,
    )

    out_p = pl.pallas_call(
        kernel_fn,
        out_shape=jax.ShapeDtypeStruct((NBp, HO, WO, Cp), x.dtype),
        grid_spec=pltpu.PrefetchScalarGridSpec(
            num_scalar_prefetch=0,
            grid=(n_steps,),
            in_specs=[
                pl.BlockSpec((Bblk, H, W, Cp), lambda n: (n, 0, 0, 0)),
                pl.BlockSpec((KH * KW, Cp), lambda n: (0, 0)),
                pl.BlockSpec((1, Cp), lambda n: (0, 0)),
            ],
            out_specs=pl.BlockSpec((Bblk, HO, WO, Cp), lambda n: (n, 0, 0, 0)),
        ),
        compiler_params=pltpu.CompilerParams(
            dimension_semantics=("parallel",),
            vmem_limit_bytes=32 * 1024 * 1024,
        ),
        cost_estimate=cost,
    )(x, w_p, bias_p)

    # ---- unpack (NBp, HO, WO, Cp) -> NCHW with a single transpose -------------------
    out = out_p[:NB].reshape(NB, HO, WO, G, C)
    out = jnp.transpose(out, (0, 3, 4, 1, 2)).reshape(N_pad, C, HO, WO)
    return out[:N]


def _reference(x_nchw, conv_w, gamma, beta, running_mean, running_var, eps=1e-4):
    """Plain-JAX reference (lax depthwise conv + folded BN), NCHW in/out."""
    N, C, H, W = x_nchw.shape
    x = jnp.transpose(x_nchw, (0, 2, 3, 1))                       # NHWC
    w_hwio = jnp.transpose(conv_w, (2, 3, 1, 0))                  # (KH,KW,1,C)
    y = jax.lax.conv_general_dilated(
        x, w_hwio, window_strides=(1, 1), padding="VALID",
        dimension_numbers=("NHWC", "HWIO", "NHWC"), feature_group_count=C)
    scale = gamma / jnp.sqrt(running_var + eps)
    bias = beta - running_mean * scale
    y = y * scale + bias
    return jnp.transpose(y, (0, 3, 1, 2))


if __name__ == "__main__":
    # Small shapes consistent with the module (depthwise => groups == channels).
    # N=64, C=8 -> G=16 (128 dense lanes), NB=4 packed batches, Bblk=2, grid=2.
    N, C, H, W = 64, 8, 16, 16
    KH, KW = 5, 5

    key = jax.random.PRNGKey(0)
    k_x, k_w, k_g, k_b, k_m, k_v = jax.random.split(key, 6)

    x = jax.random.normal(k_x, (N, C, H, W), dtype=jnp.float32)
    conv_w = jax.random.normal(k_w, (C, 1, KH, KW), dtype=jnp.float32) * 0.1
    gamma = jax.random.normal(k_g, (C,), dtype=jnp.float32) * 0.1 + 1.0
    beta = jax.random.normal(k_b, (C,), dtype=jnp.float32) * 0.1
    running_mean = jax.random.normal(k_m, (C,), dtype=jnp.float32) * 0.1
    running_var = jax.random.uniform(k_v, (C,), dtype=jnp.float32, minval=0.5, maxval=1.5)

    out = linear_block_forward(x, conv_w, gamma, beta, running_mean, running_var)
    out = jax.block_until_ready(out)

    ref = _reference(x, conv_w, gamma, beta, running_mean, running_var)
    assert out.shape == (N, C, H - KH + 1, W - KW + 1), out.shape
    assert jnp.allclose(out, ref, atol=1e-4, rtol=1e-4), float(jnp.max(jnp.abs(out - ref)))

    print("KERNEL_OK")
</pallas_src>

<mosaic_0001>
module attributes {stable_mosaic.version = 11 : i64} {
  func.func @_linear_block_kernel(%arg0: i32, %arg1: memref<2x16x16x128xf32, #tpu.memory_space<vmem>>, %arg2: memref<25x128xf32, #tpu.memory_space<vmem>>, %arg3: memref<1x128xf32, #tpu.memory_space<vmem>>, %arg4: memref<2x12x12x128xf32, #tpu.memory_space<vmem>>) attributes {dimension_semantics = [#tpu.dimension_semantics<parallel>], iteration_bounds = array<i64: 2>, scalar_prefetch = 0 : i64, scratch_operands = 0 : i64, tpu.core_type = #tpu.core_type<tc>, window_params = [{transform_indices = @transform_0, window_bounds = array<i64: 2, 16, 16, 128>}, {pipeline_mode = #tpu.pipeline_mode<synchronous>, transform_indices = @transform_1, window_bounds = array<i64: 25, 128>}, {pipeline_mode = #tpu.pipeline_mode<synchronous>, transform_indices = @transform_2, window_bounds = array<i64: 1, 128>}, {transform_indices = @transform_3, window_bounds = array<i64: 2, 12, 12, 128>}]} {
    %c0 = arith.constant 0 : index
    %c0_0 = arith.constant 0 : index
    %0 = vector.load %arg2[%c0, %c0_0] : memref<25x128xf32, #tpu.memory_space<vmem>>, vector<25x128xf32>
    %c0_1 = arith.constant 0 : index
    %c0_2 = arith.constant 0 : index
    %1 = vector.load %arg3[%c0_1, %c0_2] : memref<1x128xf32, #tpu.memory_space<vmem>>, vector<1x128xf32>
    %2 = vector.shape_cast %1 : vector<1x128xf32> to vector<128xf32>
    %c0_i32 = arith.constant 0 : i32
    %c2_i32 = arith.constant 2 : i32
    %3 = arith.addi %c0_i32, %c2_i32 : i32
    %c1_i32 = arith.constant 1 : i32
    scf.for %arg5 = %c0_i32 to %3 step %c1_i32  : i32 {
      %4 = arith.index_cast %arg5 : i32 to index
      %c0_4 = arith.constant 0 : index
      %c0_5 = arith.constant 0 : index
      %c0_6 = arith.constant 0 : index
      %5 = vector.load %arg1[%4, %c0_4, %c0_5, %c0_6] : memref<2x16x16x128xf32, #tpu.memory_space<vmem>>, vector<1x16x16x128xf32>
      %6 = vector.shape_cast %5 : vector<1x16x16x128xf32> to vector<16x16x128xf32>
      %7 = vector.extract_strided_slice %6 {offsets = [0, 0, 0], sizes = [12, 16, 128], strides = [1, 1, 1]} : vector<16x16x128xf32> to vector<12x16x128xf32>
      %8 = vector.extract_strided_slice %0 {offsets = [0, 0], sizes = [1, 128], strides = [1, 1]} : vector<25x128xf32> to vector<1x128xf32>
      %9 = vector.shape_cast %8 : vector<1x128xf32> to vector<128xf32>
      %10 = vector.shape_cast %9 : vector<128xf32> to vector<1x1x128xf32>
      %11 = vector.broadcast %10 : vector<1x1x128xf32> to vector<12x16x128xf32>
      %12 = arith.mulf %7, %11 : vector<12x16x128xf32>
      %13 = vector.extract_strided_slice %6 {offsets = [1, 0, 0], sizes = [12, 16, 128], strides = [1, 1, 1]} : vector<16x16x128xf32> to vector<12x16x128xf32>
      %14 = vector.extract_strided_slice %0 {offsets = [5, 0], sizes = [1, 128], strides = [1, 1]} : vector<25x128xf32> to vector<1x128xf32>
      %15 = vector.shape_cast %14 : vector<1x128xf32> to vector<128xf32>
      %16 = vector.shape_cast %15 : vector<128xf32> to vector<1x1x128xf32>
      %17 = vector.broadcast %16 : vector<1x1x128xf32> to vector<12x16x128xf32>
      %18 = arith.mulf %13, %17 : vector<12x16x128xf32>
      %19 = arith.addf %12, %18 : vector<12x16x128xf32>
      %20 = vector.extract_strided_slice %6 {offsets = [2, 0, 0], sizes = [12, 16, 128], strides = [1, 1, 1]} : vector<16x16x128xf32> to vector<12x16x128xf32>
      %21 = vector.extract_strided_slice %0 {offsets = [10, 0], sizes = [1, 128], strides = [1, 1]} : vector<25x128xf32> to vector<1x128xf32>
      %22 = vector.shape_cast %21 : vector<1x128xf32> to vector<128xf32>
      %23 = vector.shape_cast %22 : vector<128xf32> to vector<1x1x128xf32>
      %24 = vector.broadcast %23 : vector<1x1x128xf32> to vector<12x16x128xf32>
      %25 = arith.mulf %20, %24 : vector<12x16x128xf32>
      %26 = arith.addf %19, %25 : vector<12x16x128xf32>
      %27 = vector.extract_strided_slice %6 {offsets = [3, 0, 0], sizes = [12, 16, 128], strides = [1, 1, 1]} : vector<16x16x128xf32> to vector<12x16x128xf32>
      %28 = vector.extract_strided_slice %0 {offsets = [15, 0], sizes = [1, 128], strides = [1, 1]} : vector<25x128xf32> to vector<1x128xf32>
      %29 = vector.shape_cast %28 : vector<1x128xf32> to vector<128xf32>
      %30 = vector.shape_cast %29 : vector<128xf32> to vector<1x1x128xf32>
      %31 = vector.broadcast %30 : vector<1x1x128xf32> to vector<12x16x128xf32>
      %32 = arith.mulf %27, %31 : vector<12x16x128xf32>
      %33 = arith.addf %26, %32 : vector<12x16x128xf32>
      %34 = vector.extract_strided_slice %6 {offsets = [4, 0, 0], sizes = [12, 16, 128], strides = [1, 1, 1]} : vector<16x16x128xf32> to vector<12x16x128xf32>
      %35 = vector.extract_strided_slice %0 {offsets = [20, 0], sizes = [1, 128], strides = [1, 1]} : vector<25x128xf32> to vector<1x128xf32>
      %36 = vector.shape_cast %35 : vector<1x128xf32> to vector<128xf32>
      %37 = vector.shape_cast %36 : vector<128xf32> to vector<1x1x128xf32>
      %38 = vector.broadcast %37 : vector<1x1x128xf32> to vector<12x16x128xf32>
      %39 = arith.mulf %34, %38 : vector<12x16x128xf32>
      %40 = arith.addf %33, %39 : vector<12x16x128xf32>
      %c15_i32 = arith.constant 15 : i32
      %41 = tpu.dynamic_rotate %6 by %c15_i32 dim 1 : vector<16x16x128xf32>, i32 -> vector<16x16x128xf32>
      %42 = vector.extract_strided_slice %41 {offsets = [0, 0, 0], sizes = [12, 16, 128], strides = [1, 1, 1]} : vector<16x16x128xf32> to vector<12x16x128xf32>
      %43 = vector.extract_strided_slice %0 {offsets = [1, 0], sizes = [1, 128], strides = [1, 1]} : vector<25x128xf32> to vector<1x128xf32>
      %44 = vector.shape_cast %43 : vector<1x128xf32> to vector<128xf32>
      %45 = vector.shape_cast %44 : vector<128xf32> to vector<1x1x128xf32>
      %46 = vector.broadcast %45 : vector<1x1x128xf32> to vector<12x16x128xf32>
      %47 = arith.mulf %42, %46 : vector<12x16x128xf32>
      %48 = arith.addf %40, %47 : vector<12x16x128xf32>
      %49 = vector.extract_strided_slice %41 {offsets = [1, 0, 0], sizes = [12, 16, 128], strides = [1, 1, 1]} : vector<16x16x128xf32> to vector<12x16x128xf32>
      %50 = vector.extract_strided_slice %0 {offsets = [6, 0], sizes = [1, 128], strides = [1, 1]} : vector<25x128xf32> to vector<1x128xf32>
      %51 = vector.shape_cast %50 : vector<1x128xf32> to vector<128xf32>
      %52 = vector.shape_cast %51 : vector<128xf32> to vector<1x1x128xf32>
      %53 = vector.broadcast %52 : vector<1x1x128xf32> to vector<12x16x128xf32>
      %54 = arith.mulf %49, %53 : vector<12x16x128xf32>
      %55 = arith.addf %48, %54 : vector<12x16x128xf32>
      %56 = vector.extract_strided_slice %41 {offsets = [2, 0, 0], sizes = [12, 16, 128], strides = [1, 1, 1]} : vector<16x16x128xf32> to vector<12x16x128xf32>
      %57 = vector.extract_strided_slice %0 {offsets = [11, 0], sizes = [1, 128], strides = [1, 1]} : vector<25x128xf32> to vector<1x128xf32>
      %58 = vector.shape_cast %57 : vector<1x128xf32> to vector<128xf32>
      %59 = vector.shape_cast %58 : vector<128xf32> to vector<1x1x128xf32>
      %60 = vector.broadcast %59 : vector<1x1x128xf32> to vector<12x16x128xf32>
      %61 = arith.mulf %56, %60 : vector<12x16x128xf32>
      %62 = arith.addf %55, %61 : vector<12x16x128xf32>
      %63 = vector.extract_strided_slice %41 {offsets = [3, 0, 0], sizes = [12, 16, 128], strides = [1, 1, 1]} : vector<16x16x128xf32> to vector<12x16x128xf32>
      %64 = vector.extract_strided_slice %0 {offsets = [16, 0], sizes = [1, 128], strides = [1, 1]} : vector<25x128xf32> to vector<1x128xf32>
      %65 = vector.shape_cast %64 : vector<1x128xf32> to vector<128xf32>
      %66 = vector.shape_cast %65 : vector<128xf32> to vector<1x1x128xf32>
      %67 = vector.broadcast %66 : vector<1x1x128xf32> to vector<12x16x128xf32>
      %68 = arith.mulf %63, %67 : vector<12x16x128xf32>
      %69 = arith.addf %62, %68 : vector<12x16x128xf32>
      %70 = vector.extract_strided_slice %41 {offsets = [4, 0, 0], sizes = [12, 16, 128], strides = [1, 1, 1]} : vector<16x16x128xf32> to vector<12x16x128xf32>
      %71 = vector.extract_strided_slice %0 {offsets = [21, 0], sizes = [1, 128], strides = [1, 1]} : vector<25x128xf32> to vector<1x128xf32>
      %72 = vector.shape_cast %71 : vector<1x128xf32> to vector<128xf32>
      %73 = vector.shape_cast %72 : vector<128xf32> to vector<1x1x128xf32>
      %74 = vector.broadcast %73 : vector<1x1x128xf32> to vector<12x16x128xf32>
      %75 = arith.mulf %70, %74 : vector<12x16x128xf32>
      %76 = arith.addf %69, %75 : vector<12x16x128xf32>
      %c15_i32_7 = arith.constant 15 : i32
      %77 = tpu.dynamic_rotate %41 by %c15_i32_7 dim 1 : vector<16x16x128xf32>, i32 -> vector<16x16x128xf32>
      %78 = vector.extract_strided_slice %77 {offsets = [0, 0, 0], sizes = [12, 16, 128], strides = [1, 1, 1]} : vector<16x16x128xf32> to vector<12x16x128xf32>
      %79 = vector.extract_strided_slice %0 {offsets = [2, 0], sizes = [1, 128], strides = [1, 1]} : vector<25x128xf32> to vector<1x128xf32>
      %80 = vector.shape_cast %79 : vector<1x128xf32> to vector<128xf32>
      %81 = vector.shape_cast %80 : vector<128xf32> to vector<1x1x128xf32>
      %82 = vector.broadcast %81 : vector<1x1x128xf32> to vector<12x16x128xf32>
      %83 = arith.mulf %78, %82 : vector<12x16x128xf32>
      %84 = arith.addf %76, %83 : vector<12x16x128xf32>
      %85 = vector.extract_strided_slice %77 {offsets = [1, 0, 0], sizes = [12, 16, 128], strides = [1, 1, 1]} : vector<16x16x128xf32> to vector<12x16x128xf32>
      %86 = vector.extract_strided_slice %0 {offsets = [7, 0], sizes = [1, 128], strides = [1, 1]} : vector<25x128xf32> to vector<1x128xf32>
      %87 = vector.shape_cast %86 : vector<1x128xf32> to vector<128xf32>
      %88 = vector.shape_cast %87 : vector<128xf32> to vector<1x1x128xf32>
      %89 = vector.broadcast %88 : vector<1x1x128xf32> to vector<12x16x128xf32>
      %90 = arith.mulf %85, %89 : vector<12x16x128xf32>
      %91 = arith.addf %84, %90 : vector<12x16x128xf32>
      %92 = vector.extract_strided_slice %77 {offsets = [2, 0, 0], sizes = [12, 16, 128], strides = [1, 1, 1]} : vector<16x16x128xf32> to vector<12x16x128xf32>
      %93 = vector.extract_strided_slice %0 {offsets = [12, 0], sizes = [1, 128], strides = [1, 1]} : vector<25x128xf32> to vector<1x128xf32>
      %94 = vector.shape_cast %93 : vector<1x128xf32> to vector<128xf32>
      %95 = vector.shape_cast %94 : vector<128xf32> to vector<1x1x128xf32>
      %96 = vector.broadcast %95 : vector<1x1x128xf32> to vector<12x16x128xf32>
      %97 = arith.mulf %92, %96 : vector<12x16x128xf32>
      %98 = arith.addf %91, %97 : vector<12x16x128xf32>
      %99 = vector.extract_strided_slice %77 {offsets = [3, 0, 0], sizes = [12, 16, 128], strides = [1, 1, 1]} : vector<16x16x128xf32> to vector<12x16x128xf32>
      %100 = vector.extract_strided_slice %0 {offsets = [17, 0], sizes = [1, 128], strides = [1, 1]} : vector<25x128xf32> to vector<1x128xf32>
      %101 = vector.shape_cast %100 : vector<1x128xf32> to vector<128xf32>
      %102 = vector.shape_cast %101 : vector<128xf32> to vector<1x1x128xf32>
      %103 = vector.broadcast %102 : vector<1x1x128xf32> to vector<12x16x128xf32>
      %104 = arith.mulf %99, %103 : vector<12x16x128xf32>
      %105 = arith.addf %98, %104 : vector<12x16x128xf32>
      %106 = vector.extract_strided_slice %77 {offsets = [4, 0, 0], sizes = [12, 16, 128], strides = [1, 1, 1]} : vector<16x16x128xf32> to vector<12x16x128xf32>
      %107 = vector.extract_strided_slice %0 {offsets = [22, 0], sizes = [1, 128], strides = [1, 1]} : vector<25x128xf32> to vector<1x128xf32>
      %108 = vector.shape_cast %107 : vector<1x128xf32> to vector<128xf32>
      %109 = vector.shape_cast %108 : vector<128xf32> to vector<1x1x128xf32>
      %110 = vector.broadcast %109 : vector<1x1x128xf32> to vector<12x16x128xf32>
      %111 = arith.mulf %106, %110 : vector<12x16x128xf32>
      %112 = arith.addf %105, %111 : vector<12x16x128xf32>
      %c15_i32_8 = arith.constant 15 : i32
      %113 = tpu.dynamic_rotate %77 by %c15_i32_8 dim 1 : vector<16x16x128xf32>, i32 -> vector<16x16x128xf32>
      %114 = vector.extract_strided_slice %113 {offsets = [0, 0, 0], sizes = [12, 16, 128], strides = [1, 1, 1]} : vector<16x16x128xf32> to vector<12x16x128xf32>
      %115 = vector.extract_strided_slice %0 {offsets = [3, 0], sizes = [1, 128], strides = [1, 1]} : vector<25x128xf32> to vector<1x128xf32>
      %116 = vector.shape_cast %115 : vector<1x128xf32> to vector<128xf32>
      %117 = vector.shape_cast %116 : vector<128xf32> to vector<1x1x128xf32>
      %118 = vector.broadcast %117 : vector<1x1x128xf32> to vector<12x16x128xf32>
      %119 = arith.mulf %114, %118 : vector<12x16x128xf32>
      %120 = arith.addf %112, %119 : vector<12x16x128xf32>
      %121 = vector.extract_strided_slice %113 {offsets = [1, 0, 0], sizes = [12, 16, 128], strides = [1, 1, 1]} : vector<16x16x128xf32> to vector<12x16x128xf32>
      %122 = vector.extract_strided_slice %0 {offsets = [8, 0], sizes = [1, 128], strides = [1, 1]} : vector<25x128xf32> to vector<1x128xf32>
      %123 = vector.shape_cast %122 : vector<1x128xf32> to vector<128xf32>
      %124 = vector.shape_cast %123 : vector<128xf32> to vector<1x1x128xf32>
      %125 = vector.broadcast %124 : vector<1x1x128xf32> to vector<12x16x128xf32>
      %126 = arith.mulf %121, %125 : vector<12x16x128xf32>
      %127 = arith.addf %120, %126 : vector<12x16x128xf32>
      %128 = vector.extract_strided_slice %113 {offsets = [2, 0, 0], sizes = [12, 16, 128], strides = [1, 1, 1]} : vector<16x16x128xf32> to vector<12x16x128xf32>
      %129 = vector.extract_strided_slice %0 {offsets = [13, 0], sizes = [1, 128], strides = [1, 1]} : vector<25x128xf32> to vector<1x128xf32>
      %130 = vector.shape_cast %129 : vector<1x128xf32> to vector<128xf32>
      %131 = vector.shape_cast %130 : vector<128xf32> to vector<1x1x128xf32>
      %132 = vector.broadcast %131 : vector<1x1x128xf32> to vector<12x16x128xf32>
      %133 = arith.mulf %128, %132 : vector<12x16x128xf32>
      %134 = arith.addf %127, %133 : vector<12x16x128xf32>
      %135 = vector.extract_strided_slice %113 {offsets = [3, 0, 0], sizes = [12, 16, 128], strides = [1, 1, 1]} : vector<16x16x128xf32> to vector<12x16x128xf32>
      %136 = vector.extract_strided_slice %0 {offsets = [18, 0], sizes = [1, 128], strides = [1, 1]} : vector<25x128xf32> to vector<1x128xf32>
      %137 = vector.shape_cast %136 : vector<1x128xf32> to vector<128xf32>
      %138 = vector.shape_cast %137 : vector<128xf32> to vector<1x1x128xf32>
      %139 = vector.broadcast %138 : vector<1x1x128xf32> to vector<12x16x128xf32>
      %140 = arith.mulf %135, %139 : vector<12x16x128xf32>
      %141 = arith.addf %134, %140 : vector<12x16x128xf32>
      %142 = vector.extract_strided_slice %113 {offsets = [4, 0, 0], sizes = [12, 16, 128], strides = [1, 1, 1]} : vector<16x16x128xf32> to vector<12x16x128xf32>
      %143 = vector.extract_strided_slice %0 {offsets = [23, 0], sizes = [1, 128], strides = [1, 1]} : vector<25x128xf32> to vector<1x128xf32>
      %144 = vector.shape_cast %143 : vector<1x128xf32> to vector<128xf32>
      %145 = vector.shape_cast %144 : vector<128xf32> to vector<1x1x128xf32>
      %146 = vector.broadcast %145 : vector<1x1x128xf32> to vector<12x16x128xf32>
      %147 = arith.mulf %142, %146 : vector<12x16x128xf32>
      %148 = arith.addf %141, %147 : vector<12x16x128xf32>
      %c15_i32_9 = arith.constant 15 : i32
      %149 = tpu.dynamic_rotate %113 by %c15_i32_9 dim 1 : vector<16x16x128xf32>, i32 -> vector<16x16x128xf32>
      %150 = vector.extract_strided_slice %149 {offsets = [0, 0, 0], sizes = [12, 16, 128], strides = [1, 1, 1]} : vector<16x16x128xf32> to vector<12x16x128xf32>
      %151 = vector.extract_strided_slice %0 {offsets = [4, 0], sizes = [1, 128], strides = [1, 1]} : vector<25x128xf32> to vector<1x128xf32>
      %152 = vector.shape_cast %151 : vector<1x128xf32> to vector<128xf32>
      %153 = vector.shape_cast %152 : vector<128xf32> to vector<1x1x128xf32>
      %154 = vector.broadcast %153 : vector<1x1x128xf32> to vector<12x16x128xf32>
      %155 = arith.mulf %150, %154 : vector<12x16x128xf32>
      %156 = arith.addf %148, %155 : vector<12x16x128xf32>
      %157 = vector.extract_strided_slice %149 {offsets = [1, 0, 0], sizes = [12, 16, 128], strides = [1, 1, 1]} : vector<16x16x128xf32> to vector<12x16x128xf32>
      %158 = vector.extract_strided_slice %0 {offsets = [9, 0], sizes = [1, 128], strides = [1, 1]} : vector<25x128xf32> to vector<1x128xf32>
      %159 = vector.shape_cast %158 : vector<1x128xf32> to vector<128xf32>
      %160 = vector.shape_cast %159 : vector<128xf32> to vector<1x1x128xf32>
      %161 = vector.broadcast %160 : vector<1x1x128xf32> to vector<12x16x128xf32>
      %162 = arith.mulf %157, %161 : vector<12x16x128xf32>
      %163 = arith.addf %156, %162 : vector<12x16x128xf32>
      %164 = vector.extract_strided_slice %149 {offsets = [2, 0, 0], sizes = [12, 16, 128], strides = [1, 1, 1]} : vector<16x16x128xf32> to vector<12x16x128xf32>
      %165 = vector.extract_strided_slice %0 {offsets = [14, 0], sizes = [1, 128], strides = [1, 1]} : vector<25x128xf32> to vector<1x128xf32>
      %166 = vector.shape_cast %165 : vector<1x128xf32> to vector<128xf32>
      %167 = vector.shape_cast %166 : vector<128xf32> to vector<1x1x128xf32>
      %168 = vector.broadcast %167 : vector<1x1x128xf32> to vector<12x16x128xf32>
      %169 = arith.mulf %164, %168 : vector<12x16x128xf32>
      %170 = arith.addf %163, %169 : vector<12x16x128xf32>
      %171 = vector.extract_strided_slice %149 {offsets = [3, 0, 0], sizes = [12, 16, 128], strides = [1, 1, 1]} : vector<16x16x128xf32> to vector<12x16x128xf32>
      %172 = vector.extract_strided_slice %0 {offsets = [19, 0], sizes = [1, 128], strides = [1, 1]} : vector<25x128xf32> to vector<1x128xf32>
      %173 = vector.shape_cast %172 : vector<1x128xf32> to vector<128xf32>
      %174 = vector.shape_cast %173 : vector<128xf32> to vector<1x1x128xf32>
      %175 = vector.broadcast %174 : vector<1x1x128xf32> to vector<12x16x128xf32>
      %176 = arith.mulf %171, %175 : vector<12x16x128xf32>
      %177 = arith.addf %170, %176 : vector<12x16x128xf32>
      %178 = vector.extract_strided_slice %149 {offsets = [4, 0, 0], sizes = [12, 16, 128], strides = [1, 1, 1]} : vector<16x16x128xf32> to vector<12x16x128xf32>
      %179 = vector.extract_strided_slice %0 {offsets = [24, 0], sizes = [1, 128], strides = [1, 1]} : vector<25x128xf32> to vector<1x128xf32>
      %180 = vector.shape_cast %179 : vector<1x128xf32> to vector<128xf32>
      %181 = vector.shape_cast %180 : vector<128xf32> to vector<1x1x128xf32>
      %182 = vector.broadcast %181 : vector<1x1x128xf32> to vector<12x16x128xf32>
      %183 = arith.mulf %178, %182 : vector<12x16x128xf32>
      %184 = arith.addf %177, %183 : vector<12x16x128xf32>
      %185 = vector.shape_cast %2 : vector<128xf32> to vector<1x1x128xf32>
      %186 = vector.broadcast %185 : vector<1x1x128xf32> to vector<12x16x128xf32>
      %187 = arith.addf %184, %186 : vector<12x16x128xf32>
      %188 = vector.extract_strided_slice %187 {offsets = [0, 0, 0], sizes = [12, 12, 128], strides = [1, 1, 1]} : vector<12x16x128xf32> to vector<12x12x128xf32>
      %189 = arith.index_cast %arg5 : i32 to index
      %c0_10 = arith.constant 0 : index
      %c0_11 = arith.constant 0 : index
      %c0_12 = arith.constant 0 : index
      %190 = vector.load %arg4[%189, %c0_10, %c0_11, %c0_12] : memref<2x12x12x128xf32, #tpu.memory_space<vmem>>, vector<1x12x12x128xf32>
      %191 = vector.shape_cast %190 : vector<1x12x12x128xf32> to vector<12x12x128xf32>
      %192 = vector.shape_cast %188 : vector<12x12x128xf32> to vector<1x12x12x128xf32>
      tpu.vector_store %arg4[%189, %c0_10, %c0_11, %c0_12], %192 {strides = array<i32>} : memref<2x12x12x128xf32, #tpu.memory_space<vmem>>, vector<1x12x12x128xf32>,
    }
    %c2_i32_3 = arith.constant 2 : i32
    return
  }
  func.func @transform_0(%arg0: i32) -> (i32, i32, i32, i32) {
    %c0_i32 = arith.constant 0 : i32
    %c0_i32_0 = arith.constant 0 : i32
    %c0_i32_1 = arith.constant 0 : i32
    %c0_i32_2 = arith.constant 0 : i32
    return %arg0, %c0_i32, %c0_i32_0, %c0_i32_1 : i32, i32, i32, i32
  }
  func.func @transform_1(%arg0: i32) -> (i32, i32) {
    %c0_i32 = arith.constant 0 : i32
    %c0_i32_0 = arith.constant 0 : i32
    %c0_i32_1 = arith.constant 0 : i32
    return %c0_i32, %c0_i32_0 : i32, i32
  }
  func.func @transform_2(%arg0: i32) -> (i32, i32) {
    %c0_i32 = arith.constant 0 : i32
    %c0_i32_0 = arith.constant 0 : i32
    %c0_i32_1 = arith.constant 0 : i32
    return %c0_i32, %c0_i32_0 : i32, i32
  }
  func.func @transform_3(%arg0: i32) -> (i32, i32, i32, i32) {
    %c0_i32 = arith.constant 0 : i32
    %c0_i32_0 = arith.constant 0 : i32
    %c0_i32_1 = arith.constant 0 : i32
    %c0_i32_2 = arith.constant 0 : i32
    return %arg0, %c0_i32, %c0_i32_0, %c0_i32_1 : i32, i32, i32, i32
  }
}

</mosaic_0001>

<bundles_post_ra>
// kernel: tpu_custom_call.1
= control target key start
LH: loop header
LB: loop body
LE: loop exit
PB: predicated region body
PF: predicated region fallthrough
CT: control target
= control target key end

     0   :  { %8 = vsyncpa [#allocation3], 0  ;;  %s4615_s0 = inlined_call_operand.hbm [shape: f32[4,16,16,128], index: 0, kind: input, shape index: {}]   ;;  %s4616_s1 = inlined_call_operand.hbm [shape: f32[25,128], index: 1, kind: input, shape index: {}]   ;;  %s4617_s2 = inlined_call_operand.vmem [shape: f32[1,128], index: 2, kind: input, shape index: {}]   ;;  %s4618_s3 = inlined_call_operand.vmem [shape: f32[4,12,12,128], index: 3, kind: output, shape index: {}]  }
   0x1   :  { %10 = vsyncpa [#allocation3 + $0x1], 0 }
   0x2   :  { %11 = vsyncpa [#allocation5], 0  ;;  %s2143_s12 = smov 0   ;;  %s2145_s13 = smov 0  }
   0x3   :  { %s2147_s14 = smov 0   ;;  %s2149_s15 = smov 0  }
   0x4 LB: > { %s1935_s16 = sadd.s32 4294967295, %s2113_s15   ;;  %p37_p0 = scmp.ne.s32.totalorder %s2105_s13, %s2101_s12  ;;  %s2113_s15 = sphi %s2149_s15, %s5793_s15   ;;  %s2109_s14 = sphi %s2147_s14, %s5792_s14   ;;  %s2105_s13 = sphi %s2145_s13, %s5791_s13   ;;  %s2101_s12 = sphi %s2143_s12, %s5790_s12  }
   0x5   : > { %p2165_p1 = scmp.eq.s32.totalorder %s1935_s16, 0  ;;  %p1937_p2 = scmp.ge.s32.totalorder %s2113_s15, 1 }
   0x6   : > { %p116_p3 = scmp.lt.s32.totalorder %s2113_s15, 3  ;;  %s2119_s20 = smov [#allocation4]  }
   0x7   : > { %s4936_s17 = scalar_select %p2165_p1, 1, 0 }
   0x8   : > { %p2173_p4 = por %p2165_p1, %p37_p0  ;;  %p2177_p5 = pnand %p1937_p2, %p116_p3 }
   0x9   : > { %s128_s21 = sshll.u32 %s2119_s20, 4  ;;  %s2190_s23 = sadd.s32 1, %s2113_s15   ;;  %s129_s21 = int_to_ptr.vmem [resolvable:$true] %s128_s21 }
   0xa   : > { %s4937_s18 = scalar_select %p2173_p4, 1, 0 }
   0xb   : > { %s4938_s19 = scalar_select %p2177_p5, 1, 0 }
   0xc   : > { %p1963_p6 = pneg %p2177_p5  ;;  %s24_s24 = sadd.s32 1, %s2109_s14 }
   0xd   : > { %s21_s25 = ssub.s32 %s2113_s15, %s2190_s23  ;;  %s2028_s26 = scalar_lea.vmem %s129_s21, 512 }
   0xe   : > { %p2185_p7 = pnand %p1963_p6, %p2165_p1  ;;  %p2029_p9 = scmp.ne.s32.totalorder %s129_s21, %s2028_s26 }
   0xf   : > { %p2036_p12 = scmp.lt.s32.totalorder %s129_s21, %s129_s21  ;;  %p2037_p13 = scmp.lt.s32.totalorder %s2028_s26, %s2028_s26 }
  0x10   : > { %p2019_p8 = pneg %p2185_p7 }
  0x11   : > { %p2038_p0 = por %p2037_p13, %p2036_p12 }
  0x12   : > { %p2031_p10 = pnand %p2029_p9, %p2019_p8 }
  0x14   : > { %p2032_p11 = pneg %p2031_p10 }
  0x16   : > { %p2039_p2 = pnand %p2038_p0, %p2032_p11 }
  0x18   : > { %2042 = shalt.err (!%p2039_p2)
}
  0x19   : > { %s2120_s27 = smov 128   ;;  %s2121_s28 = smov 8  }
  0x1a   : > { %1966 = dma.hbm_to_vmem [thread:$0]  (!%p2185_p7), %s4616_s1, 512, %s129_s21, [#allocation5], %s2120_s27, %s2120_s27, %s2121_s28  }
  0x1b   : > { %p22_p3 = scmp.eq.s32.totalorder %s21_s25, 0  ;;  %p31_p6 = scmp.ne.s32.totalorder %s2109_s14, %s2105_s13 }
  0x1c   : > { %p32_p8 = scmp.eq.s32.totalorder %s2113_s15, 0  ;;  %p1972_p9 = scmp.lt.s32.totalorder %s2113_s15, 2 }
  0x1d   : > { %s2210_s4 = scalar_select %p22_p3, %s2109_s14, %s24_s24  }
  0x1e   : > { %p33_p10 = por %p32_p8, %p31_p6  ;;  %s145_s5 = sand.u32 1, %s2109_s14  }
  0x1f   : > { %s1940_s6 = sshll.u32 %s145_s5, 9  ;;  %s1955_s7 = sshll.u32 %s2113_s15, 13 }
  0x20   : > { %s2217_s10 = scalar_lea.hbm %s4615_s0, %s1955_s7  ;;  %s149_s11 = scalar_lea.vmem [#allocation2], %s1940_s6 }
  0x21   : > { %s157_s12 = sshll.u32 %s149_s11, 4  ;;  %p2221_p7 = pnand %p1972_p9, %p33_p10  ;;  %s2219_s12 = int_to_ptr.vmem [resolvable:$true] %s157_s12 }
  0x22   : > { %s2225_s21 = scalar_lea.sflag [#allocation3], %s145_s5  ;;  %s2043_s22 = scalar_lea.hbm %s2217_s10, 8192 }
  0x23   : > { %p2044_p11 = scmp.ne.s32.totalorder %s2217_s10, %s2043_s22  ;;  %p2045_p12 = pneg %p2221_p7 }
  0x24   : > { %s2048_s26 = scalar_lea.hbm %s4615_s0, 16384  ;;  %p2049_p2 = scmp.lt.s32.totalorder %s2217_s10, %s4615_s0 }
  0x25   : > { %p2046_p13 = pnand %p2045_p12, %p2044_p11  ;;  %p2050_p3 = scmp.lt.s32.totalorder %s2048_s26, %s2043_s22 }
  0x27   : > { %p2047_p0 = pneg %p2046_p13  ;;  %p2051_p6 = por %p2050_p3, %p2049_p2 }
  0x29   : > { %p2052_p8 = pnand %p2051_p6, %p2047_p0 }
  0x2b   : > { %2055 = shalt.err (!%p2052_p8)
}
  0x2c   : > { %s2056_s5 = scalar_lea.vmem %s2219_s12, 8192  ;;  %s2122_s6 = smov [#allocation2]  }
  0x2d   : > { %p2057_p9 = scmp.ne.s32.totalorder %s2219_s12, %s2056_s5  ;;  %s2061_s7 = sshll.u32 %s2122_s6, 4  ;;  %s2062_s7 = int_to_ptr.vmem [resolvable:$false] %s2061_s7 }
  0x2e   : > { %s2063_s8 = scalar_lea.vmem %s2062_s7, 16384  ;;  %p2064_p13 = scmp.lt.s32.totalorder %s2219_s12, %s2062_s7 }
  0x2f   : > { %p2059_p10 = pnand %p2057_p9, %p2045_p12  ;;  %p2065_p1 = scmp.lt.s32.totalorder %s2063_s8, %s2056_s5 }
  0x31   : > { %p2060_p11 = pneg %p2059_p10  ;;  %p2066_p4 = por %p2065_p1, %p2064_p13 }
  0x33   : > { %p2067_p5 = pnand %p2066_p4, %p2060_p11 }
  0x35   : > { %2070 = shalt.err (!%p2067_p5)
}
  0x36   : > { %1970 = dma.hbm_to_vmem [thread:$0]  (!%p2221_p7), %s2217_s10, 8192, %s2219_s12, %s2225_s21, %s2120_s27, %s2120_s27, %s2121_s28  }
  0x37   : > { %p4941_p12 = scmp.ne.s32.totalorder %s4938_s19, 0 }
  0x38   : > { %s171_s9 = sand.u32 (!%p4941_p12), 1, %s2105_s13   ;;  %p4942_p1 = scmp.ne.s32.totalorder (!%p4941_p12), %s4937_s18, 0 }
  0x39   : > { %169 = sbr.rel (%p4941_p12) target bundleno = 487 (0x1e7), region = 32  ;;  %s2252_s11 = sshll.u32 (!%p4941_p12), %s171_s9, 9 }
  0x3a   : > { %s172_s22 = scalar_lea.sflag (!%p4941_p12), [#allocation3], %s171_s9  ;;  %s175_s24 = scalar_lea.vmem (!%p4941_p12), [#allocation2], %s2252_s11 }
  0x3e   : > { %2092 = dma.done.wait (%p4942_p1), %s172_s22, 8192  }
  0x3f   : > { %2094 = vsyncadd (%p4942_p1), %s172_s22, 4294959104  ;;  %p4943_p4 = scmp.ne.s32.totalorder %s4936_s17, 0 }
  0x41   : > { %2096 = dma.done.wait (%p4943_p4), [#allocation5], 512  }
  0x42   : > { %2098 = vsyncadd (%p4943_p4), [#allocation5], 4294966784  ;;  %s1947_s19 = sshll.u32 %s1935_s16, 1  ;;  %v2265_v0 = vld [vmem:[#allocation4] sm:$0xff]  ;;  %v2267_v1 = vld [vmem:[#allocation4 + $0x8] sm:$0xff]  ;;  %s2283_s15 = smov 0  }
  0x43   : > { %p205_p5 = scmp.lt.s32.totalorder %s1947_s19, 3  ;;  %4944 = vst [vmem:[#allocation8_spill] sm:$0xff] %v2265_v0  ;;  %4945 = vst [vmem:[#allocation9_spill] sm:$0xff] %v2267_v1  ;;  %v2269_v2 = vld [vmem:[#allocation4 + $0x10] sm:$0xff]  ;;  %v2276_v3 = vld [vmem:[#allocation4 + $0x18] ss:$0 sm:$0xff] }
  0x44   : > { %4946 = vst [vmem:[#allocation10_spill] sm:$0xff] %v2269_v2  ;;  %4947 = vst [vmem:[#allocation11_spill] sm:$0xff] %v2276_v3  ;;  %v2281_v4 = vld [vmem:[%s4617_s2] ss:$0 sm:$0xff] }
  0x45   : > { %s5795_s19 = smov (!%p205_p5, %s1947_s19), 3  ;;  %4948 = vst [vmem:[#allocation12_spill] sm:$0xff] %v2281_v4 }
  0x46   : > { %s1956_s27 = smul.u32 192, %s5795_s19 }
  0x48   : > { %s2274_s10 = scalar_lea.vmem %s4618_s3, %s1956_s27 }
  0x49 LB: >> { %v256_v5 = vlaneseq  ;;  %s1949_s16 = sshll.u32 %s2117_s15, 8  ;;  %s1821_s21 = smul.u32 192, %s2117_s15  ;;  %s2117_s15 = sphi %s2283_s15, %s221_s15  }
  0x4a   : >> { %v4949_v0 = vld [vmem:[#allocation8_spill] sm:$0xff]  ;;  %v4950_v1 = vld [vmem:[#allocation9_spill] sm:$0xff]  ;;  %s2293_s20 = scalar_lea.vmem %s175_s24, %s1949_s16 [#allocation2]  ;;  %s221_s15 = sadd.s32 1, %s2117_s15  }
  0x4b   : >> { %v2289_v6 = vshrl.u32 %v256_v5, 7  ;;  %v2296_v7 = vld [vmem:[%s2293_s20] sm:$0xff]  ;;  %v2299_v8 = vld [vmem:[%s2293_s20 + $0x8] sm:$0xff]  ;;  %v2302_v9 = vld [vmem:[%s2293_s20 + $0x10] sm:$0xff]  ;;  %s4549_s25 = scalar_lea.vmem %s2274_s10, %s1821_s21  ;;  %p218_p7 = scmp.ge.s32.totalorder %s221_s15, 2  }
  0x4c   : >> { %4952 = vst [vmem:[#allocation14_spill] sm:$0xff] %v2296_v7  ;;  %4953 = vst [vmem:[#allocation15_spill] sm:$0xff] %v2299_v8  ;;  %v2314_v13 = vld [vmem:[%s2293_s20 + $0x18] sm:$0xff]  ;;  %v2317_v14 = vld [vmem:[%s2293_s20 + $0x20] sm:$0xff] }
  0x4d   : >> { %4951 = vst [vmem:[#allocation13_spill] sm:$0xff] %v2289_v6  ;;  %4954 = vst [vmem:[#allocation16_spill] sm:$0xff] %v2302_v9  ;;  %v2305_v10 = vsub.s32 0, %v2289_v6  ;;  %v2308_v11 = vsub.s32 5, %v2289_v6  ;;  %v2311_v12 = vsub.s32 2, %v2289_v6  ;;  %v2320_v15 = vld [vmem:[%s2293_s20 + $0x28] sm:$0xff] }
  0x4e   : >> { %4958 = vst [vmem:[#allocation20_spill] sm:$0xff] %v2314_v13  ;;  %4959 = vst [vmem:[#allocation21_spill] sm:$0xff] %v2317_v14  ;;  %v2323_v16 = vsub.s32 7, %v2289_v6  ;;  %v2326_v17 = vsub.s32 4, %v2289_v6  ;;  %v2330_v19 = vld [vmem:[%s2293_s20 + $0x30] sm:$0xff]  ;;  %v2333_v20 = vld [vmem:[%s2293_s20 + $0x38] sm:$0xff] }
  0x4f   : >> { %4955 = vst [vmem:[#allocation17_spill] sm:$0xff] %v2305_v10  ;;  %4956 = vst [vmem:[#allocation18_spill] sm:$0xff] %v2308_v11  ;;  %v2336_v21 = vld [vmem:[%s2293_s20 + $0x40] sm:$0xff]  ;;  %v259_v22 = vrot.slane %v4949_v0, %v2305_v10  ;;  %v2342_v23 = vrot.slane %v4949_v0, %v2308_v11  ;;  %v2346_v24 = vrot.slane %v4950_v1, %v2311_v12  ;;  %v2350_v26 = vld [vmem:[%s2293_s20 + $0x48] sm:$0xff] }
  0x50   : >> { %4957 = vst [vmem:[#allocation19_spill] sm:$0xff] %v2311_v12  ;;  %4960 = vst [vmem:[#allocation22_spill] sm:$0xff] %v2320_v15  ;;  %v2353_v27 = vld [vmem:[%s2293_s20 + $0x50] sm:$0xff]  ;;  %v2356_v28 = vld [vmem:[%s2293_s20 + $0x58] sm:$0xff]  ;;  %v2360_v29 = vrot.slane %v4950_v1, %v2323_v16 }
  0x51   : >> { %4961 = vst [vmem:[#allocation23_spill] sm:$0xff] %v2323_v16  ;;  %4962 = vst [vmem:[#allocation24_spill] sm:$0xff] %v2326_v17  ;;  %v4971_v2 = vld [vmem:[#allocation10_spill] sm:$0xff]  ;;  %v2369_v33 = vld [vmem:[%s2293_s20 + $0x60] sm:$0xff]  ;;  %v260_v36 = vmul.f32 %v259_v22, %v2296_v7  ;;  %v261_v37 = vmul.f32 %v259_v22, %v2299_v8  ;;  %v262_v38 = vmul.f32 %v259_v22, %v2302_v9 }
  0x52   : >> { %4963 = vst [vmem:[#allocation25_spill] sm:$0xff] %v2330_v19  ;;  %4964 = vst [vmem:[#allocation26_spill] sm:$0xff] %v2333_v20  ;;  %v2364_v30 = vrot.slane %v4971_v2, %v2326_v17  ;;  %v2372_v34 = vld [vmem:[%s2293_s20 + $0x68] sm:$0xff]  ;;  %v2375_v35 = vld [vmem:[%s2293_s20 + $0x70] sm:$0xff]  ;;  %v263_v39 = vmul.f32 %v259_v22, %v2314_v13  ;;  %v264_v43 = vmul.f32 %v259_v22, %v2317_v14 }
  0x53   : >> { %4965 = vst [vmem:[#allocation27_spill] sm:$0xff] %v2336_v21  ;;  %4966 = vst [vmem:[#allocation28_spill] sm:$0xff] %v2346_v24  ;;  %v2382_v40 = vld [vmem:[%s2293_s20 + $0x78] sm:$0xff]  ;;  %v2385_v41 = vld [vmem:[%s2293_s20 + $0x80] sm:$0xff]  ;;  %v265_v44 = vmul.f32 %v259_v22, %v2320_v15  ;;  %v266_v45 = vmul.f32 %v259_v22, %v2330_v19  ;;  %v267_v46 = vmul.f32 %v259_v22, %v2333_v20 }
  0x54   : >> { %4967 = vst [vmem:[#allocation29_spill] sm:$0xff] %v2350_v26  ;;  %4968 = vst [vmem:[#allocation30_spill] sm:$0xff] %v2353_v27  ;;  %v2388_v42 = vld [vmem:[%s2293_s20 + $0x88] sm:$0xff]  ;;  %v2395_v47 = vld [vmem:[%s2293_s20 + $0x90] sm:$0xff]  ;;  %v268_v50 = vmul.f32 %v259_v22, %v2336_v21  ;;  %v269_v51 = vmul.f32 %v259_v22, %v2350_v26  ;;  %v270_v52 = vmul.f32 %v259_v22, %v2353_v27 }
  0x55   : >> { %4969 = vst [vmem:[#allocation31_spill] sm:$0xff] %v2356_v28  ;;  %4970 = vst [vmem:[#allocation32_spill] sm:$0xff] %v2360_v29  ;;  %v2398_v48 = vld [vmem:[%s2293_s20 + $0x98] sm:$0xff]  ;;  %v2401_v49 = vld [vmem:[%s2293_s20 + $0xa0] sm:$0xff]  ;;  %v271_v53 = vmul.f32 %v259_v22, %v2356_v28  ;;  %v272_v57 = vmul.f32 %v259_v22, %v2369_v33  ;;  %v273_v58 = vmul.f32 %v259_v22, %v2372_v34 }
  0x56   : >> { %4972 = vst [vmem:[#allocation33_spill] sm:$0xff] %v2364_v30  ;;  %4973 = vst [vmem:[#allocation34_spill] sm:$0xff] %v2369_v33  ;;  %v2408_v54 = vld [vmem:[%s2293_s20 + $0xa8] sm:$0xff]  ;;  %v2411_v55 = vld [vmem:[%s2293_s20 + $0xb0] sm:$0xff]  ;;  %v274_v59 = vmul.f32 %v259_v22, %v2375_v35  ;;  %v275_v60 = vmul.f32 %v259_v22, %v2382_v40  ;;  %v276_v61 = vmul.f32 %v259_v22, %v2385_v41 }
  0x57   : >> { %4974 = vst [vmem:[#allocation35_spill] sm:$0xff] %v2372_v34  ;;  %4975 = vst [vmem:[#allocation36_spill] sm:$0xff] %v2375_v35  ;;  %v2414_v56 = vld [vmem:[%s2293_s20 + $0xb8] sm:$0xff]  ;;  %v277_v62 = vmul.f32 %v259_v22, %v2388_v42  ;;  %v278_v63 = vmul.f32 %v259_v22, %v2395_v47  ;;  %v279_v5 = vmul.f32 %v259_v22, %v2398_v48  ;;  %v2445_v10 = vld [vmem:[%s2293_s20 + $0xc0] sm:$0xff] }
  0x58   : >> { %4976 = vst [vmem:[#allocation37_spill] sm:$0xff] %v2382_v40  ;;  %4977 = vst [vmem:[#allocation38_spill] sm:$0xff] %v2385_v41  ;;  %v280_v32 = vmul.f32 %v259_v22, %v2401_v49  ;;  %v281_v31 = vmul.f32 %v259_v22, %v2408_v54  ;;  %v282_v25 = vmul.f32 %v259_v22, %v2411_v55  ;;  %v2448_v1 = vld [vmem:[%s2293_s20 + $0xc8] sm:$0xff] }
  0x59   : >> { %4978 = vst [vmem:[#allocation39_spill] sm:$0xff] %v2388_v42  ;;  %4979 = vst [vmem:[#allocation40_spill] sm:$0xff] %v2395_v47  ;;  %v283_v18 = vmul.f32 %v259_v22, %v2414_v56  ;;  %v288_v4 = vmul.f32 %v2342_v23, %v2302_v9  ;;  %v289_v3 = vmul.f32 %v2342_v23, %v2314_v13 }
  0x5a   : >> { %4980 = vst [vmem:[#allocation41_spill] sm:$0xff] %v2398_v48  ;;  %4981 = vst [vmem:[#allocation42_spill] sm:$0xff] %v2401_v49  ;;  %v290_v17 = vmul.f32 %v2342_v23, %v2317_v14  ;;  %v291_v16 = vmul.f32 %v2342_v23, %v2320_v15  ;;  %v292_v12 = vmul.f32 %v2342_v23, %v2330_v19 }
  0x5b   : >> { %4982 = vst [vmem:[#allocation43_spill] sm:$0xff] %v2408_v54  ;;  %4983 = vst [vmem:[#allocation44_spill] sm:$0xff] %v2411_v55  ;;  %v293_v11 = vmul.f32 %v2342_v23, %v2333_v20  ;;  %v294_v22 = vmul.f32 %v2342_v23, %v2336_v21  ;;  %v295_v2 = vmul.f32 %v2342_v23, %v2350_v26 }
  0x5c   : >> { %4984 = vst [vmem:[#allocation45_spill] sm:$0xff] %v2414_v56  ;;  %4985 = vst [vmem:[#allocation46_spill] sm:$0xff] %v2445_v10  ;;  %v296_v0 = vmul.f32 %v2342_v23, %v2353_v27  ;;  %v297_v9 = vmul.f32 %v2342_v23, %v2356_v28  ;;  %v298_v7 = vmul.f32 %v2342_v23, %v2369_v33 }
  0x5d   : >> { %4986 = vst [vmem:[#allocation47_spill] sm:$0xff] %v2448_v1  ;;  %v299_v6 = vmul.f32 %v2342_v23, %v2372_v34  ;;  %v300_v13 = vmul.f32 %v2342_v23, %v2375_v35  ;;  %v301_v8 = vmul.f32 %v2342_v23, %v2382_v40  ;;  %v302_v30 = vmul.f32 %v2342_v23, %v2385_v41 }
  0x5e   : >> { %v303_v29 = vmul.f32 %v2342_v23, %v2388_v42  ;;  %v304_v28 = vmul.f32 %v2342_v23, %v2395_v47  ;;  %v305_v33 = vmul.f32 %v2342_v23, %v2398_v48  ;;  %v306_v34 = vmul.f32 %v2342_v23, %v2401_v49 }
  0x5f   : >> { %v307_v35 = vmul.f32 %v2342_v23, %v2408_v54  ;;  %v308_v40 = vmul.f32 %v2342_v23, %v2411_v55  ;;  %v309_v41 = vmul.f32 %v2342_v23, %v2414_v56  ;;  %v310_v42 = vmul.f32 %v2342_v23, %v2445_v10 }
  0x60   : >> { %v311_v47 = vmul.f32 %v2342_v23, %v2448_v1  ;;  %v312_v27 = vadd.f32 %v288_v4, %v260_v36  ;;  %v313_v48 = vadd.f32 %v289_v3, %v261_v37  ;;  %v314_v26 = vadd.f32 %v290_v17, %v262_v38  ;;  %v4987_v38 = vld [vmem:[#allocation21_spill] sm:$0xff] }
  0x61   : >> { %v315_v21 = vadd.f32 %v291_v16, %v263_v39  ;;  %v316_v49 = vadd.f32 %v292_v12, %v264_v43  ;;  %v317_v20 = vadd.f32 %v293_v11, %v265_v44  ;;  %v318_v19 = vadd.f32 %v294_v22, %v266_v45  ;;  %v2502_v39 = vld [vmem:[%s2293_s20 + $0xd8] sm:$0xff]  ;;  %v5000_v44 = vld [vmem:[#allocation36_spill] sm:$0xff] }
  0x62   : >> { %v319_v54 = vadd.f32 %v295_v2, %v267_v46  ;;  %v320_v15 = vadd.f32 %v296_v0, %v268_v50  ;;  %v321_v24 = vadd.f32 %v297_v9, %v269_v51  ;;  %v322_v55 = vadd.f32 %v298_v7, %v270_v52  ;;  %v4988_v2 = vld [vmem:[#allocation28_spill] sm:$0xff]  ;;  %v4989_v9 = vld [vmem:[#allocation22_spill] sm:$0xff]  ;;  %v4990_v7 = vld [vmem:[#allocation25_spill] sm:$0xff]  ;;  %4997 = vst [vmem:[#allocation48_spill] sm:$0xff] %v2502_v39 }
  0x63   : >> { %v323_v14 = vadd.f32 %v299_v6, %v271_v53  ;;  %v324_v56 = vadd.f32 %v300_v13, %v272_v57  ;;  %v325_v10 = vadd.f32 %v301_v8, %v273_v58  ;;  %v326_v1 = vadd.f32 %v302_v30, %v274_v59  ;;  %v4991_v13 = vld [vmem:[#allocation26_spill] sm:$0xff]  ;;  %v5001_v46 = vld [vmem:[#allocation37_spill] sm:$0xff]  ;;  %v5003_v52 = vld [vmem:[#allocation39_spill] sm:$0xff] }
  0x64   : >> { %v327_v23 = vadd.f32 %v303_v29, %v275_v60  ;;  %v328_v4 = vadd.f32 %v304_v28, %v276_v61  ;;  %v329_v36 = vadd.f32 %v305_v33, %v277_v62  ;;  %v330_v3 = vadd.f32 %v306_v34, %v278_v63  ;;  %v4992_v29 = vld [vmem:[#allocation27_spill] sm:$0xff]  ;;  %v4993_v33 = vld [vmem:[#allocation29_spill] sm:$0xff]  ;;  %v5002_v50 = vld [vmem:[#allocation38_spill] sm:$0xff] }
  0x65   : >> { %v331_v37 = vadd.f32 %v307_v35, %v279_v5  ;;  %v332_v17 = vadd.f32 %v308_v40, %v280_v32  ;;  %v333_v16 = vadd.f32 %v309_v41, %v281_v31  ;;  %v334_v12 = vadd.f32 %v310_v42, %v282_v25  ;;  %v4994_v25 = vld [vmem:[#allocation30_spill] sm:$0xff]  ;;  %v4995_v32 = vld [vmem:[#allocation31_spill] sm:$0xff]  ;;  %v5004_v57 = vld [vmem:[#allocation40_spill] sm:$0xff] }
  0x66   : >> { %v335_v11 = vadd.f32 %v311_v47, %v283_v18  ;;  %v340_v0 = vmul.f32 %v4988_v2, %v4987_v38  ;;  %v341_v6 = vmul.f32 %v4988_v2, %v4989_v9  ;;  %v342_v8 = vmul.f32 %v4988_v2, %v4990_v7  ;;  %v2499_v35 = vld [vmem:[%s2293_s20 + $0xd0] sm:$0xff]  ;;  %v4999_v42 = vld [vmem:[#allocation35_spill] sm:$0xff]  ;;  %v5005_v59 = vld [vmem:[#allocation41_spill] sm:$0xff] }
  0x67   : >> { %v343_v28 = vmul.f32 %v4988_v2, %v4991_v13  ;;  %v344_v30 = vmul.f32 %v4988_v2, %v4992_v29  ;;  %v345_v31 = vmul.f32 %v4988_v2, %v4993_v33  ;;  %v346_v18 = vmul.f32 %v4988_v2, %v4994_v25  ;;  %4996 = vst [vmem:[#allocation28_spill] sm:$0xff] %v2499_v35  ;;  %v4998_v40 = vld [vmem:[#allocation34_spill] sm:$0xff]  ;;  %v5007_v63 = vld [vmem:[#allocation43_spill] sm:$0xff]  ;;  %v5008_v22 = vld [vmem:[#allocation44_spill] sm:$0xff] }
  0x68   : >> { %v347_v34 = vmul.f32 %v4988_v2, %v4995_v32  ;;  %v348_v41 = vmul.f32 %v4988_v2, %v4998_v40  ;;  %v349_v43 = vmul.f32 %v4988_v2, %v4999_v42  ;;  %v350_v45 = vmul.f32 %v4988_v2, %v5000_v44  ;;  %v5006_v61 = vld [vmem:[#allocation42_spill] sm:$0xff]  ;;  %v5009_v9 = vld [vmem:[#allocation45_spill] sm:$0xff]  ;;  %v5011_v44 = vld [vmem:[#allocation47_spill] sm:$0xff] }
  0x69   : >> { %v351_v47 = vmul.f32 %v4988_v2, %v5001_v46  ;;  %v352_v51 = vmul.f32 %v4988_v2, %v5002_v50  ;;  %v353_v53 = vmul.f32 %v4988_v2, %v5003_v52  ;;  %v354_v58 = vmul.f32 %v4988_v2, %v5004_v57  ;;  %v5010_v46 = vld [vmem:[#allocation46_spill] sm:$0xff] }
  0x6a   : >> { %v355_v60 = vmul.f32 %v4988_v2, %v5005_v59  ;;  %v356_v62 = vmul.f32 %v4988_v2, %v5006_v61  ;;  %v357_v5 = vmul.f32 %v4988_v2, %v5007_v63  ;;  %v358_v38 = vmul.f32 %v4988_v2, %v5008_v22 }
  0x6b   : >> { %v359_v50 = vmul.f32 %v4988_v2, %v5009_v9  ;;  %v360_v52 = vmul.f32 %v4988_v2, %v5010_v46  ;;  %v361_v57 = vmul.f32 %v4988_v2, %v5011_v44  ;;  %v362_v59 = vmul.f32 %v4988_v2, %v2499_v35 }
  0x6c   : >> { %v363_v61 = vmul.f32 %v4988_v2, %v2502_v39  ;;  %v364_v42 = vadd.f32 %v340_v0, %v312_v27  ;;  %v365_v63 = vadd.f32 %v341_v6, %v313_v48  ;;  %v366_v40 = vadd.f32 %v342_v8, %v314_v26  ;;  %v5023_v8 = vld [vmem:[#allocation36_spill] sm:$0xff] }
  0x6d   : >> { %v367_v32 = vadd.f32 %v343_v28, %v315_v21  ;;  %v368_v22 = vadd.f32 %v344_v30, %v316_v49  ;;  %v369_v25 = vadd.f32 %v345_v31, %v317_v20  ;;  %v370_v33 = vadd.f32 %v346_v18, %v318_v19  ;;  %v5012_v19 = vld [vmem:[#allocation25_spill] sm:$0xff]  ;;  %v5025_v18 = vld [vmem:[#allocation38_spill] sm:$0xff] }
  0x6e   : >> { %v371_v9 = vadd.f32 %v347_v34, %v319_v54  ;;  %v372_v29 = vadd.f32 %v348_v41, %v320_v15  ;;  %v373_v13 = vadd.f32 %v349_v43, %v321_v24  ;;  %v374_v46 = vadd.f32 %v350_v45, %v322_v55  ;;  %v5013_v54 = vld [vmem:[#allocation32_spill] sm:$0xff]  ;;  %v5014_v24 = vld [vmem:[#allocation26_spill] sm:$0xff]  ;;  %v5015_v55 = vld [vmem:[#allocation27_spill] sm:$0xff] }
  0x6f   : >> { %v375_v7 = vadd.f32 %v351_v47, %v323_v14  ;;  %v376_v44 = vadd.f32 %v352_v51, %v324_v56  ;;  %v377_v35 = vadd.f32 %v353_v53, %v325_v10  ;;  %v378_v2 = vadd.f32 %v354_v58, %v326_v1  ;;  %v5016_v10 = vld [vmem:[#allocation29_spill] sm:$0xff]  ;;  %v5026_v41 = vld [vmem:[#allocation39_spill] sm:$0xff]  ;;  %v5027_v45 = vld [vmem:[#allocation40_spill] sm:$0xff] }
  0x70   : >> { %v379_v39 = vadd.f32 %v355_v60, %v327_v23  ;;  %v380_v0 = vadd.f32 %v356_v62, %v328_v4  ;;  %v381_v27 = vadd.f32 %v357_v5, %v329_v36  ;;  %v382_v6 = vadd.f32 %v358_v38, %v330_v3  ;;  %v5017_v23 = vld [vmem:[#allocation30_spill] sm:$0xff]  ;;  %v5018_v36 = vld [vmem:[#allocation31_spill] sm:$0xff]  ;;  %v2556_v38 = vld [vmem:[%s2293_s20 + $0xe8] sm:$0xff] }
  0x71   : >> { %v383_v48 = vadd.f32 %v359_v50, %v331_v37  ;;  %v384_v26 = vadd.f32 %v360_v52, %v332_v17  ;;  %v385_v21 = vadd.f32 %v361_v57, %v333_v16  ;;  %v386_v49 = vadd.f32 %v362_v59, %v334_v12  ;;  %v5019_v37 = vld [vmem:[#allocation34_spill] sm:$0xff]  ;;  %v5020_v16 = vld [vmem:[#allocation35_spill] sm:$0xff]  ;;  %5022 = vst [vmem:[#allocation49_spill] sm:$0xff] %v2556_v38  ;;  %v5024_v30 = vld [vmem:[#allocation37_spill] sm:$0xff] }
  0x72   : >> { %v387_v20 = vadd.f32 %v363_v61, %v335_v11  ;;  %v392_v15 = vmul.f32 %v5013_v54, %v5012_v19  ;;  %v393_v14 = vmul.f32 %v5013_v54, %v5014_v24  ;;  %v394_v1 = vmul.f32 %v5013_v54, %v5015_v55  ;;  %v2553_v11 = vld [vmem:[%s2293_s20 + $0xe0] sm:$0xff]  ;;  %v5028_v50 = vld [vmem:[#allocation41_spill] sm:$0xff]  ;;  %v5029_v52 = vld [vmem:[#allocation42_spill] sm:$0xff] }
  0x73   : >> { %v395_v56 = vmul.f32 %v5013_v54, %v5016_v10  ;;  %v396_v4 = vmul.f32 %v5013_v54, %v5017_v23  ;;  %v397_v3 = vmul.f32 %v5013_v54, %v5018_v36  ;;  %v398_v17 = vmul.f32 %v5013_v54, %v5019_v37  ;;  %5021 = vst [vmem:[#allocation32_spill] sm:$0xff] %v2553_v11  ;;  %v5030_v57 = vld [vmem:[#allocation43_spill] sm:$0xff]  ;;  %v5031_v59 = vld [vmem:[#allocation44_spill] sm:$0xff]  ;;  %v5032_v61 = vld [vmem:[#allocation45_spill] sm:$0xff] }
  0x74   : >> { %v399_v12 = vmul.f32 %v5013_v54, %v5020_v16  ;;  %v400_v28 = vmul.f32 %v5013_v54, %v5023_v8  ;;  %v401_v31 = vmul.f32 %v5013_v54, %v5024_v30  ;;  %v402_v34 = vmul.f32 %v5013_v54, %v5025_v18  ;;  %v5033_v5 = vld [vmem:[#allocation46_spill] sm:$0xff]  ;;  %v5034_v24 = vld [vmem:[#allocation47_spill] sm:$0xff]  ;;  %v5036_v18 = vld [vmem:[#allocation48_spill] sm:$0xff] }
  0x75   : >> { %v403_v43 = vmul.f32 %v5013_v54, %v5026_v41  ;;  %v404_v47 = vmul.f32 %v5013_v54, %v5027_v45  ;;  %v405_v51 = vmul.f32 %v5013_v54, %v5028_v50  ;;  %v406_v53 = vmul.f32 %v5013_v54, %v5029_v52  ;;  %v5035_v41 = vld [vmem:[#allocation28_spill] sm:$0xff] }
  0x76   : >> { %v407_v58 = vmul.f32 %v5013_v54, %v5030_v57  ;;  %v408_v60 = vmul.f32 %v5013_v54, %v5031_v59  ;;  %v409_v62 = vmul.f32 %v5013_v54, %v5032_v61  ;;  %v410_v19 = vmul.f32 %v5013_v54, %v5033_v5 }
  0x77   : >> { %v411_v45 = vmul.f32 %v5013_v54, %v5034_v24  ;;  %v412_v50 = vmul.f32 %v5013_v54, %v5035_v41  ;;  %v413_v52 = vmul.f32 %v5013_v54, %v5036_v18  ;;  %v414_v57 = vmul.f32 %v5013_v54, %v2553_v11 }
  0x78   : >> { %v415_v59 = vmul.f32 %v5013_v54, %v2556_v38  ;;  %v416_v30 = vadd.f32 %v392_v15, %v364_v42  ;;  %v417_v61 = vadd.f32 %v393_v14, %v365_v63  ;;  %v418_v8 = vadd.f32 %v394_v1, %v366_v40  ;;  %v5047_v1 = vld [vmem:[#allocation38_spill] sm:$0xff] }
  0x79   : >> { %v419_v16 = vadd.f32 %v395_v56, %v367_v32  ;;  %v420_v5 = vadd.f32 %v396_v4, %v368_v22  ;;  %v421_v37 = vadd.f32 %v397_v3, %v369_v25  ;;  %v422_v36 = vadd.f32 %v398_v17, %v370_v33  ;;  %v5037_v33 = vld [vmem:[#allocation27_spill] sm:$0xff]  ;;  %v5049_v17 = vld [vmem:[#allocation40_spill] sm:$0xff] }
  0x7a   : >> { %v423_v24 = vadd.f32 %v399_v12, %v371_v9  ;;  %v424_v23 = vadd.f32 %v400_v28, %v372_v29  ;;  %v425_v10 = vadd.f32 %v401_v31, %v373_v13  ;;  %v426_v41 = vadd.f32 %v402_v34, %v374_v46  ;;  %v5038_v9 = vld [vmem:[#allocation33_spill] sm:$0xff]  ;;  %v5048_v4 = vld [vmem:[#allocation39_spill] sm:$0xff]  ;;  %v5051_v34 = vld [vmem:[#allocation42_spill] sm:$0xff] }
  0x7b   : >> { %v427_v55 = vadd.f32 %v403_v43, %v375_v7  ;;  %v428_v18 = vadd.f32 %v404_v47, %v376_v44  ;;  %v429_v11 = vadd.f32 %v405_v51, %v377_v35  ;;  %v430_v38 = vadd.f32 %v406_v53, %v378_v2  ;;  %v5039_v13 = vld [vmem:[#allocation29_spill] sm:$0xff]  ;;  %v5040_v44 = vld [vmem:[#allocation30_spill] sm:$0xff] }
  0x7c   : >> { %v431_v54 = vadd.f32 %v407_v58, %v379_v39  ;;  %v432_v15 = vadd.f32 %v408_v60, %v380_v0  ;;  %v433_v42 = vadd.f32 %v409_v62, %v381_v27  ;;  %v434_v14 = vadd.f32 %v410_v19, %v382_v6  ;;  %v5041_v39 = vld [vmem:[#allocation31_spill] sm:$0xff]  ;;  %v5042_v2 = vld [vmem:[#allocation34_spill] sm:$0xff]  ;;  %v5050_v28 = vld [vmem:[#allocation41_spill] sm:$0xff] }
  0x7d   : >> { %v435_v63 = vadd.f32 %v411_v45, %v383_v48  ;;  %v436_v40 = vadd.f32 %v412_v50, %v384_v26  ;;  %v437_v32 = vadd.f32 %v413_v52, %v385_v21  ;;  %v438_v22 = vadd.f32 %v414_v57, %v386_v49  ;;  %v5043_v27 = vld [vmem:[#allocation35_spill] sm:$0xff]  ;;  %v5044_v48 = vld [vmem:[#allocation36_spill] sm:$0xff]  ;;  %v5045_v21 = vld [vmem:[#allocation37_spill] sm:$0xff] }
  0x7e   : >> { %v439_v25 = vadd.f32 %v415_v59, %v387_v20  ;;  %v444_v29 = vmul.f32 %v5038_v9, %v5037_v33  ;;  %v445_v7 = vmul.f32 %v5038_v9, %v5039_v13  ;;  %v446_v35 = vmul.f32 %v5038_v9, %v5040_v44  ;;  %v2607_v20 = vld [vmem:[%s2293_s20 + $0xf0] sm:$0xff]  ;;  %v2610_v19 = vld [vmem:[%s2293_s20 + $0xf8] sm:$0xff]  ;;  %v5053_v50 = vld [vmem:[#allocation44_spill] sm:$0xff] }
  0x7f   : >> { %v447_v46 = vmul.f32 %v5038_v9, %v5041_v39  ;;  %v448_v0 = vmul.f32 %v5038_v9, %v5042_v2  ;;  %v449_v6 = vmul.f32 %v5038_v9, %v5043_v27  ;;  %v450_v26 = vmul.f32 %v5038_v9, %v5044_v48  ;;  %5046 = vst [vmem:[#allocation27_spill] sm:$0xff] %v2607_v20  ;;  %v5052_v45 = vld [vmem:[#allocation43_spill] sm:$0xff]  ;;  %v5054_v52 = vld [vmem:[#allocation45_spill] sm:$0xff]  ;;  %v5055_v57 = vld [vmem:[#allocation46_spill] sm:$0xff] }
  0x80   : >> { %v451_v49 = vmul.f32 %v5038_v9, %v5045_v21  ;;  %v452_v56 = vmul.f32 %v5038_v9, %v5047_v1  ;;  %v453_v3 = vmul.f32 %v5038_v9, %v5048_v4  ;;  %v454_v12 = vmul.f32 %v5038_v9, %v5049_v17  ;;  %v5056_v59 = vld [vmem:[#allocation47_spill] sm:$0xff]  ;;  %v5057_v62 = vld [vmem:[#allocation28_spill] sm:$0xff]  ;;  %v5060_v39 = vld [vmem:[#allocation49_spill] sm:$0xff] }
  0x81   : >> { %v455_v31 = vmul.f32 %v5038_v9, %v5050_v28  ;;  %v456_v43 = vmul.f32 %v5038_v9, %v5051_v34  ;;  %v457_v47 = vmul.f32 %v5038_v9, %v5052_v45  ;;  %v458_v51 = vmul.f32 %v5038_v9, %v5053_v50  ;;  %v5058_v4 = vld [vmem:[#allocation48_spill] sm:$0xff] }
  0x82   : >> { %v459_v53 = vmul.f32 %v5038_v9, %v5054_v52  ;;  %v460_v58 = vmul.f32 %v5038_v9, %v5055_v57  ;;  %v461_v60 = vmul.f32 %v5038_v9, %v5056_v59  ;;  %v462_v28 = vmul.f32 %v5038_v9, %v5057_v62  ;;  %v5059_v27 = vld [vmem:[#allocation32_spill] sm:$0xff] }
  0x83   : >> { %v463_v21 = vmul.f32 %v5038_v9, %v5058_v4  ;;  %v464_v45 = vmul.f32 %v5038_v9, %v5059_v27  ;;  %v465_v13 = vmul.f32 %v5038_v9, %v5060_v39  ;;  %v466_v52 = vmul.f32 %v5038_v9, %v2607_v20 }
  0x84   : >> { %v467_v57 = vmul.f32 %v5038_v9, %v2610_v19  ;;  %v2644_v50 = vadd.f32 %v444_v29, %v416_v30  ;;  %v2646_v59 = vadd.f32 %v445_v7, %v417_v61  ;;  %v2648_v62 = vadd.f32 %v446_v35, %v418_v8 }
  0x85   : >> { %v2650_v34 = vadd.f32 %v447_v46, %v419_v16  ;;  %v2652_v4 = vadd.f32 %v448_v0, %v420_v5  ;;  %v2654_v27 = vadd.f32 %v449_v6, %v421_v37  ;;  %v2656_v17 = vadd.f32 %v450_v26, %v422_v36  ;;  %v5082_v0 = vld [vmem:[#allocation32_spill] sm:$0xff]  ;;  %v5084_v26 = vld [vmem:[#allocation15_spill] sm:$0xff] }
  0x86   : >> { %v2658_v39 = vadd.f32 %v451_v49, %v423_v24  ;;  %v2660_v20 = vadd.f32 %v452_v56, %v424_v23  ;;  %v2662_v1 = vadd.f32 %v453_v3, %v425_v10  ;;  %v2664_v30 = vadd.f32 %v454_v12, %v426_v41  ;;  %v5083_v6 = vld [vmem:[#allocation27_spill] sm:$0xff]  ;;  %v5086_v49 = vld [vmem:[#allocation22_spill] sm:$0xff] }
  0x87   : >> { %v2666_v61 = vadd.f32 %v455_v31, %v427_v55  ;;  %v2668_v8 = vadd.f32 %v456_v43, %v428_v18  ;;  %v2670_v16 = vadd.f32 %v457_v47, %v429_v11  ;;  %v2672_v5 = vadd.f32 %v458_v51, %v430_v38  ;;  %v5087_v3 = vld [vmem:[#allocation26_spill] sm:$0xff]  ;;  %v5089_v43 = vld [vmem:[#allocation31_spill] sm:$0xff] }
  0x88   : >> { %5061 = vst [vmem:[#allocation33_spill] sm:$0xff] %v2662_v1  ;;  %5062 = vst [vmem:[#allocation30_spill] sm:$0xff] %v2664_v30  ;;  %v2674_v37 = vadd.f32 %v459_v53, %v431_v54  ;;  %v2676_v36 = vadd.f32 %v460_v58, %v432_v15  ;;  %v2678_v24 = vadd.f32 %v461_v60, %v433_v42  ;;  %v496_v38 = vrot.slane %v5037_v33, 1  ;;  %v5090_v47 = vld [vmem:[#allocation35_spill] sm:$0xff]  ;;  %v5093_v60 = vld [vmem:[#allocation41_spill] sm:$0xff] }
  0x89   : >> { %5063 = vst [vmem:[#allocation34_spill] sm:$0xff] %v2666_v61  ;;  %5064 = vst [vmem:[#allocation36_spill] sm:$0xff] %v2668_v8  ;;  %v2680_v23 = vadd.f32 %v462_v28, %v434_v14  ;;  %v2682_v10 = vadd.f32 %v463_v21, %v435_v63  ;;  %v2684_v41 = vadd.f32 %v464_v45, %v436_v40  ;;  %v497_v54 = vrot.slane %v5040_v44, 1  ;;  %v5076_v14 = vld [vmem:[#allocation38_spill] sm:$0xff]  ;;  %v5077_v63 = vld [vmem:[#allocation40_spill] sm:$0xff] }
  0x8a   : >> { %5065 = vst [vmem:[#allocation50_spill] sm:$0xff] %v2670_v16  ;;  %5066 = vst [vmem:[#allocation51_spill] sm:$0xff] %v2672_v5  ;;  %v2686_v55 = vadd.f32 %v465_v13, %v437_v32  ;;  %v2688_v18 = vadd.f32 %v466_v52, %v438_v22  ;;  %v2690_v11 = vadd.f32 %v467_v57, %v439_v25  ;;  %v498_v15 = vrot.slane %v5042_v2, 1  ;;  %v5078_v40 = vld [vmem:[#allocation42_spill] sm:$0xff]  ;;  %v5079_v32 = vld [vmem:[#allocation44_spill] sm:$0xff] }
  0x8b   : >> { %5067 = vst [vmem:[#allocation52_spill] sm:$0xff] %v2674_v37  ;;  %5068 = vst [vmem:[#allocation53_spill] sm:$0xff] %v2676_v36  ;;  %v499_v42 = vrot.slane %v5044_v48, 1  ;;  %v500_v9 = vrot.slane %v5076_v14, 1  ;;  %v501_v29 = vrot.slane %v5077_v63, 1  ;;  %v502_v7 = vrot.slane %v5078_v40, 1 }
  0x8c   : >> { %5069 = vst [vmem:[#allocation54_spill] sm:$0xff] %v2678_v24  ;;  %5070 = vst [vmem:[#allocation55_spill] sm:$0xff] %v2680_v23  ;;  %v503_v13 = vrot.slane %v5079_v32, 1  ;;  %v5080_v22 = vld [vmem:[#allocation46_spill] sm:$0xff]  ;;  %v5081_v25 = vld [vmem:[#allocation28_spill] sm:$0xff]  ;;  %v506_v33 = vrot.slane %v5082_v0, 1 }
  0x8d   : >> { %5071 = vst [vmem:[#allocation56_spill] sm:$0xff] %v2682_v10  ;;  %5072 = vst [vmem:[#allocation57_spill] sm:$0xff] %v2684_v41  ;;  %v504_v35 = vrot.slane %v5080_v22, 1  ;;  %v505_v46 = vrot.slane %v5081_v25, 1  ;;  %v507_v44 = vrot.slane %v5083_v6, 1  ;;  %v508_v2 = vrot.slane %v5084_v26, 1 }
  0x8e   : >> { %5073 = vst [vmem:[#allocation58_spill] sm:$0xff] %v2686_v55  ;;  %5074 = vst [vmem:[#allocation59_spill] sm:$0xff] %v2688_v18  ;;  %v5085_v21 = vld [vmem:[#allocation20_spill] sm:$0xff]  ;;  %v510_v56 = vrot.slane %v5086_v49, 1  ;;  %v511_v12 = vrot.slane %v5087_v3, 1  ;;  %v5088_v28 = vld [vmem:[#allocation29_spill] sm:$0xff] }
  0x8f   : >> { %5075 = vst [vmem:[#allocation60_spill] sm:$0xff] %v2690_v11  ;;  %v509_v48 = vrot.slane %v5085_v21, 1  ;;  %v512_v31 = vrot.slane %v5088_v28, 1  ;;  %v513_v45 = vrot.slane %v5089_v43, 1  ;;  %v514_v51 = vrot.slane %v5090_v47, 1  ;;  %v5091_v52 = vld [vmem:[#allocation37_spill] sm:$0xff] }
  0x90   : >> { %v515_v53 = vrot.slane %v5091_v52, 1  ;;  %v5092_v57 = vld [vmem:[#allocation39_spill] sm:$0xff]  ;;  %v517_v14 = vrot.slane %v5093_v60, 1  ;;  %v5095_v32 = vld [vmem:[#allocation45_spill] sm:$0xff]  ;;  %v5097_v6 = vld [vmem:[#allocation48_spill] sm:$0xff]  ;;  %v523_v3 = vrot.slane %v2610_v19, 1 }
  0x91   : >> { %v516_v58 = vrot.slane %v5092_v57, 1  ;;  %v5094_v63 = vld [vmem:[#allocation43_spill] sm:$0xff]  ;;  %v519_v22 = vrot.slane %v5095_v32, 1  ;;  %v521_v26 = vrot.slane %v5097_v6, 1  ;;  %v5098_v21 = vld [vmem:[#allocation49_spill] sm:$0xff]  ;;  %v5103_v57 = vld [vmem:[#allocation14_spill] sm:$0xff] }
  0x92   : >> { %v518_v40 = vrot.slane %v5094_v63, 1  ;;  %v5096_v25 = vld [vmem:[#allocation47_spill] sm:$0xff]  ;;  %v522_v49 = vrot.slane %v5098_v21, 1  ;;  %v5099_v28 = vld [vmem:[#allocation13_spill] sm:$0xff]  ;;  %v5104_v60 = vrot.slane %v5103_v57, 1  ;;  %v5106_v32 = vld [vmem:[#allocation16_spill] sm:$0xff] }
  0x93   : >> { %v520_v0 = vrot.slane %v5096_v25, 1  ;;  %vm526_vm0 = vcmp.lt.s32.totalorder %v5099_v28, 7  ;;  %v2722_v43 = vsub.s32 1, %v5099_v28  ;;  %v2725_v47 = vsub.s32 6, %v5099_v28  ;;  %v5109_v6 = vld [vmem:[#allocation21_spill] sm:$0xff] }
  0x94   : >> { %v2728_v52 = vsub.s32 3, %v5099_v28  ;;  %v2734_v63 = vsel %vm526_vm0, %v5104_v60, %v508_v2  ;;  %v5107_v25 = vrot.slane %v5106_v32, 1  ;;  %v5110_v21 = vrot.slane %v5109_v6, 1  ;;  %v5112_v18 = vld [vmem:[#allocation25_spill] sm:$0xff] }
  0x95   : >> { %5100 = vst [vmem:[#allocation38_spill] sm:$0xff] %v2722_v43  ;;  %5101 = vst [vmem:[#allocation40_spill] sm:$0xff] %v2725_v47  ;;  %v5113_v55 = vrot.slane %v5112_v18, 1  ;;  %v2756_v60 = vsel %vm526_vm0, %v496_v38, %v512_v31  ;;  %v2764_v10 = vsel %vm526_vm0, %v498_v15, %v514_v51  ;;  %v2776_v23 = vsel %vm526_vm0, %v501_v29, %v517_v14 }
  0x96   : >> { %5102 = vst [vmem:[#allocation42_spill] sm:$0xff] %v2728_v52  ;;  %5105 = vst [vmem:[#allocation44_spill] sm:$0xff] %v2734_v63  ;;  %v2740_v19 = vsel %vm526_vm0, %v5107_v25, %v509_v48  ;;  %v2746_v11 = vsel %vm526_vm0, %v5110_v21, %v510_v56  ;;  %v2760_v25 = vsel %vm526_vm0, %v497_v54, %v513_v45  ;;  %v5127_v61 = vrot.slane %v5103_v57, 1 }
  0x97   : >> { %5108 = vst [vmem:[#allocation46_spill] sm:$0xff] %v2740_v19  ;;  %5111 = vst [vmem:[#allocation28_spill] sm:$0xff] %v2746_v11  ;;  %v2752_v41 = vsel %vm526_vm0, %v5113_v55, %v511_v12  ;;  %v2768_v21 = vsel %vm526_vm0, %v499_v42, %v515_v53  ;;  %v2772_v55 = vsel %vm526_vm0, %v500_v9, %v516_v58 }
  0x98   : >> { %5114 = vst [vmem:[#allocation32_spill] sm:$0xff] %v2752_v41  ;;  %5115 = vst [vmem:[#allocation27_spill] sm:$0xff] %v2756_v60  ;;  %v2780_v24 = vsel %vm526_vm0, %v502_v7, %v518_v40  ;;  %v2784_v36 = vsel %vm526_vm0, %v503_v13, %v519_v22  ;;  %v2788_v37 = vsel %vm526_vm0, %v504_v35, %v520_v0 }
  0x99   : >> { %5116 = vst [vmem:[#allocation15_spill] sm:$0xff] %v2760_v25  ;;  %5117 = vst [vmem:[#allocation20_spill] sm:$0xff] %v2764_v10  ;;  %v2792_v5 = vsel %vm526_vm0, %v505_v46, %v521_v26  ;;  %v2796_v16 = vsel %vm526_vm0, %v506_v33, %v522_v49  ;;  %v2800_v8 = vsel %vm526_vm0, %v507_v44, %v523_v3 }
  0x9a   : >> { %5118 = vst [vmem:[#allocation22_spill] sm:$0xff] %v2768_v21  ;;  %5119 = vst [vmem:[#allocation26_spill] sm:$0xff] %v2772_v55  ;;  %v2806_v30 = vsel %vm526_vm0, %v508_v2, %v5127_v61  ;;  %v2828_v61 = vsel %vm526_vm0, %v512_v31, %v496_v38  ;;  %v2836_v2 = vsel %vm526_vm0, %v514_v51, %v498_v15 }
  0x9b   : >> { %5120 = vst [vmem:[#allocation29_spill] sm:$0xff] %v2776_v23  ;;  %5121 = vst [vmem:[#allocation31_spill] sm:$0xff] %v2780_v24  ;;  %v2852_v38 = vsel %vm526_vm0, %v518_v40, %v502_v7  ;;  %v2860_v15 = vsel %vm526_vm0, %v520_v0, %v504_v35  ;;  %v5147_v7 = vld [vmem:[#allocation8_spill] sm:$0xff]  ;;  %v5148_v35 = vld [vmem:[#allocation9_spill] sm:$0xff] }
  0x9c   : >> { %5122 = vst [vmem:[#allocation35_spill] sm:$0xff] %v2784_v36  ;;  %5123 = vst [vmem:[#allocation37_spill] sm:$0xff] %v2788_v37  ;;  %v5129_v37 = vrot.slane %v5106_v32, 1 }
  0x9d   : >> { %5124 = vst [vmem:[#allocation39_spill] sm:$0xff] %v2792_v5  ;;  %5125 = vst [vmem:[#allocation41_spill] sm:$0xff] %v2796_v16  ;;  %v5131_v5 = vrot.slane %v5109_v6, 1 }
  0x9e   : >> { %5126 = vst [vmem:[#allocation43_spill] sm:$0xff] %v2800_v8  ;;  %5128 = vst [vmem:[#allocation45_spill] sm:$0xff] %v2806_v30  ;;  %v2812_v1 = vsel %vm526_vm0, %v509_v48, %v5129_v37  ;;  %v5133_v8 = vrot.slane %v5112_v18, 1  ;;  %v2832_v37 = vsel %vm526_vm0, %v513_v45, %v497_v54  ;;  %v2848_v18 = vsel %vm526_vm0, %v517_v14, %v501_v29 }
  0x9f   : >> { %5130 = vst [vmem:[#allocation47_spill] sm:$0xff] %v2812_v1  ;;  %v2818_v16 = vsel %vm526_vm0, %v510_v56, %v5131_v5  ;;  %5135 = vst [vmem:[#allocation14_spill] sm:$0xff] %v2828_v61  ;;  %v2840_v5 = vsel %vm526_vm0, %v515_v53, %v499_v42  ;;  %v2856_v54 = vsel %vm526_vm0, %v519_v22, %v503_v13 }
  0xa0   : >> { %5132 = vst [vmem:[#allocation48_spill] sm:$0xff] %v2818_v16  ;;  %v2824_v57 = vsel %vm526_vm0, %v511_v12, %v5133_v8  ;;  %5136 = vst [vmem:[#allocation16_spill] sm:$0xff] %v2832_v37  ;;  %v2844_v8 = vsel %vm526_vm0, %v516_v58, %v500_v9  ;;  %v2864_v42 = vsel %vm526_vm0, %v521_v26, %v505_v46  ;;  %v5150_v46 = vld [vmem:[#allocation17_spill] sm:$0xff]  ;;  %v5151_v12 = vld [vmem:[#allocation10_spill] sm:$0xff] }
  0xa1   : >> { %5134 = vst [vmem:[#allocation49_spill] sm:$0xff] %v2824_v57  ;;  %5137 = vst [vmem:[#allocation21_spill] sm:$0xff] %v2836_v2  ;;  %v2868_v9 = vsel %vm526_vm0, %v522_v49, %v506_v33  ;;  %v2872_v29 = vsel %vm526_vm0, %v523_v3, %v507_v44  ;;  %v562_v13 = vrot.slane %v5147_v7, %v2722_v43  ;;  %v5153_v33 = vld [vmem:[#allocation18_spill] sm:$0xff] }
  0xa2   : >> { %5138 = vst [vmem:[#allocation25_spill] sm:$0xff] %v2840_v5  ;;  %5139 = vst [vmem:[#allocation61_spill] sm:$0xff] %v2844_v8  ;;  %v2878_v48 = vrot.slane %v5147_v7, %v2725_v47  ;;  %v2882_v56 = vrot.slane %v5148_v35, %v2728_v52  ;;  %v2886_v31 = vrot.slane %v5151_v12, %v5150_v46 }
  0xa3   : >> { %5140 = vst [vmem:[#allocation62_spill] sm:$0xff] %v2848_v18  ;;  %5141 = vst [vmem:[#allocation63_spill] sm:$0xff] %v2852_v38  ;;  %v2890_v45 = vrot.slane %v5151_v12, %v5153_v33  ;;  %v563_v58 = vmul.f32 %v562_v13, %v2734_v63  ;;  %v564_v14 = vmul.f32 %v562_v13, %v2806_v30 }
  0xa4   : >> { %5142 = vst [vmem:[#allocation64_spill] sm:$0xff] %v2856_v54  ;;  %5143 = vst [vmem:[#allocation65_spill] sm:$0xff] %v2860_v15  ;;  %v565_v40 = vmul.f32 %v562_v13, %v2740_v19  ;;  %v566_v22 = vmul.f32 %v562_v13, %v2812_v1  ;;  %v567_v0 = vmul.f32 %v562_v13, %v2746_v11 }
  0xa5   : >> { %5144 = vst [vmem:[#allocation66_spill] sm:$0xff] %v2864_v42  ;;  %5145 = vst [vmem:[#allocation67_spill] sm:$0xff] %v2868_v9  ;;  %v568_v26 = vmul.f32 %v562_v13, %v2818_v16  ;;  %v569_v49 = vmul.f32 %v562_v13, %v2752_v41  ;;  %v570_v3 = vmul.f32 %v562_v13, %v2824_v57 }
  0xa6   : >> { %5146 = vst [vmem:[#allocation68_spill] sm:$0xff] %v2872_v29  ;;  %5149 = vst [vmem:[#allocation69_spill] sm:$0xff] %v2882_v56  ;;  %v571_v32 = vmul.f32 %v562_v13, %v2756_v60  ;;  %v572_v6 = vmul.f32 %v562_v13, %v2828_v61  ;;  %v573_v53 = vmul.f32 %v562_v13, %v2760_v25 }
  0xa7   : >> { %5152 = vst [vmem:[#allocation70_spill] sm:$0xff] %v2886_v31  ;;  %5154 = vst [vmem:[#allocation71_spill] sm:$0xff] %v2890_v45  ;;  %v574_v51 = vmul.f32 %v562_v13, %v2832_v37  ;;  %v575_v44 = vmul.f32 %v562_v13, %v2764_v10  ;;  %v576_v33 = vmul.f32 %v562_v13, %v2836_v2 }
  0xa8   : >> { %v577_v46 = vmul.f32 %v562_v13, %v2768_v21  ;;  %v578_v52 = vmul.f32 %v562_v13, %v2840_v5  ;;  %v579_v47 = vmul.f32 %v562_v13, %v2772_v55  ;;  %v580_v12 = vmul.f32 %v562_v13, %v2844_v8 }
  0xa9   : >> { %v581_v43 = vmul.f32 %v562_v13, %v2776_v23  ;;  %v582_v35 = vmul.f32 %v562_v13, %v2848_v18  ;;  %v583_v7 = vmul.f32 %v562_v13, %v2780_v24  ;;  %v584_v28 = vmul.f32 %v562_v13, %v2852_v38  ;;  %v5155_v24 = vld [vmem:[#allocation33_spill] sm:$0xff] }
  0xaa   : >> { %v585_v63 = vmul.f32 %v562_v13, %v2784_v36  ;;  %v586_v30 = vmul.f32 %v562_v13, %v2856_v54  ;;  %v587_v29 = vadd.f32 %v563_v58, %v2644_v50  ;;  %v588_v45 = vadd.f32 %v564_v14, %v2646_v59  ;;  %v5156_v54 = vld [vmem:[#allocation30_spill] sm:$0xff]  ;;  %v5158_v14 = vld [vmem:[#allocation36_spill] sm:$0xff] }
  0xab   : >> { %v589_v9 = vadd.f32 %v565_v40, %v2648_v62  ;;  %v590_v31 = vadd.f32 %v566_v22, %v2650_v34  ;;  %v591_v42 = vadd.f32 %v567_v0, %v2652_v4  ;;  %v592_v56 = vadd.f32 %v568_v26, %v2654_v27  ;;  %v5157_v58 = vld [vmem:[#allocation34_spill] sm:$0xff]  ;;  %v5160_v22 = vld [vmem:[#allocation51_spill] sm:$0xff]  ;;  %v5161_v0 = vld [vmem:[#allocation52_spill] sm:$0xff] }
  0xac   : >> { %v593_v15 = vadd.f32 %v569_v49, %v2656_v17  ;;  %v594_v38 = vadd.f32 %v570_v3, %v2658_v39  ;;  %v595_v36 = vadd.f32 %v571_v32, %v2660_v20  ;;  %v596_v13 = vadd.f32 %v572_v6, %v5155_v24  ;;  %v5159_v40 = vld [vmem:[#allocation50_spill] sm:$0xff]  ;;  %v5162_v26 = vld [vmem:[#allocation53_spill] sm:$0xff]  ;;  %v5164_v3 = vld [vmem:[#allocation55_spill] sm:$0xff] }
  0xad   : >> { %v597_v50 = vadd.f32 %v573_v53, %v5156_v54  ;;  %v598_v59 = vadd.f32 %v574_v51, %v5157_v58  ;;  %v599_v62 = vadd.f32 %v575_v44, %v5158_v14  ;;  %v600_v34 = vadd.f32 %v576_v33, %v5159_v40  ;;  %v5163_v49 = vld [vmem:[#allocation54_spill] sm:$0xff]  ;;  %v5165_v32 = vld [vmem:[#allocation56_spill] sm:$0xff]  ;;  %v5166_v6 = vld [vmem:[#allocation57_spill] sm:$0xff] }
  0xae   : >> { %v601_v4 = vadd.f32 %v577_v46, %v5160_v22  ;;  %v602_v27 = vadd.f32 %v578_v52, %v5161_v0  ;;  %v603_v17 = vadd.f32 %v579_v47, %v5162_v26  ;;  %v604_v39 = vadd.f32 %v580_v12, %v5163_v49  ;;  %v5167_v53 = vld [vmem:[#allocation58_spill] sm:$0xff]  ;;  %v5168_v58 = vld [vmem:[#allocation59_spill] sm:$0xff]  ;;  %v5169_v14 = vld [vmem:[#allocation60_spill] sm:$0xff] }
  0xaf   : >> { %v605_v20 = vadd.f32 %v581_v43, %v5164_v3  ;;  %v606_v24 = vadd.f32 %v582_v35, %v5165_v32  ;;  %v607_v54 = vadd.f32 %v583_v7, %v5166_v6  ;;  %v608_v51 = vadd.f32 %v584_v28, %v5167_v53  ;;  %v5170_v53 = vld [vmem:[#allocation31_spill] sm:$0xff] }
  0xb0   : >> { %v609_v44 = vadd.f32 %v585_v63, %v5168_v58  ;;  %v610_v33 = vadd.f32 %v586_v30, %v5169_v14  ;;  %v615_v46 = vmul.f32 %v2878_v48, %v2740_v19  ;;  %v616_v47 = vmul.f32 %v2878_v48, %v2812_v1  ;;  %v5171_v14 = vld [vmem:[#allocation63_spill] sm:$0xff] }
  0xb1   : >> { %v617_v52 = vmul.f32 %v2878_v48, %v2746_v11  ;;  %v618_v43 = vmul.f32 %v2878_v48, %v2818_v16  ;;  %v619_v7 = vmul.f32 %v2878_v48, %v2752_v41  ;;  %v620_v28 = vmul.f32 %v2878_v48, %v2824_v57  ;;  %v5172_v1 = vld [vmem:[#allocation35_spill] sm:$0xff] }
  0xb2   : >> { %v621_v30 = vmul.f32 %v2878_v48, %v2756_v60  ;;  %v622_v63 = vmul.f32 %v2878_v48, %v2828_v61  ;;  %v623_v35 = vmul.f32 %v2878_v48, %v2760_v25  ;;  %v624_v12 = vmul.f32 %v2878_v48, %v2832_v37 }
  0xb3   : >> { %v625_v40 = vmul.f32 %v2878_v48, %v2764_v10  ;;  %v626_v22 = vmul.f32 %v2878_v48, %v2836_v2  ;;  %v627_v0 = vmul.f32 %v2878_v48, %v2768_v21  ;;  %v628_v26 = vmul.f32 %v2878_v48, %v2840_v5  ;;  %v5173_v21 = vld [vmem:[#allocation64_spill] sm:$0xff]  ;;  %v5174_v2 = vld [vmem:[#allocation37_spill] sm:$0xff] }
  0xb4   : >> { %v629_v49 = vmul.f32 %v2878_v48, %v2772_v55  ;;  %v630_v3 = vmul.f32 %v2878_v48, %v2844_v8  ;;  %v631_v32 = vmul.f32 %v2878_v48, %v2776_v23  ;;  %v632_v6 = vmul.f32 %v2878_v48, %v2848_v18  ;;  %v5175_v10 = vld [vmem:[#allocation65_spill] sm:$0xff] }
  0xb5   : >> { %v633_v58 = vmul.f32 %v2878_v48, %v5170_v53  ;;  %v634_v19 = vmul.f32 %v2878_v48, %v5171_v14  ;;  %v635_v5 = vmul.f32 %v2878_v48, %v5172_v1  ;;  %v636_v55 = vmul.f32 %v2878_v48, %v5173_v21 }
  0xb6   : >> { %v637_v8 = vmul.f32 %v2878_v48, %v5174_v2  ;;  %v638_v23 = vmul.f32 %v2878_v48, %v5175_v10  ;;  %v639_v37 = vadd.f32 %v615_v46, %v587_v29  ;;  %v640_v18 = vadd.f32 %v616_v47, %v588_v45 }
  0xb7   : >> { %v641_v25 = vadd.f32 %v617_v52, %v589_v9  ;;  %v642_v61 = vadd.f32 %v618_v43, %v590_v31  ;;  %v643_v53 = vadd.f32 %v619_v7, %v591_v42  ;;  %v644_v60 = vadd.f32 %v620_v28, %v592_v56  ;;  %v5176_v42 = vld [vmem:[#allocation28_spill] sm:$0xff]  ;;  %v5177_v56 = vld [vmem:[#allocation69_spill] sm:$0xff]  ;;  %v5189_v7 = vld [vmem:[#allocation26_spill] sm:$0xff] }
  0xb8   : >> { %v645_v57 = vadd.f32 %v621_v30, %v593_v15  ;;  %v646_v14 = vadd.f32 %v622_v63, %v594_v38  ;;  %v647_v41 = vadd.f32 %v623_v35, %v595_v36  ;;  %v648_v16 = vadd.f32 %v624_v12, %v596_v13  ;;  %v5178_v38 = vld [vmem:[#allocation48_spill] sm:$0xff]  ;;  %v5190_v30 = vld [vmem:[#allocation61_spill] sm:$0xff] }
  0xb9   : >> { %v649_v1 = vadd.f32 %v625_v40, %v597_v50  ;;  %v650_v11 = vadd.f32 %v626_v22, %v598_v59  ;;  %v651_v21 = vadd.f32 %v627_v0, %v599_v62  ;;  %v652_v2 = vadd.f32 %v628_v26, %v600_v34  ;;  %v5179_v13 = vld [vmem:[#allocation32_spill] sm:$0xff]  ;;  %v5180_v59 = vld [vmem:[#allocation49_spill] sm:$0xff]  ;;  %v5181_v34 = vld [vmem:[#allocation27_spill] sm:$0xff] }
  0xba   : >> { %v653_v10 = vadd.f32 %v629_v49, %v601_v4  ;;  %v654_v48 = vadd.f32 %v630_v3, %v602_v27  ;;  %v655_v29 = vadd.f32 %v631_v32, %v603_v17  ;;  %v656_v46 = vadd.f32 %v632_v6, %v604_v39  ;;  %v5185_v17 = vld [vmem:[#allocation20_spill] sm:$0xff]  ;;  %v5191_v35 = vld [vmem:[#allocation29_spill] sm:$0xff]  ;;  %v5192_v40 = vld [vmem:[#allocation62_spill] sm:$0xff] }
  0xbb   : >> { %v657_v45 = vadd.f32 %v633_v58, %v605_v20  ;;  %v658_v47 = vadd.f32 %v634_v19, %v606_v24  ;;  %v659_v9 = vadd.f32 %v635_v5, %v607_v54  ;;  %v660_v52 = vadd.f32 %v636_v55, %v608_v51  ;;  %v5182_v19 = vld [vmem:[#allocation14_spill] sm:$0xff]  ;;  %v5183_v5 = vld [vmem:[#allocation15_spill] sm:$0xff]  ;;  %v5186_v20 = vld [vmem:[#allocation21_spill] sm:$0xff] }
  0xbc   : >> { %v661_v31 = vadd.f32 %v637_v8, %v609_v44  ;;  %v662_v43 = vadd.f32 %v638_v23, %v610_v33  ;;  %v667_v15 = vmul.f32 %v5177_v56, %v5176_v42  ;;  %v668_v36 = vmul.f32 %v5177_v56, %v5178_v38  ;;  %v5184_v8 = vld [vmem:[#allocation16_spill] sm:$0xff]  ;;  %v5187_v54 = vld [vmem:[#allocation22_spill] sm:$0xff]  ;;  %v5188_v44 = vld [vmem:[#allocation25_spill] sm:$0xff] }
  0xbd   : >> { %v669_v50 = vmul.f32 %v5177_v56, %v5179_v13  ;;  %v670_v62 = vmul.f32 %v5177_v56, %v5180_v59  ;;  %v671_v4 = vmul.f32 %v5177_v56, %v5181_v34  ;;  %v672_v55 = vmul.f32 %v5177_v56, %v5182_v19  ;;  %v5193_v0 = vld [vmem:[#allocation31_spill] sm:$0xff]  ;;  %v5196_v58 = vld [vmem:[#allocation64_spill] sm:$0xff]  ;;  %v5197_v38 = vld [vmem:[#allocation37_spill] sm:$0xff] }
  0xbe   : >> { %v673_v23 = vmul.f32 %v5177_v56, %v5183_v5  ;;  %v674_v27 = vmul.f32 %v5177_v56, %v5184_v8  ;;  %v675_v39 = vmul.f32 %v5177_v56, %v5185_v17  ;;  %v676_v24 = vmul.f32 %v5177_v56, %v5186_v20  ;;  %v5194_v49 = vld [vmem:[#allocation63_spill] sm:$0xff] }
  0xbf   : >> { %v677_v51 = vmul.f32 %v5177_v56, %v5187_v54  ;;  %v678_v33 = vmul.f32 %v5177_v56, %v5188_v44  ;;  %v679_v28 = vmul.f32 %v5177_v56, %v5189_v7  ;;  %v680_v63 = vmul.f32 %v5177_v56, %v5190_v30  ;;  %v5195_v32 = vld [vmem:[#allocation35_spill] sm:$0xff]  ;;  %v5198_v7 = vld [vmem:[#allocation65_spill] sm:$0xff]  ;;  %v5200_v54 = vld [vmem:[#allocation66_spill] sm:$0xff] }
  0xc0   : >> { %v681_v12 = vmul.f32 %v5177_v56, %v5191_v35  ;;  %v682_v22 = vmul.f32 %v5177_v56, %v5192_v40  ;;  %v683_v26 = vmul.f32 %v5177_v56, %v5193_v0  ;;  %v684_v3 = vmul.f32 %v5177_v56, %v5194_v49  ;;  %v5199_v44 = vld [vmem:[#allocation39_spill] sm:$0xff] }
  0xc1   : >> { %v685_v6 = vmul.f32 %v5177_v56, %v5195_v32  ;;  %v686_v42 = vmul.f32 %v5177_v56, %v5196_v58  ;;  %v687_v30 = vmul.f32 %v5177_v56, %v5197_v38  ;;  %v688_v35 = vmul.f32 %v5177_v56, %v5198_v7 }
  0xc2   : >> { %v689_v40 = vmul.f32 %v5177_v56, %v5199_v44  ;;  %v690_v0 = vmul.f32 %v5177_v56, %v5200_v54  ;;  %v691_v20 = vadd.f32 %v667_v15, %v639_v37  ;;  %v692_v49 = vadd.f32 %v668_v36, %v640_v18 }
  0xc3   : >> { %v693_v17 = vadd.f32 %v669_v50, %v641_v25  ;;  %v694_v8 = vadd.f32 %v670_v62, %v642_v61  ;;  %v695_v32 = vadd.f32 %v671_v4, %v643_v53  ;;  %v696_v5 = vadd.f32 %v672_v55, %v644_v60  ;;  %v5201_v53 = vld [vmem:[#allocation32_spill] sm:$0xff]  ;;  %v5202_v60 = vld [vmem:[#allocation70_spill] sm:$0xff] }
  0xc4   : >> { %v697_v19 = vadd.f32 %v673_v23, %v645_v57  ;;  %v698_v58 = vadd.f32 %v674_v27, %v646_v14  ;;  %v699_v34 = vadd.f32 %v675_v39, %v647_v41  ;;  %v700_v59 = vadd.f32 %v676_v24, %v648_v16  ;;  %v5203_v14 = vld [vmem:[#allocation49_spill] sm:$0xff]  ;;  %v5212_v4 = vld [vmem:[#allocation26_spill] sm:$0xff] }
  0xc5   : >> { %v701_v38 = vadd.f32 %v677_v51, %v649_v1  ;;  %v702_v13 = vadd.f32 %v678_v33, %v650_v11  ;;  %v703_v7 = vadd.f32 %v679_v28, %v651_v21  ;;  %v704_v44 = vadd.f32 %v680_v63, %v652_v2  ;;  %v5204_v1 = vld [vmem:[#allocation27_spill] sm:$0xff]  ;;  %v5205_v11 = vld [vmem:[#allocation14_spill] sm:$0xff]  ;;  %v5213_v23 = vld [vmem:[#allocation61_spill] sm:$0xff] }
  0xc6   : >> { %v705_v54 = vadd.f32 %v681_v12, %v653_v10  ;;  %v706_v56 = vadd.f32 %v682_v22, %v654_v48  ;;  %v707_v15 = vadd.f32 %v683_v26, %v655_v29  ;;  %v708_v37 = vadd.f32 %v684_v3, %v656_v46  ;;  %v5206_v21 = vld [vmem:[#allocation15_spill] sm:$0xff]  ;;  %v5207_v48 = vld [vmem:[#allocation16_spill] sm:$0xff]  ;;  %v5214_v39 = vld [vmem:[#allocation29_spill] sm:$0xff] }
  0xc7   : >> { %v709_v18 = vadd.f32 %v685_v6, %v657_v45  ;;  %v710_v36 = vadd.f32 %v686_v42, %v658_v47  ;;  %v711_v25 = vadd.f32 %v687_v30, %v659_v9  ;;  %v712_v50 = vadd.f32 %v688_v35, %v660_v52  ;;  %v5208_v46 = vld [vmem:[#allocation20_spill] sm:$0xff]  ;;  %v5209_v47 = vld [vmem:[#allocation21_spill] sm:$0xff]  ;;  %v5210_v52 = vld [vmem:[#allocation22_spill] sm:$0xff] }
  0xc8   : >> { %v713_v61 = vadd.f32 %v689_v40, %v661_v31  ;;  %v714_v62 = vadd.f32 %v690_v0, %v662_v43  ;;  %v719_v57 = vmul.f32 %v5202_v60, %v5201_v53  ;;  %v720_v16 = vmul.f32 %v5202_v60, %v5203_v14  ;;  %v5211_v43 = vld [vmem:[#allocation25_spill] sm:$0xff]  ;;  %v5215_v51 = vld [vmem:[#allocation62_spill] sm:$0xff]  ;;  %v5216_v28 = vld [vmem:[#allocation31_spill] sm:$0xff] }
  0xc9   : >> { %v721_v41 = vmul.f32 %v5202_v60, %v5204_v1  ;;  %v722_v10 = vmul.f32 %v5202_v60, %v5205_v11  ;;  %v723_v2 = vmul.f32 %v5202_v60, %v5206_v21  ;;  %v724_v29 = vmul.f32 %v5202_v60, %v5207_v48  ;;  %v5217_v63 = vld [vmem:[#allocation63_spill] sm:$0xff]  ;;  %v5219_v22 = vld [vmem:[#allocation64_spill] sm:$0xff]  ;;  %v5220_v26 = vld [vmem:[#allocation37_spill] sm:$0xff] }
  0xca   : >> { %v725_v45 = vmul.f32 %v5202_v60, %v5208_v46  ;;  %v726_v9 = vmul.f32 %v5202_v60, %v5209_v47  ;;  %v727_v31 = vmul.f32 %v5202_v60, %v5210_v52  ;;  %v728_v42 = vmul.f32 %v5202_v60, %v5211_v43  ;;  %v5218_v12 = vld [vmem:[#allocation35_spill] sm:$0xff]  ;;  %v5221_v6 = vld [vmem:[#allocation65_spill] sm:$0xff] }
  0xcb   : >> { %v729_v55 = vmul.f32 %v5202_v60, %v5212_v4  ;;  %v730_v27 = vmul.f32 %v5202_v60, %v5213_v23  ;;  %v731_v24 = vmul.f32 %v5202_v60, %v5214_v39  ;;  %v732_v33 = vmul.f32 %v5202_v60, %v5215_v51  ;;  %v5222_v53 = vld [vmem:[#allocation39_spill] sm:$0xff]  ;;  %v5223_v39 = vld [vmem:[#allocation66_spill] sm:$0xff]  ;;  %v5224_v23 = vld [vmem:[#allocation41_spill] sm:$0xff] }
  0xcc   : >> { %v733_v30 = vmul.f32 %v5202_v60, %v5216_v28  ;;  %v734_v35 = vmul.f32 %v5202_v60, %v5217_v63  ;;  %v735_v40 = vmul.f32 %v5202_v60, %v5218_v12  ;;  %v736_v0 = vmul.f32 %v5202_v60, %v5219_v22  ;;  %v5225_v4 = vld [vmem:[#allocation67_spill] sm:$0xff] }
  0xcd   : >> { %v737_v3 = vmul.f32 %v5202_v60, %v5220_v26  ;;  %v738_v14 = vmul.f32 %v5202_v60, %v5221_v6  ;;  %v739_v51 = vmul.f32 %v5202_v60, %v5222_v53  ;;  %v740_v28 = vmul.f32 %v5202_v60, %v5223_v39 }
  0xce   : >> { %v741_v63 = vmul.f32 %v5202_v60, %v5224_v23  ;;  %v742_v12 = vmul.f32 %v5202_v60, %v5225_v4  ;;  %v743_v43 = vadd.f32 %v719_v57, %v691_v20  ;;  %v744_v22 = vadd.f32 %v720_v16, %v692_v49 }
  0xcf   : >> { %v745_v52 = vadd.f32 %v721_v41, %v693_v17  ;;  %v746_v47 = vadd.f32 %v722_v10, %v694_v8  ;;  %v747_v26 = vadd.f32 %v723_v2, %v695_v32  ;;  %v748_v46 = vadd.f32 %v724_v29, %v696_v5  ;;  %v5226_v32 = vld [vmem:[#allocation27_spill] sm:$0xff]  ;;  %v5237_v2 = vld [vmem:[#allocation29_spill] sm:$0xff] }
  0xd0   : >> { %v749_v48 = vadd.f32 %v725_v45, %v697_v19  ;;  %v750_v6 = vadd.f32 %v726_v9, %v698_v58  ;;  %v751_v21 = vadd.f32 %v727_v31, %v699_v34  ;;  %v752_v11 = vadd.f32 %v728_v42, %v700_v59  ;;  %v5227_v5 = vld [vmem:[#allocation71_spill] sm:$0xff]  ;;  %v5228_v58 = vld [vmem:[#allocation14_spill] sm:$0xff]  ;;  %v5230_v34 = vld [vmem:[#allocation16_spill] sm:$0xff] }
  0xd1   : >> { %v753_v53 = vadd.f32 %v729_v55, %v701_v38  ;;  %v754_v1 = vadd.f32 %v730_v27, %v702_v13  ;;  %v755_v39 = vadd.f32 %v731_v24, %v703_v7  ;;  %v756_v23 = vadd.f32 %v732_v33, %v704_v44  ;;  %v5229_v38 = vld [vmem:[#allocation15_spill] sm:$0xff]  ;;  %v5231_v44 = vld [vmem:[#allocation20_spill] sm:$0xff]  ;;  %v5238_v45 = vld [vmem:[#allocation62_spill] sm:$0xff] }
  0xd2   : >> { %v757_v4 = vadd.f32 %v733_v30, %v705_v54  ;;  %v758_v60 = vadd.f32 %v734_v35, %v706_v56  ;;  %v759_v20 = vadd.f32 %v735_v40, %v707_v15  ;;  %v760_v57 = vadd.f32 %v736_v0, %v708_v37  ;;  %v5232_v56 = vld [vmem:[#allocation21_spill] sm:$0xff]  ;;  %v5233_v37 = vld [vmem:[#allocation22_spill] sm:$0xff]  ;;  %v5239_v31 = vld [vmem:[#allocation31_spill] sm:$0xff] }
  0xd3   : >> { %v761_v16 = vadd.f32 %v737_v3, %v709_v18  ;;  %v762_v49 = vadd.f32 %v738_v14, %v710_v36  ;;  %v763_v17 = vadd.f32 %v739_v51, %v711_v25  ;;  %v764_v41 = vadd.f32 %v740_v28, %v712_v50  ;;  %v5234_v36 = vld [vmem:[#allocation25_spill] sm:$0xff]  ;;  %v5235_v50 = vld [vmem:[#allocation26_spill] sm:$0xff]  ;;  %v5240_v55 = vld [vmem:[#allocation63_spill] sm:$0xff] }
  0xd4   : >> { %v765_v8 = vadd.f32 %v741_v63, %v713_v61  ;;  %v766_v10 = vadd.f32 %v742_v12, %v714_v62  ;;  %v771_v19 = vmul.f32 %v5227_v5, %v5226_v32  ;;  %v772_v59 = vmul.f32 %v5227_v5, %v5228_v58  ;;  %v5236_v62 = vld [vmem:[#allocation61_spill] sm:$0xff]  ;;  %v5241_v24 = vld [vmem:[#allocation35_spill] sm:$0xff]  ;;  %v5242_v33 = vld [vmem:[#allocation64_spill] sm:$0xff] }
  0xd5   : >> { %v773_v13 = vmul.f32 %v5227_v5, %v5229_v38  ;;  %v774_v54 = vmul.f32 %v5227_v5, %v5230_v34  ;;  %v775_v7 = vmul.f32 %v5227_v5, %v5231_v44  ;;  %v776_v15 = vmul.f32 %v5227_v5, %v5232_v56  ;;  %v5243_v30 = vld [vmem:[#allocation37_spill] sm:$0xff]  ;;  %v5245_v40 = vld [vmem:[#allocation39_spill] sm:$0xff]  ;;  %v5246_v3 = vld [vmem:[#allocation66_spill] sm:$0xff] }
  0xd6   : >> { %v777_v18 = vmul.f32 %v5227_v5, %v5233_v37  ;;  %v778_v25 = vmul.f32 %v5227_v5, %v5234_v36  ;;  %v779_v61 = vmul.f32 %v5227_v5, %v5235_v50  ;;  %v780_v14 = vmul.f32 %v5227_v5, %v5236_v62  ;;  %v5244_v35 = vld [vmem:[#allocation65_spill] sm:$0xff]  ;;  %v5248_v36 = vld [vmem:[#allocation67_spill] sm:$0xff]  ;;  %v5250_v58 = vld [vmem:[#allocation68_spill] sm:$0xff] }
  0xd7   : >> { %v781_v29 = vmul.f32 %v5227_v5, %v5237_v2  ;;  %v782_v9 = vmul.f32 %v5227_v5, %v5238_v45  ;;  %v783_v42 = vmul.f32 %v5227_v5, %v5239_v31  ;;  %v784_v27 = vmul.f32 %v5227_v5, %v5240_v55  ;;  %v5247_v62 = vld [vmem:[#allocation41_spill] sm:$0xff]  ;;  %v5249_v34 = vld [vmem:[#allocation43_spill] sm:$0xff] }
  0xd8   : >> { %v785_v51 = vmul.f32 %v5227_v5, %v5241_v24  ;;  %v786_v28 = vmul.f32 %v5227_v5, %v5242_v33  ;;  %v787_v63 = vmul.f32 %v5227_v5, %v5243_v30  ;;  %v788_v12 = vmul.f32 %v5227_v5, %v5244_v35 }
  0xd9   : >> { %v789_v0 = vmul.f32 %v5227_v5, %v5245_v40  ;;  %v790_v45 = vmul.f32 %v5227_v5, %v5246_v3  ;;  %v791_v55 = vmul.f32 %v5227_v5, %v5247_v62  ;;  %v792_v56 = vmul.f32 %v5227_v5, %v5248_v36 }
  0xda   : >> { %v793_v33 = vmul.f32 %v5227_v5, %v5249_v34  ;;  %v794_v30 = vmul.f32 %v5227_v5, %v5250_v58  ;;  %v3135_v24 = vadd.f32 %v771_v19, %v743_v43  ;;  %v3137_v35 = vadd.f32 %v772_v59, %v744_v22 }
  0xdb   : >> { %v3139_v40 = vadd.f32 %v773_v13, %v745_v52  ;;  %v3141_v31 = vadd.f32 %v774_v54, %v746_v47  ;;  %v3143_v3 = vadd.f32 %v775_v7, %v747_v26  ;;  %v3145_v62 = vadd.f32 %v776_v15, %v748_v46 }
  0xdc   : >> { %v3147_v2 = vadd.f32 %v777_v18, %v749_v48  ;;  %v3149_v36 = vadd.f32 %v778_v25, %v750_v6  ;;  %v3151_v34 = vadd.f32 %v779_v61, %v751_v21  ;;  %v3153_v50 = vadd.f32 %v780_v14, %v752_v11  ;;  %v5270_v18 = vld [vmem:[#allocation41_spill] sm:$0xff]  ;;  %v5271_v25 = vld [vmem:[#allocation43_spill] sm:$0xff] }
  0xdd   : >> { %v3155_v43 = vadd.f32 %v781_v29, %v753_v53  ;;  %v3157_v22 = vadd.f32 %v782_v9, %v754_v1  ;;  %v3159_v52 = vadd.f32 %v783_v42, %v755_v39  ;;  %v3161_v47 = vadd.f32 %v784_v27, %v756_v23  ;;  %v5272_v61 = vld [vmem:[#allocation45_spill] sm:$0xff]  ;;  %v5273_v14 = vld [vmem:[#allocation47_spill] sm:$0xff]  ;;  %v5274_v29 = vld [vmem:[#allocation48_spill] sm:$0xff] }
  0xde   : >> { %v3163_v26 = vadd.f32 %v785_v51, %v757_v4  ;;  %v3165_v46 = vadd.f32 %v786_v28, %v758_v60  ;;  %v3167_v48 = vadd.f32 %v787_v63, %v759_v20  ;;  %v3169_v6 = vadd.f32 %v788_v12, %v760_v57  ;;  %v5263_v4 = vld [vmem:[#allocation32_spill] sm:$0xff]  ;;  %v5275_v9 = vld [vmem:[#allocation49_spill] sm:$0xff] }
  0xdf   : >> { %5251 = vst [vmem:[#allocation33_spill] sm:$0xff] %v3159_v52  ;;  %5252 = vst [vmem:[#allocation30_spill] sm:$0xff] %v3161_v47  ;;  %v3171_v21 = vadd.f32 %v789_v0, %v761_v16  ;;  %v3173_v11 = vadd.f32 %v790_v45, %v762_v49  ;;  %v3175_v53 = vadd.f32 %v791_v55, %v763_v17  ;;  %v822_v5 = vrot.slane %v5263_v4, 1  ;;  %v5264_v49 = vld [vmem:[#allocation26_spill] sm:$0xff]  ;;  %v5265_v17 = vld [vmem:[#allocation29_spill] sm:$0xff] }
  0xe0   : >> { %5253 = vst [vmem:[#allocation34_spill] sm:$0xff] %v3163_v26  ;;  %5254 = vst [vmem:[#allocation36_spill] sm:$0xff] %v3165_v46  ;;  %v3177_v1 = vadd.f32 %v792_v56, %v764_v41  ;;  %v3179_v39 = vadd.f32 %v793_v33, %v765_v8  ;;  %v3181_v23 = vadd.f32 %v794_v30, %v766_v10  ;;  %v823_v60 = vrot.slane %v5226_v32, 1  ;;  %v5266_v41 = vld [vmem:[#allocation31_spill] sm:$0xff]  ;;  %v5268_v10 = vld [vmem:[#allocation37_spill] sm:$0xff] }
  0xe1   : >> { %5255 = vst [vmem:[#allocation50_spill] sm:$0xff] %v3167_v48  ;;  %5256 = vst [vmem:[#allocation51_spill] sm:$0xff] %v3169_v6  ;;  %v824_v20 = vrot.slane %v5229_v38, 1  ;;  %v825_v57 = vrot.slane %v5231_v44, 1  ;;  %v826_v16 = vrot.slane %v5233_v37, 1  ;;  %v827_v19 = vrot.slane %v5264_v49, 1 }
  0xe2   : >> { %5257 = vst [vmem:[#allocation52_spill] sm:$0xff] %v3171_v21  ;;  %5258 = vst [vmem:[#allocation53_spill] sm:$0xff] %v3173_v11  ;;  %v828_v59 = vrot.slane %v5265_v17, 1  ;;  %v829_v13 = vrot.slane %v5266_v41, 1  ;;  %v5267_v8 = vld [vmem:[#allocation35_spill] sm:$0xff]  ;;  %v831_v7 = vrot.slane %v5268_v10, 1 }
  0xe3   : >> { %5259 = vst [vmem:[#allocation54_spill] sm:$0xff] %v3175_v53  ;;  %5260 = vst [vmem:[#allocation55_spill] sm:$0xff] %v3177_v1  ;;  %v830_v54 = vrot.slane %v5267_v8, 1  ;;  %v5269_v56 = vld [vmem:[#allocation39_spill] sm:$0xff]  ;;  %v833_v32 = vrot.slane %v5270_v18, 1  ;;  %v834_v38 = vrot.slane %v5271_v25, 1 }
  0xe4   : >> { %5261 = vst [vmem:[#allocation56_spill] sm:$0xff] %v3179_v39  ;;  %5262 = vst [vmem:[#allocation57_spill] sm:$0xff] %v3181_v23  ;;  %v832_v15 = vrot.slane %v5269_v56, 1  ;;  %v835_v44 = vrot.slane %v5272_v61, 1  ;;  %v836_v37 = vrot.slane %v5273_v14, 1  ;;  %v837_v45 = vrot.slane %v5274_v29, 1 }
  0xe5   : >> { %v838_v42 = vrot.slane %v5275_v9, 1  ;;  %v5276_v55 = vld [vmem:[#allocation14_spill] sm:$0xff]  ;;  %v5277_v51 = vld [vmem:[#allocation16_spill] sm:$0xff]  ;;  %v5278_v28 = vld [vmem:[#allocation21_spill] sm:$0xff] }
  0xe6   : >> { %v839_v27 = vrot.slane %v5276_v55, 1  ;;  %v840_v33 = vrot.slane %v5277_v51, 1  ;;  %v841_v30 = vrot.slane %v5278_v28, 1  ;;  %v5279_v63 = vld [vmem:[#allocation25_spill] sm:$0xff]  ;;  %v5281_v49 = vld [vmem:[#allocation62_spill] sm:$0xff]  ;;  %v5282_v41 = vld [vmem:[#allocation63_spill] sm:$0xff] }
  0xe7   : >> { %v842_v12 = vrot.slane %v5279_v63, 1  ;;  %v5280_v0 = vld [vmem:[#allocation61_spill] sm:$0xff]  ;;  %v844_v17 = vrot.slane %v5281_v49, 1  ;;  %v845_v8 = vrot.slane %v5282_v41, 1  ;;  %v5283_v10 = vld [vmem:[#allocation64_spill] sm:$0xff]  ;;  %v5285_v61 = vld [vmem:[#allocation66_spill] sm:$0xff] }
  0xe8   : >> { %v843_v4 = vrot.slane %v5280_v0, 1  ;;  %v846_v56 = vrot.slane %v5283_v10, 1  ;;  %v5284_v18 = vld [vmem:[#allocation65_spill] sm:$0xff]  ;;  %v848_v14 = vrot.slane %v5285_v61, 1  ;;  %v5286_v29 = vld [vmem:[#allocation67_spill] sm:$0xff]  ;;  %v850_v55 = vrot.slane %v5250_v58, 1 }
  0xe9   : >> { %v847_v25 = vrot.slane %v5284_v18, 1  ;;  %v849_v9 = vrot.slane %v5286_v29, 1  ;;  %v5287_v51 = vld [vmem:[#allocation44_spill] sm:$0xff]  ;;  %v5291_v0 = vld [vmem:[#allocation46_spill] sm:$0xff]  ;;  %v3232_v58 = vsel %vm526_vm0, %v822_v5, %v838_v42  ;;  %v3236_v29 = vsel %vm526_vm0, %v823_v60, %v839_v27 }
  0xea   : >> { %v5288_v28 = vrot.slane %v5287_v51, 1  ;;  %v5292_v49 = vrot.slane %v5291_v0, 1  ;;  %v5294_v10 = vld [vmem:[#allocation28_spill] sm:$0xff]  ;;  %5297 = vst [vmem:[#allocation69_spill] sm:$0xff] %v3232_v58  ;;  %5298 = vst [vmem:[#allocation70_spill] sm:$0xff] %v3236_v29  ;;  %v3252_v39 = vsel %vm526_vm0, %v827_v19, %v843_v4  ;;  %v3256_v1 = vsel %vm526_vm0, %v828_v59, %v844_v17 }
  0xeb   : >> { %v5295_v18 = vrot.slane %v5294_v10, 1  ;;  %5302 = vst [vmem:[#allocation20_spill] sm:$0xff] %v3252_v39  ;;  %5303 = vst [vmem:[#allocation22_spill] sm:$0xff] %v3256_v1  ;;  %v3260_v53 = vsel %vm526_vm0, %v829_v13, %v845_v8  ;;  %v3264_v11 = vsel %vm526_vm0, %v830_v54, %v846_v56  ;;  %v3268_v21 = vsel %vm526_vm0, %v831_v7, %v847_v25 }
  0xec   : >> { %v3216_v63 = vsel %vm526_vm0, %v5288_v28, %v835_v44  ;;  %v3222_v41 = vsel %vm526_vm0, %v5292_v49, %v836_v37  ;;  %v3240_v28 = vsel %vm526_vm0, %v824_v20, %v840_v33  ;;  %v3244_v49 = vsel %vm526_vm0, %v825_v57, %v841_v30  ;;  %5304 = vst [vmem:[#allocation68_spill] sm:$0xff] %v3260_v53 }
  0xed   : >> { %5290 = vst [vmem:[#allocation58_spill] sm:$0xff] %v3216_v63  ;;  %5293 = vst [vmem:[#allocation59_spill] sm:$0xff] %v3222_v41  ;;  %v3228_v61 = vsel %vm526_vm0, %v5295_v18, %v837_v45  ;;  %v3248_v18 = vsel %vm526_vm0, %v826_v16, %v842_v12  ;;  %v3272_v6 = vsel %vm526_vm0, %v832_v15, %v848_v14  ;;  %v5310_v26 = vrot.slane %v5287_v51, 1 }
  0xee   : >> { %5296 = vst [vmem:[#allocation60_spill] sm:$0xff] %v3228_v61  ;;  %5299 = vst [vmem:[#allocation27_spill] sm:$0xff] %v3240_v28  ;;  %v3276_v48 = vsel %vm526_vm0, %v833_v32, %v849_v9  ;;  %v3280_v46 = vsel %vm526_vm0, %v834_v38, %v850_v55 }
  0xef   : >> { %5300 = vst [vmem:[#allocation71_spill] sm:$0xff] %v3244_v49  ;;  %5301 = vst [vmem:[#allocation15_spill] sm:$0xff] %v3248_v18  ;;  %v3286_v47 = vsel %vm526_vm0, %v835_v44, %v5310_v26  ;;  %v3306_v26 = vsel %vm526_vm0, %v839_v27, %v823_v60  ;;  %v3310_v44 = vsel %vm526_vm0, %v840_v33, %v824_v20  ;;  %v5333_v33 = vld [vmem:[#allocation9_spill] sm:$0xff] }
  0xf0   : >> { %5305 = vst [vmem:[#allocation32_spill] sm:$0xff] %v3264_v11  ;;  %5306 = vst [vmem:[#allocation26_spill] sm:$0xff] %v3268_v21  ;;  %v5312_v21 = vrot.slane %v5291_v0, 1  ;;  %v3326_v60 = vsel %vm526_vm0, %v844_v17, %v828_v59  ;;  %v3330_v20 = vsel %vm526_vm0, %v845_v8, %v829_v13  ;;  %v3346_v59 = vsel %vm526_vm0, %v849_v9, %v833_v32  ;;  %v5338_v32 = vld [vmem:[#allocation40_spill] sm:$0xff] }
  0xf1   : >> { %5307 = vst [vmem:[#allocation29_spill] sm:$0xff] %v3272_v6  ;;  %5308 = vst [vmem:[#allocation31_spill] sm:$0xff] %v3276_v48  ;;  %v5314_v6 = vrot.slane %v5294_v10, 1  ;;  %v3350_v13 = vsel %vm526_vm0, %v850_v55, %v834_v38 }
  0xf2   : >> { %5309 = vst [vmem:[#allocation35_spill] sm:$0xff] %v3280_v46  ;;  %5311 = vst [vmem:[#allocation37_spill] sm:$0xff] %v3286_v47  ;;  %v3292_v52 = vsel %vm526_vm0, %v836_v37, %v5312_v21  ;;  %v3302_v46 = vsel %vm526_vm0, %v838_v42, %v822_v5  ;;  %v3314_v21 = vsel %vm526_vm0, %v841_v30, %v825_v57  ;;  %v5329_v37 = vld [vmem:[#allocation19_spill] sm:$0xff] }
  0xf3   : >> { %5313 = vst [vmem:[#allocation39_spill] sm:$0xff] %v3292_v52  ;;  %v3298_v48 = vsel %vm526_vm0, %v837_v45, %v5314_v6  ;;  %5316 = vst [vmem:[#allocation43_spill] sm:$0xff] %v3302_v46  ;;  %v3318_v6 = vsel %vm526_vm0, %v842_v12, %v826_v16  ;;  %v3322_v5 = vsel %vm526_vm0, %v843_v4, %v827_v19  ;;  %v5330_v45 = vld [vmem:[#allocation8_spill] sm:$0xff]  ;;  %v5331_v42 = vld [vmem:[#allocation23_spill] sm:$0xff] }
  0xf4   : >> { %5315 = vst [vmem:[#allocation41_spill] sm:$0xff] %v3298_v48  ;;  %5317 = vst [vmem:[#allocation45_spill] sm:$0xff] %v3306_v26  ;;  %v3334_v57 = vsel %vm526_vm0, %v846_v56, %v830_v54  ;;  %v3338_v16 = vsel %vm526_vm0, %v847_v25, %v831_v7  ;;  %v3342_v19 = vsel %vm526_vm0, %v848_v14, %v832_v15  ;;  %v5332_v7 = vld [vmem:[#allocation24_spill] sm:$0xff]  ;;  %v5335_v15 = vld [vmem:[#allocation38_spill] sm:$0xff] }
  0xf5   : >> { %5318 = vst [vmem:[#allocation47_spill] sm:$0xff] %v3310_v44  ;;  %5319 = vst [vmem:[#allocation48_spill] sm:$0xff] %v3314_v21  ;;  %v886_v54 = vrot.slane %v5330_v45, %v5329_v37  ;;  %v3356_v27 = vrot.slane %v5330_v45, %v5331_v42  ;;  %v3360_v30 = vrot.slane %v5333_v33, %v5332_v7  ;;  %v5336_v12 = vld [vmem:[#allocation10_spill] sm:$0xff] }
  0xf6   : >> { %5320 = vst [vmem:[#allocation49_spill] sm:$0xff] %v3318_v6  ;;  %5321 = vst [vmem:[#allocation14_spill] sm:$0xff] %v3322_v5  ;;  %v3364_v4 = vrot.slane %v5336_v12, %v5335_v15  ;;  %v3368_v17 = vrot.slane %v5336_v12, %v5338_v32 }
  0xf7   : >> { %5322 = vst [vmem:[#allocation16_spill] sm:$0xff] %v3326_v60  ;;  %5323 = vst [vmem:[#allocation21_spill] sm:$0xff] %v3330_v20  ;;  %v887_v56 = vmul.f32 %v886_v54, %v3216_v63  ;;  %v888_v25 = vmul.f32 %v886_v54, %v3286_v47  ;;  %v889_v14 = vmul.f32 %v886_v54, %v3222_v41 }
  0xf8   : >> { %5324 = vst [vmem:[#allocation25_spill] sm:$0xff] %v3334_v57  ;;  %5325 = vst [vmem:[#allocation61_spill] sm:$0xff] %v3338_v16  ;;  %v890_v9 = vmul.f32 %v886_v54, %v3292_v52  ;;  %v891_v55 = vmul.f32 %v886_v54, %v3228_v61  ;;  %v892_v51 = vmul.f32 %v886_v54, %v3298_v48 }
  0xf9   : >> { %5326 = vst [vmem:[#allocation62_spill] sm:$0xff] %v3342_v19  ;;  %5327 = vst [vmem:[#allocation63_spill] sm:$0xff] %v3346_v59  ;;  %v893_v0 = vmul.f32 %v886_v54, %v3232_v58  ;;  %v894_v10 = vmul.f32 %v886_v54, %v3302_v46  ;;  %v895_v38 = vmul.f32 %v886_v54, %v3236_v29 }
  0xfa   : >> { %5328 = vst [vmem:[#allocation64_spill] sm:$0xff] %v3350_v13  ;;  %5334 = vst [vmem:[#allocation65_spill] sm:$0xff] %v3360_v30  ;;  %v896_v8 = vmul.f32 %v886_v54, %v3306_v26  ;;  %v897_v32 = vmul.f32 %v886_v54, %v3240_v28  ;;  %v898_v15 = vmul.f32 %v886_v54, %v3310_v44 }
  0xfb   : >> { %5337 = vst [vmem:[#allocation66_spill] sm:$0xff] %v3364_v4  ;;  %5339 = vst [vmem:[#allocation67_spill] sm:$0xff] %v3368_v17  ;;  %v899_v7 = vmul.f32 %v886_v54, %v3244_v49  ;;  %v900_v42 = vmul.f32 %v886_v54, %v3314_v21  ;;  %v901_v12 = vmul.f32 %v886_v54, %v3248_v18 }
  0xfc   : >> { %v902_v37 = vmul.f32 %v886_v54, %v3318_v6  ;;  %v903_v33 = vmul.f32 %v886_v54, %v3252_v39  ;;  %v904_v45 = vmul.f32 %v886_v54, %v3322_v5  ;;  %v905_v23 = vmul.f32 %v886_v54, %v3256_v1 }
  0xfd   : >> { %v906_v63 = vmul.f32 %v886_v54, %v3326_v60  ;;  %v907_v47 = vmul.f32 %v886_v54, %v3260_v53  ;;  %v908_v13 = vmul.f32 %v886_v54, %v3330_v20  ;;  %v909_v17 = vmul.f32 %v886_v54, %v3264_v11 }
  0xfe   : >> { %v910_v59 = vmul.f32 %v886_v54, %v3334_v57  ;;  %v911_v4 = vadd.f32 %v887_v56, %v3135_v24  ;;  %v912_v19 = vadd.f32 %v888_v25, %v3137_v35  ;;  %v913_v30 = vadd.f32 %v889_v14, %v3139_v40  ;;  %v5340_v56 = vld [vmem:[#allocation33_spill] sm:$0xff]  ;;  %v5341_v25 = vld [vmem:[#allocation30_spill] sm:$0xff] }
  0xff   : >> { %v914_v16 = vadd.f32 %v890_v9, %v3141_v31  ;;  %v915_v1 = vadd.f32 %v891_v55, %v3143_v3  ;;  %v916_v60 = vadd.f32 %v892_v51, %v3145_v62  ;;  %v917_v53 = vadd.f32 %v893_v0, %v3147_v2  ;;  %v5342_v14 = vld [vmem:[#allocation34_spill] sm:$0xff]  ;;  %v5343_v9 = vld [vmem:[#allocation36_spill] sm:$0xff]  ;;  %v5345_v51 = vld [vmem:[#allocation51_spill] sm:$0xff] }
 0x100   : >> { %v918_v20 = vadd.f32 %v894_v10, %v3149_v36  ;;  %v919_v11 = vadd.f32 %v895_v38, %v3151_v34  ;;  %v920_v54 = vadd.f32 %v896_v8, %v3153_v50  ;;  %v921_v24 = vadd.f32 %v897_v32, %v3155_v43  ;;  %v5344_v55 = vld [vmem:[#allocation50_spill] sm:$0xff]  ;;  %v5346_v0 = vld [vmem:[#allocation52_spill] sm:$0xff]  ;;  %v5347_v38 = vld [vmem:[#allocation53_spill] sm:$0xff] }
 0x101   : >> { %v922_v35 = vadd.f32 %v898_v15, %v3157_v22  ;;  %v923_v40 = vadd.f32 %v899_v7, %v5340_v56  ;;  %v924_v31 = vadd.f32 %v900_v42, %v5341_v25  ;;  %v925_v3 = vadd.f32 %v901_v12, %v5342_v14  ;;  %v5348_v8 = vld [vmem:[#allocation54_spill] sm:$0xff]  ;;  %v5349_v32 = vld [vmem:[#allocation55_spill] sm:$0xff]  ;;  %v5350_v15 = vld [vmem:[#allocation56_spill] sm:$0xff] }
 0x102   : >> { %v926_v62 = vadd.f32 %v902_v37, %v5343_v9  ;;  %v927_v2 = vadd.f32 %v903_v33, %v5344_v55  ;;  %v928_v36 = vadd.f32 %v904_v45, %v5345_v51  ;;  %v929_v34 = vadd.f32 %v905_v23, %v5346_v0  ;;  %v5351_v10 = vld [vmem:[#allocation57_spill] sm:$0xff]  ;;  %v5352_v0 = vld [vmem:[#allocation22_spill] sm:$0xff] }
 0x103   : >> { %v930_v50 = vadd.f32 %v906_v63, %v5347_v38  ;;  %v931_v43 = vadd.f32 %v907_v47, %v5348_v8  ;;  %v932_v22 = vadd.f32 %v908_v13, %v5349_v32  ;;  %v933_v7 = vadd.f32 %v909_v17, %v5350_v15  ;;  %v5353_v8 = vld [vmem:[#allocation16_spill] sm:$0xff] }
 0x104   : >> { %v934_v42 = vadd.f32 %v910_v59, %v5351_v10  ;;  %v939_v12 = vmul.f32 %v3356_v27, %v3222_v41  ;;  %v940_v37 = vmul.f32 %v3356_v27, %v3292_v52  ;;  %v941_v45 = vmul.f32 %v3356_v27, %v3228_v61  ;;  %v5354_v15 = vld [vmem:[#allocation68_spill] sm:$0xff]  ;;  %v5355_v41 = vld [vmem:[#allocation21_spill] sm:$0xff] }
 0x105   : >> { %v942_v23 = vmul.f32 %v3356_v27, %v3298_v48  ;;  %v943_v47 = vmul.f32 %v3356_v27, %v3232_v58  ;;  %v944_v63 = vmul.f32 %v3356_v27, %v3302_v46  ;;  %v945_v59 = vmul.f32 %v3356_v27, %v3236_v29 }
 0x106   : >> { %v946_v13 = vmul.f32 %v3356_v27, %v3306_v26  ;;  %v947_v33 = vmul.f32 %v3356_v27, %v3240_v28  ;;  %v948_v17 = vmul.f32 %v3356_v27, %v3310_v44  ;;  %v949_v56 = vmul.f32 %v3356_v27, %v3244_v49  ;;  %v5358_v49 = vld [vmem:[#allocation61_spill] sm:$0xff] }
 0x107   : >> { %v950_v25 = vmul.f32 %v3356_v27, %v3314_v21  ;;  %v951_v14 = vmul.f32 %v3356_v27, %v3248_v18  ;;  %v952_v9 = vmul.f32 %v3356_v27, %v3318_v6  ;;  %v953_v55 = vmul.f32 %v3356_v27, %v3252_v39  ;;  %v5356_v18 = vld [vmem:[#allocation32_spill] sm:$0xff]  ;;  %v5357_v21 = vld [vmem:[#allocation26_spill] sm:$0xff] }
 0x108   : >> { %v954_v51 = vmul.f32 %v3356_v27, %v3322_v5  ;;  %v955_v38 = vmul.f32 %v3356_v27, %v5352_v0  ;;  %v956_v32 = vmul.f32 %v3356_v27, %v5353_v8  ;;  %v957_v10 = vmul.f32 %v3356_v27, %v5354_v15 }
 0x109   : >> { %v958_v52 = vmul.f32 %v3356_v27, %v5355_v41  ;;  %v959_v6 = vmul.f32 %v3356_v27, %v5356_v18  ;;  %v960_v39 = vmul.f32 %v3356_v27, %v3334_v57  ;;  %v961_v5 = vmul.f32 %v3356_v27, %v5357_v21 }
 0x10a   : >> { %v962_v0 = vmul.f32 %v3356_v27, %v5358_v49  ;;  %v963_v44 = vadd.f32 %v939_v12, %v911_v4  ;;  %v964_v8 = vadd.f32 %v940_v37, %v912_v19  ;;  %v965_v28 = vadd.f32 %v941_v45, %v913_v30 }
 0x10b   : >> { %v966_v26 = vadd.f32 %v942_v23, %v914_v16  ;;  %v967_v15 = vadd.f32 %v943_v47, %v915_v1  ;;  %v968_v29 = vadd.f32 %v944_v63, %v916_v60  ;;  %v969_v46 = vadd.f32 %v945_v59, %v917_v53  ;;  %v5359_v1 = vld [vmem:[#allocation60_spill] sm:$0xff]  ;;  %v5360_v60 = vld [vmem:[#allocation65_spill] sm:$0xff] }
 0x10c   : >> { %v970_v41 = vadd.f32 %v946_v13, %v918_v20  ;;  %v971_v58 = vadd.f32 %v947_v33, %v919_v11  ;;  %v972_v48 = vadd.f32 %v948_v17, %v920_v54  ;;  %v973_v18 = vadd.f32 %v949_v56, %v921_v24  ;;  %v5361_v20 = vld [vmem:[#allocation41_spill] sm:$0xff]  ;;  %v5372_v63 = vld [vmem:[#allocation20_spill] sm:$0xff]  ;;  %v5373_v13 = vld [vmem:[#allocation14_spill] sm:$0xff] }
 0x10d   : >> { %v974_v61 = vadd.f32 %v950_v25, %v922_v35  ;;  %v975_v57 = vadd.f32 %v951_v14, %v923_v40  ;;  %v976_v21 = vadd.f32 %v952_v9, %v924_v31  ;;  %v977_v27 = vadd.f32 %v953_v55, %v925_v3  ;;  %v5362_v54 = vld [vmem:[#allocation69_spill] sm:$0xff]  ;;  %v5363_v35 = vld [vmem:[#allocation43_spill] sm:$0xff]  ;;  %v5364_v31 = vld [vmem:[#allocation70_spill] sm:$0xff] }
 0x10e   : >> { %v978_v49 = vadd.f32 %v954_v51, %v926_v62  ;;  %v979_v4 = vadd.f32 %v955_v38, %v927_v2  ;;  %v980_v12 = vadd.f32 %v956_v32, %v928_v36  ;;  %v981_v19 = vadd.f32 %v957_v10, %v929_v34  ;;  %v5367_v62 = vld [vmem:[#allocation47_spill] sm:$0xff]  ;;  %v5374_v17 = vld [vmem:[#allocation22_spill] sm:$0xff]  ;;  %v5375_v25 = vld [vmem:[#allocation16_spill] sm:$0xff] }
 0x10f   : >> { %v982_v37 = vadd.f32 %v958_v52, %v930_v50  ;;  %v983_v30 = vadd.f32 %v959_v6, %v931_v43  ;;  %v984_v45 = vadd.f32 %v960_v39, %v932_v22  ;;  %v985_v16 = vadd.f32 %v961_v5, %v933_v7  ;;  %v5365_v52 = vld [vmem:[#allocation45_spill] sm:$0xff]  ;;  %v5366_v6 = vld [vmem:[#allocation27_spill] sm:$0xff]  ;;  %v5369_v50 = vld [vmem:[#allocation48_spill] sm:$0xff] }
 0x110   : >> { %v986_v23 = vadd.f32 %v962_v0, %v934_v42  ;;  %v991_v53 = vmul.f32 %v5360_v60, %v5359_v1  ;;  %v992_v11 = vmul.f32 %v5360_v60, %v5361_v20  ;;  %v993_v24 = vmul.f32 %v5360_v60, %v5362_v54  ;;  %v5368_v36 = vld [vmem:[#allocation71_spill] sm:$0xff]  ;;  %v5371_v42 = vld [vmem:[#allocation49_spill] sm:$0xff]  ;;  %v5376_v9 = vld [vmem:[#allocation68_spill] sm:$0xff] }
 0x111   : >> { %v994_v40 = vmul.f32 %v5360_v60, %v5363_v35  ;;  %v995_v3 = vmul.f32 %v5360_v60, %v5364_v31  ;;  %v996_v39 = vmul.f32 %v5360_v60, %v5365_v52  ;;  %v997_v5 = vmul.f32 %v5360_v60, %v5366_v6  ;;  %v5370_v22 = vld [vmem:[#allocation15_spill] sm:$0xff]  ;;  %v5377_v51 = vld [vmem:[#allocation21_spill] sm:$0xff]  ;;  %v5378_v38 = vld [vmem:[#allocation32_spill] sm:$0xff] }
 0x112   : >> { %v998_v2 = vmul.f32 %v5360_v60, %v5367_v62  ;;  %v999_v34 = vmul.f32 %v5360_v60, %v5368_v36  ;;  %v1000_v43 = vmul.f32 %v5360_v60, %v5369_v50  ;;  %v1001_v7 = vmul.f32 %v5360_v60, %v5370_v22  ;;  %v5379_v10 = vld [vmem:[#allocation25_spill] sm:$0xff]  ;;  %v5380_v1 = vld [vmem:[#allocation26_spill] sm:$0xff] }
 0x113   : >> { %v1002_v47 = vmul.f32 %v5360_v60, %v5371_v42  ;;  %v1003_v59 = vmul.f32 %v5360_v60, %v5372_v63  ;;  %v1004_v33 = vmul.f32 %v5360_v60, %v5373_v13  ;;  %v1005_v56 = vmul.f32 %v5360_v60, %v5374_v17  ;;  %v5381_v63 = vld [vmem:[#allocation61_spill] sm:$0xff]  ;;  %v5383_v22 = vld [vmem:[#allocation62_spill] sm:$0xff] }
 0x114   : >> { %v1006_v14 = vmul.f32 %v5360_v60, %v5375_v25  ;;  %v1007_v55 = vmul.f32 %v5360_v60, %v5376_v9  ;;  %v1008_v0 = vmul.f32 %v5360_v60, %v5377_v51  ;;  %v1009_v32 = vmul.f32 %v5360_v60, %v5378_v38  ;;  %v5382_v42 = vld [vmem:[#allocation29_spill] sm:$0xff] }
 0x115   : >> { %v1010_v20 = vmul.f32 %v5360_v60, %v5379_v10  ;;  %v1011_v13 = vmul.f32 %v5360_v60, %v5380_v1  ;;  %v1012_v17 = vmul.f32 %v5360_v60, %v5381_v63  ;;  %v1013_v25 = vmul.f32 %v5360_v60, %v5382_v42 }
 0x116   : >> { %v1014_v9 = vmul.f32 %v5360_v60, %v5383_v22  ;;  %v1015_v50 = vadd.f32 %v991_v53, %v963_v44  ;;  %v1016_v51 = vadd.f32 %v992_v11, %v964_v8  ;;  %v1017_v36 = vadd.f32 %v993_v24, %v965_v28 }
 0x117   : >> { %v1018_v62 = vadd.f32 %v994_v40, %v966_v26  ;;  %v1019_v38 = vadd.f32 %v995_v3, %v967_v15  ;;  %v1020_v6 = vadd.f32 %v996_v39, %v968_v29  ;;  %v1021_v52 = vadd.f32 %v997_v5, %v969_v46  ;;  %v5384_v15 = vld [vmem:[#allocation69_spill] sm:$0xff]  ;;  %v5385_v29 = vld [vmem:[#allocation66_spill] sm:$0xff]  ;;  %v5395_v3 = vld [vmem:[#allocation20_spill] sm:$0xff] }
 0x118   : >> { %v1022_v10 = vadd.f32 %v998_v2, %v970_v41  ;;  %v1023_v31 = vadd.f32 %v999_v34, %v971_v58  ;;  %v1024_v35 = vadd.f32 %v1000_v43, %v972_v48  ;;  %v1025_v1 = vadd.f32 %v1001_v7, %v973_v18  ;;  %v5386_v41 = vld [vmem:[#allocation43_spill] sm:$0xff]  ;;  %v5387_v58 = vld [vmem:[#allocation70_spill] sm:$0xff]  ;;  %v5388_v18 = vld [vmem:[#allocation45_spill] sm:$0xff] }
 0x119   : >> { %v1026_v54 = vadd.f32 %v1002_v47, %v974_v61  ;;  %v1027_v63 = vadd.f32 %v1003_v59, %v975_v57  ;;  %v1028_v42 = vadd.f32 %v1004_v33, %v976_v21  ;;  %v1029_v22 = vadd.f32 %v1005_v56, %v977_v27  ;;  %v5389_v21 = vld [vmem:[#allocation27_spill] sm:$0xff]  ;;  %v5396_v5 = vld [vmem:[#allocation14_spill] sm:$0xff]  ;;  %v5398_v7 = vld [vmem:[#allocation16_spill] sm:$0xff] }
 0x11a   : >> { %v1030_v60 = vadd.f32 %v1006_v14, %v978_v49  ;;  %v1031_v44 = vadd.f32 %v1007_v55, %v979_v4  ;;  %v1032_v53 = vadd.f32 %v1008_v0, %v980_v12  ;;  %v1033_v8 = vadd.f32 %v1009_v32, %v981_v19  ;;  %v5390_v27 = vld [vmem:[#allocation47_spill] sm:$0xff]  ;;  %v5397_v34 = vld [vmem:[#allocation22_spill] sm:$0xff]  ;;  %v5399_v59 = vld [vmem:[#allocation68_spill] sm:$0xff] }
 0x11b   : >> { %v1034_v11 = vadd.f32 %v1010_v20, %v982_v37  ;;  %v1035_v24 = vadd.f32 %v1011_v13, %v983_v30  ;;  %v1036_v28 = vadd.f32 %v1012_v17, %v984_v45  ;;  %v1037_v26 = vadd.f32 %v1013_v25, %v985_v16  ;;  %v5391_v12 = vld [vmem:[#allocation71_spill] sm:$0xff]  ;;  %v5392_v37 = vld [vmem:[#allocation48_spill] sm:$0xff]  ;;  %v5400_v33 = vld [vmem:[#allocation21_spill] sm:$0xff] }
 0x11c   : >> { %v1038_v40 = vadd.f32 %v1014_v9, %v986_v23  ;;  %v1043_v46 = vmul.f32 %v5385_v29, %v5384_v15  ;;  %v1044_v48 = vmul.f32 %v5385_v29, %v5386_v41  ;;  %v1045_v61 = vmul.f32 %v5385_v29, %v5387_v58  ;;  %v5393_v45 = vld [vmem:[#allocation15_spill] sm:$0xff]  ;;  %v5394_v23 = vld [vmem:[#allocation49_spill] sm:$0xff]  ;;  %v5401_v56 = vld [vmem:[#allocation32_spill] sm:$0xff] }
 0x11d   : >> { %v1046_v49 = vmul.f32 %v5385_v29, %v5388_v18  ;;  %v1047_v57 = vmul.f32 %v5385_v29, %v5389_v21  ;;  %v1048_v4 = vmul.f32 %v5385_v29, %v5390_v27  ;;  %v1049_v19 = vmul.f32 %v5385_v29, %v5391_v12  ;;  %v5402_v14 = vld [vmem:[#allocation25_spill] sm:$0xff]  ;;  %v5403_v55 = vld [vmem:[#allocation26_spill] sm:$0xff] }
 0x11e   : >> { %v1050_v30 = vmul.f32 %v5385_v29, %v5392_v37  ;;  %v1051_v16 = vmul.f32 %v5385_v29, %v5393_v45  ;;  %v1052_v20 = vmul.f32 %v5385_v29, %v5394_v23  ;;  %v1053_v39 = vmul.f32 %v5385_v29, %v5395_v3  ;;  %v5404_v32 = vld [vmem:[#allocation61_spill] sm:$0xff]  ;;  %v5408_v3 = vld [vmem:[#allocation63_spill] sm:$0xff] }
 0x11f   : >> { %v1054_v2 = vmul.f32 %v5385_v29, %v5396_v5  ;;  %v1055_v43 = vmul.f32 %v5385_v29, %v5397_v34  ;;  %v1056_v47 = vmul.f32 %v5385_v29, %v5398_v7  ;;  %v1057_v13 = vmul.f32 %v5385_v29, %v5399_v59  ;;  %v5405_v15 = vld [vmem:[#allocation29_spill] sm:$0xff]  ;;  %v5406_v34 = vld [vmem:[#allocation62_spill] sm:$0xff]  ;;  %v5407_v5 = vld [vmem:[#allocation31_spill] sm:$0xff] }
 0x120   : >> { %v1058_v17 = vmul.f32 %v5385_v29, %v5400_v33  ;;  %v1059_v25 = vmul.f32 %v5385_v29, %v5401_v56  ;;  %v1060_v9 = vmul.f32 %v5385_v29, %v5402_v14  ;;  %v1061_v0 = vmul.f32 %v5385_v29, %v5403_v55 }
 0x121   : >> { %v1062_v41 = vmul.f32 %v5385_v29, %v5404_v32  ;;  %v1063_v7 = vmul.f32 %v5385_v29, %v5405_v15  ;;  %v1064_v59 = vmul.f32 %v5385_v29, %v5406_v34  ;;  %v1065_v33 = vmul.f32 %v5385_v29, %v5407_v5 }
 0x122   : >> { %v1066_v56 = vmul.f32 %v5385_v29, %v5408_v3  ;;  %v1067_v23 = vadd.f32 %v1043_v46, %v1015_v50  ;;  %v1068_v14 = vadd.f32 %v1044_v48, %v1016_v51  ;;  %v1069_v45 = vadd.f32 %v1045_v61, %v1017_v36 }
 0x123   : >> { %v1070_v37 = vadd.f32 %v1046_v49, %v1018_v62  ;;  %v1071_v55 = vadd.f32 %v1047_v57, %v1019_v38  ;;  %v1072_v12 = vadd.f32 %v1048_v4, %v1020_v6  ;;  %v1073_v27 = vadd.f32 %v1049_v19, %v1021_v52  ;;  %v5409_v38 = vld [vmem:[#allocation70_spill] sm:$0xff]  ;;  %v5410_v6 = vld [vmem:[#allocation67_spill] sm:$0xff]  ;;  %v5421_v19 = vld [vmem:[#allocation16_spill] sm:$0xff] }
 0x124   : >> { %v1074_v32 = vadd.f32 %v1050_v30, %v1022_v10  ;;  %v1075_v21 = vadd.f32 %v1051_v16, %v1023_v31  ;;  %v1076_v18 = vadd.f32 %v1052_v20, %v1024_v35  ;;  %v1077_v15 = vadd.f32 %v1053_v39, %v1025_v1  ;;  %v5411_v10 = vld [vmem:[#allocation45_spill] sm:$0xff]  ;;  %v5412_v1 = vld [vmem:[#allocation27_spill] sm:$0xff]  ;;  %v5420_v57 = vld [vmem:[#allocation22_spill] sm:$0xff] }
 0x125   : >> { %v1078_v58 = vadd.f32 %v1054_v2, %v1026_v54  ;;  %v1079_v34 = vadd.f32 %v1055_v43, %v1027_v63  ;;  %v1080_v5 = vadd.f32 %v1056_v47, %v1028_v42  ;;  %v1081_v3 = vadd.f32 %v1057_v13, %v1029_v22  ;;  %v5413_v31 = vld [vmem:[#allocation47_spill] sm:$0xff]  ;;  %v5422_v16 = vld [vmem:[#allocation68_spill] sm:$0xff]  ;;  %v5423_v39 = vld [vmem:[#allocation21_spill] sm:$0xff] }
 0x126   : >> { %v1082_v29 = vadd.f32 %v1058_v17, %v1030_v60  ;;  %v1083_v46 = vadd.f32 %v1059_v25, %v1031_v44  ;;  %v1084_v50 = vadd.f32 %v1060_v9, %v1032_v53  ;;  %v1085_v48 = vadd.f32 %v1061_v0, %v1033_v8  ;;  %v5414_v42 = vld [vmem:[#allocation71_spill] sm:$0xff]  ;;  %v5415_v60 = vld [vmem:[#allocation48_spill] sm:$0xff]  ;;  %v5425_v47 = vld [vmem:[#allocation25_spill] sm:$0xff] }
 0x127   : >> { %v1086_v51 = vadd.f32 %v1062_v41, %v1034_v11  ;;  %v1087_v36 = vadd.f32 %v1063_v7, %v1035_v24  ;;  %v1088_v61 = vadd.f32 %v1064_v59, %v1036_v28  ;;  %v1089_v49 = vadd.f32 %v1065_v33, %v1037_v26  ;;  %v5416_v53 = vld [vmem:[#allocation15_spill] sm:$0xff]  ;;  %v5417_v11 = vld [vmem:[#allocation49_spill] sm:$0xff]  ;;  %v5418_v28 = vld [vmem:[#allocation20_spill] sm:$0xff] }
 0x128   : >> { %v1090_v62 = vadd.f32 %v1066_v56, %v1038_v40  ;;  %v1095_v52 = vmul.f32 %v5410_v6, %v5409_v38  ;;  %v1096_v35 = vmul.f32 %v5410_v6, %v5411_v10  ;;  %v1097_v54 = vmul.f32 %v5410_v6, %v5412_v1  ;;  %v5419_v40 = vld [vmem:[#allocation14_spill] sm:$0xff]  ;;  %v5424_v43 = vld [vmem:[#allocation32_spill] sm:$0xff]  ;;  %v5427_v17 = vld [vmem:[#allocation61_spill] sm:$0xff] }
 0x129   : >> { %v1098_v22 = vmul.f32 %v5410_v6, %v5413_v31  ;;  %v1099_v63 = vmul.f32 %v5410_v6, %v5414_v42  ;;  %v1100_v44 = vmul.f32 %v5410_v6, %v5415_v60  ;;  %v1101_v8 = vmul.f32 %v5410_v6, %v5416_v53  ;;  %v5426_v13 = vld [vmem:[#allocation26_spill] sm:$0xff]  ;;  %v5428_v25 = vld [vmem:[#allocation29_spill] sm:$0xff]  ;;  %v5432_v31 = vld [vmem:[#allocation35_spill] sm:$0xff] }
 0x12a   : >> { %v1102_v24 = vmul.f32 %v5410_v6, %v5417_v11  ;;  %v1103_v26 = vmul.f32 %v5410_v6, %v5418_v28  ;;  %v1104_v41 = vmul.f32 %v5410_v6, %v5419_v40  ;;  %v1105_v4 = vmul.f32 %v5410_v6, %v5420_v57  ;;  %v5429_v0 = vld [vmem:[#allocation62_spill] sm:$0xff]  ;;  %v5430_v40 = vld [vmem:[#allocation31_spill] sm:$0xff]  ;;  %v5433_v10 = vld [vmem:[#allocation64_spill] sm:$0xff] }
 0x12b   : >> { %v1106_v30 = vmul.f32 %v5410_v6, %v5421_v19  ;;  %v1107_v20 = vmul.f32 %v5410_v6, %v5422_v16  ;;  %v1108_v2 = vmul.f32 %v5410_v6, %v5423_v39  ;;  %v1109_v7 = vmul.f32 %v5410_v6, %v5424_v43  ;;  %v5431_v11 = vld [vmem:[#allocation63_spill] sm:$0xff] }
 0x12c   : >> { %v1110_v59 = vmul.f32 %v5410_v6, %v5425_v47  ;;  %v1111_v33 = vmul.f32 %v5410_v6, %v5426_v13  ;;  %v1112_v56 = vmul.f32 %v5410_v6, %v5427_v17  ;;  %v1113_v9 = vmul.f32 %v5410_v6, %v5428_v25 }
 0x12d   : >> { %v1114_v19 = vmul.f32 %v5410_v6, %v5429_v0  ;;  %v1115_v39 = vmul.f32 %v5410_v6, %v5430_v40  ;;  %v1116_v60 = vmul.f32 %v5410_v6, %v5431_v11  ;;  %v1117_v47 = vmul.f32 %v5410_v6, %v5432_v31 }
 0x12e   : >> { %v1118_v13 = vmul.f32 %v5410_v6, %v5433_v10  ;;  %v3612_v43 = vadd.f32 %v1095_v52, %v1067_v23  ;;  %v3614_v17 = vadd.f32 %v1096_v35, %v1068_v14  ;;  %v3616_v25 = vadd.f32 %v1097_v54, %v1069_v45 }
 0x12f   : >> { %v3618_v16 = vadd.f32 %v1098_v22, %v1070_v37  ;;  %v3620_v0 = vadd.f32 %v1099_v63, %v1071_v55  ;;  %v3622_v40 = vadd.f32 %v1100_v44, %v1072_v12  ;;  %v3624_v57 = vadd.f32 %v1101_v8, %v1073_v27  ;;  %v5453_v8 = vld [vmem:[#allocation29_spill] sm:$0xff] }
 0x130   : >> { %v3626_v11 = vadd.f32 %v1102_v24, %v1074_v32  ;;  %v3628_v31 = vadd.f32 %v1103_v26, %v1075_v21  ;;  %v3630_v28 = vadd.f32 %v1104_v41, %v1076_v18  ;;  %v3632_v23 = vadd.f32 %v1105_v4, %v1077_v15  ;;  %v5454_v26 = vld [vmem:[#allocation31_spill] sm:$0xff]  ;;  %v5456_v4 = vld [vmem:[#allocation37_spill] sm:$0xff] }
 0x131   : >> { %v3634_v14 = vadd.f32 %v1106_v30, %v1078_v58  ;;  %v3636_v45 = vadd.f32 %v1107_v20, %v1079_v34  ;;  %v3638_v37 = vadd.f32 %v1108_v2, %v1080_v5  ;;  %v3640_v55 = vadd.f32 %v1109_v7, %v1081_v3  ;;  %v5446_v3 = vld [vmem:[#allocation60_spill] sm:$0xff]  ;;  %v5455_v41 = vld [vmem:[#allocation35_spill] sm:$0xff]  ;;  %v5458_v30 = vld [vmem:[#allocation41_spill] sm:$0xff] }
 0x132   : >> { %v3642_v12 = vadd.f32 %v1110_v59, %v1082_v29  ;;  %v3644_v27 = vadd.f32 %v1111_v33, %v1083_v46  ;;  %v3646_v32 = vadd.f32 %v1112_v56, %v1084_v50  ;;  %v3648_v21 = vadd.f32 %v1113_v9, %v1085_v48  ;;  %v5447_v29 = vld [vmem:[#allocation69_spill] sm:$0xff]  ;;  %v5461_v59 = vld [vmem:[#allocation47_spill] sm:$0xff]  ;;  %v5462_v33 = vld [vmem:[#allocation48_spill] sm:$0xff] }
 0x133   : >> { %5434 = vst [vmem:[#allocation44_spill] sm:$0xff] %v3636_v45  ;;  %5435 = vst [vmem:[#allocation46_spill] sm:$0xff] %v3638_v37  ;;  %v3650_v18 = vadd.f32 %v1114_v19, %v1086_v51  ;;  %v3652_v15 = vadd.f32 %v1115_v39, %v1087_v36  ;;  %v3654_v58 = vadd.f32 %v1116_v60, %v1088_v61  ;;  %v1145_v6 = vrot.slane %v5446_v3, 1  ;;  %v5448_v36 = vld [vmem:[#allocation20_spill] sm:$0xff]  ;;  %v5449_v61 = vld [vmem:[#allocation22_spill] sm:$0xff] }
 0x134   : >> { %5436 = vst [vmem:[#allocation28_spill] sm:$0xff] %v3640_v55  ;;  %5437 = vst [vmem:[#allocation33_spill] sm:$0xff] %v3642_v12  ;;  %v3656_v34 = vadd.f32 %v1117_v47, %v1089_v49  ;;  %v3658_v5 = vadd.f32 %v1118_v13, %v1090_v62  ;;  %v1146_v52 = vrot.slane %v5447_v29, 1  ;;  %v1147_v46 = vrot.slane %v5409_v38, 1  ;;  %v5450_v49 = vld [vmem:[#allocation68_spill] sm:$0xff]  ;;  %v5452_v60 = vld [vmem:[#allocation26_spill] sm:$0xff] }
 0x135   : >> { %5438 = vst [vmem:[#allocation30_spill] sm:$0xff] %v3644_v27  ;;  %5439 = vst [vmem:[#allocation34_spill] sm:$0xff] %v3646_v32  ;;  %v1148_v50 = vrot.slane %v5412_v1, 1  ;;  %v1149_v48 = vrot.slane %v5414_v42, 1  ;;  %v1150_v51 = vrot.slane %v5416_v53, 1  ;;  %v1151_v35 = vrot.slane %v5448_v36, 1 }
 0x136   : >> { %5440 = vst [vmem:[#allocation36_spill] sm:$0xff] %v3648_v21  ;;  %5441 = vst [vmem:[#allocation50_spill] sm:$0xff] %v3650_v18  ;;  %v1152_v54 = vrot.slane %v5449_v61, 1  ;;  %v1153_v22 = vrot.slane %v5450_v49, 1  ;;  %v5451_v62 = vld [vmem:[#allocation32_spill] sm:$0xff]  ;;  %v1155_v44 = vrot.slane %v5452_v60, 1 }
 0x137   : >> { %5442 = vst [vmem:[#allocation51_spill] sm:$0xff] %v3652_v15  ;;  %5443 = vst [vmem:[#allocation52_spill] sm:$0xff] %v3654_v58  ;;  %v1154_v63 = vrot.slane %v5451_v62, 1  ;;  %v1156_v24 = vrot.slane %v5453_v8, 1  ;;  %v1157_v38 = vrot.slane %v5454_v26, 1  ;;  %v1158_v1 = vrot.slane %v5455_v41, 1 }
 0x138   : >> { %5444 = vst [vmem:[#allocation53_spill] sm:$0xff] %v3656_v34  ;;  %5445 = vst [vmem:[#allocation54_spill] sm:$0xff] %v3658_v5  ;;  %v1159_v42 = vrot.slane %v5456_v4, 1  ;;  %v5457_v19 = vld [vmem:[#allocation39_spill] sm:$0xff]  ;;  %v1161_v20 = vrot.slane %v5458_v30, 1  ;;  %v5460_v7 = vld [vmem:[#allocation45_spill] sm:$0xff] }
 0x139   : >> { %v1160_v53 = vrot.slane %v5457_v19, 1  ;;  %v5459_v39 = vld [vmem:[#allocation43_spill] sm:$0xff]  ;;  %v1163_v47 = vrot.slane %v5460_v7, 1  ;;  %v1164_v13 = vrot.slane %v5461_v59, 1  ;;  %v1165_v56 = vrot.slane %v5462_v33, 1  ;;  %v5463_v9 = vld [vmem:[#allocation49_spill] sm:$0xff] }
 0x13a   : >> { %v1162_v2 = vrot.slane %v5459_v39, 1  ;;  %v1166_v3 = vrot.slane %v5463_v9, 1  ;;  %v5464_v29 = vld [vmem:[#allocation14_spill] sm:$0xff]  ;;  %v5465_v61 = vld [vmem:[#allocation16_spill] sm:$0xff]  ;;  %v5466_v62 = vld [vmem:[#allocation21_spill] sm:$0xff]  ;;  %v1174_v59 = vrot.slane %v5433_v10, 1 }
 0x13b   : >> { %v1167_v36 = vrot.slane %v5464_v29, 1  ;;  %v1168_v49 = vrot.slane %v5465_v61, 1  ;;  %v1169_v60 = vrot.slane %v5466_v62, 1  ;;  %v5467_v8 = vld [vmem:[#allocation25_spill] sm:$0xff]  ;;  %v5469_v19 = vld [vmem:[#allocation62_spill] sm:$0xff]  ;;  %v5470_v39 = vld [vmem:[#allocation63_spill] sm:$0xff]  ;;  %v3712_v10 = vsel %vm526_vm0, %v1147_v46, %v1163_v47 }
 0x13c   : >> { %v1170_v26 = vrot.slane %v5467_v8, 1  ;;  %v5468_v41 = vld [vmem:[#allocation61_spill] sm:$0xff]  ;;  %v1172_v30 = vrot.slane %v5469_v19, 1  ;;  %v1173_v7 = vrot.slane %v5470_v39, 1  ;;  %v5471_v5 = vld [vmem:[#allocation58_spill] sm:$0xff]  ;;  %v5475_v29 = vld [vmem:[#allocation59_spill] sm:$0xff]  ;;  %v3704_v8 = vsel %vm526_vm0, %v1145_v6, %v1161_v20 }
 0x13d   : >> { %v1171_v4 = vrot.slane %v5468_v41, 1  ;;  %v5472_v33 = vrot.slane %v5471_v5, 1  ;;  %v5476_v61 = vrot.slane %v5475_v29, 1  ;;  %5478 = vst [vmem:[#allocation57_spill] sm:$0xff] %v3704_v8  ;;  %v3708_v41 = vsel %vm526_vm0, %v1146_v52, %v1162_v2  ;;  %5480 = vst [vmem:[#allocation66_spill] sm:$0xff] %v3712_v10 }
 0x13e   : >> { %5479 = vst [vmem:[#allocation65_spill] sm:$0xff] %v3708_v41  ;;  %v3716_v19 = vsel %vm526_vm0, %v1148_v50, %v1164_v13  ;;  %v3720_v39 = vsel %vm526_vm0, %v1149_v48, %v1165_v56  ;;  %v3732_v58 = vsel %vm526_vm0, %v1152_v54, %v1168_v49  ;;  %v3736_v15 = vsel %vm526_vm0, %v1153_v22, %v1169_v60 }
 0x13f   : >> { %v3694_v9 = vsel %vm526_vm0, %v5472_v33, %v1159_v42  ;;  %v3700_v62 = vsel %vm526_vm0, %v5476_v61, %v1160_v53  ;;  %5481 = vst [vmem:[#allocation70_spill] sm:$0xff] %v3716_v19  ;;  %5482 = vst [vmem:[#allocation67_spill] sm:$0xff] %v3720_v39  ;;  %v3724_v33 = vsel %vm526_vm0, %v1150_v51, %v1166_v3  ;;  %v5492_v55 = vrot.slane %v5471_v5, 1 }
 0x140   : >> { %5474 = vst [vmem:[#allocation55_spill] sm:$0xff] %v3694_v9  ;;  %5477 = vst [vmem:[#allocation56_spill] sm:$0xff] %v3700_v62  ;;  %v3728_v61 = vsel %vm526_vm0, %v1151_v35, %v1167_v36  ;;  %v3740_v18 = vsel %vm526_vm0, %v1154_v63, %v1170_v26  ;;  %v3744_v21 = vsel %vm526_vm0, %v1155_v44, %v1171_v4 }
 0x141   : >> { %5483 = vst [vmem:[#allocation27_spill] sm:$0xff] %v3724_v33  ;;  %5484 = vst [vmem:[#allocation71_spill] sm:$0xff] %v3728_v61  ;;  %v3748_v32 = vsel %vm526_vm0, %v1156_v24, %v1172_v30  ;;  %v3752_v27 = vsel %vm526_vm0, %v1157_v38, %v1173_v7  ;;  %v3756_v12 = vsel %vm526_vm0, %v1158_v1, %v1174_v59 }
 0x142   : >> { %5485 = vst [vmem:[#allocation15_spill] sm:$0xff] %v3732_v58  ;;  %5486 = vst [vmem:[#allocation64_spill] sm:$0xff] %v3736_v15  ;;  %v3762_v37 = vsel %vm526_vm0, %v1159_v42, %v5492_v55  ;;  %v3780_v5 = vsel %vm526_vm0, %v1163_v47, %v1147_v46  ;;  %v3784_v55 = vsel %vm526_vm0, %v1164_v13, %v1148_v50  ;;  %v5510_v42 = vld [vmem:[#allocation42_spill] sm:$0xff] }
 0x143   : >> { %5487 = vst [vmem:[#allocation60_spill] sm:$0xff] %v3740_v18  ;;  %5488 = vst [vmem:[#allocation69_spill] sm:$0xff] %v3744_v21  ;;  %v5494_v21 = vrot.slane %v5475_v29, 1  ;;  %v3800_v46 = vsel %vm526_vm0, %v1168_v49, %v1152_v54  ;;  %v3804_v50 = vsel %vm526_vm0, %v1169_v60, %v1153_v22  ;;  %v3820_v54 = vsel %vm526_vm0, %v1173_v7, %v1157_v38  ;;  %v5519_v38 = vld [vmem:[#allocation23_spill] sm:$0xff] }
 0x144   : >> { %5489 = vst [vmem:[#allocation20_spill] sm:$0xff] %v3748_v32  ;;  %5490 = vst [vmem:[#allocation22_spill] sm:$0xff] %v3752_v27  ;;  %v3772_v32 = vsel %vm526_vm0, %v1161_v20, %v1145_v6  ;;  %v3776_v27 = vsel %vm526_vm0, %v1162_v2, %v1146_v52  ;;  %v3792_v6 = vsel %vm526_vm0, %v1166_v3, %v1150_v51  ;;  %v5512_v20 = vld [vmem:[#allocation17_spill] sm:$0xff] }
 0x145   : >> { %5491 = vst [vmem:[#allocation68_spill] sm:$0xff] %v3756_v12  ;;  %5493 = vst [vmem:[#allocation32_spill] sm:$0xff] %v3762_v37  ;;  %v3768_v45 = vsel %vm526_vm0, %v1160_v53, %v5494_v21  ;;  %v3788_v21 = vsel %vm526_vm0, %v1165_v56, %v1149_v48  ;;  %v3796_v52 = vsel %vm526_vm0, %v1167_v36, %v1151_v35  ;;  %v5511_v53 = vld [vmem:[#allocation8_spill] sm:$0xff]  ;;  %v5513_v2 = vld [vmem:[#allocation9_spill] sm:$0xff] }
 0x146   : >> { %5495 = vst [vmem:[#allocation26_spill] sm:$0xff] %v3768_v45  ;;  %5496 = vst [vmem:[#allocation29_spill] sm:$0xff] %v3772_v32  ;;  %v3808_v48 = vsel %vm526_vm0, %v1170_v26, %v1154_v63  ;;  %v3812_v51 = vsel %vm526_vm0, %v1171_v4, %v1155_v44  ;;  %v3816_v35 = vsel %vm526_vm0, %v1172_v30, %v1156_v24  ;;  %v5514_v44 = vld [vmem:[#allocation18_spill] sm:$0xff]  ;;  %v5516_v24 = vld [vmem:[#allocation19_spill] sm:$0xff] }
 0x147   : >> { %5497 = vst [vmem:[#allocation31_spill] sm:$0xff] %v3776_v27  ;;  %5498 = vst [vmem:[#allocation35_spill] sm:$0xff] %v3780_v5  ;;  %v3824_v22 = vsel %vm526_vm0, %v1174_v59, %v1158_v1  ;;  %v1210_v63 = vrot.slane %v5511_v53, %v5510_v42  ;;  %v3830_v47 = vrot.slane %v5513_v2, %v5512_v20  ;;  %v5517_v56 = vld [vmem:[#allocation10_spill] sm:$0xff] }
 0x148   : >> { %5499 = vst [vmem:[#allocation37_spill] sm:$0xff] %v3784_v55  ;;  %5500 = vst [vmem:[#allocation39_spill] sm:$0xff] %v3788_v21  ;;  %v3834_v13 = vrot.slane %v5513_v2, %v5514_v44  ;;  %v3838_v3 = vrot.slane %v5517_v56, %v5516_v24  ;;  %v3842_v36 = vrot.slane %v5517_v56, %v5519_v38 }
 0x149   : >> { %5501 = vst [vmem:[#allocation41_spill] sm:$0xff] %v3792_v6  ;;  %5502 = vst [vmem:[#allocation43_spill] sm:$0xff] %v3796_v52  ;;  %v1211_v49 = vmul.f32 %v1210_v63, %v3694_v9  ;;  %v1212_v60 = vmul.f32 %v1210_v63, %v3762_v37  ;;  %v1213_v26 = vmul.f32 %v1210_v63, %v3700_v62 }
 0x14a   : >> { %5503 = vst [vmem:[#allocation45_spill] sm:$0xff] %v3800_v46  ;;  %5504 = vst [vmem:[#allocation47_spill] sm:$0xff] %v3804_v50  ;;  %v1214_v4 = vmul.f32 %v1210_v63, %v3768_v45  ;;  %v1215_v30 = vmul.f32 %v1210_v63, %v3704_v8  ;;  %v1216_v7 = vmul.f32 %v1210_v63, %v3772_v32 }
 0x14b   : >> { %5505 = vst [vmem:[#allocation48_spill] sm:$0xff] %v3808_v48  ;;  %5506 = vst [vmem:[#allocation49_spill] sm:$0xff] %v3812_v51  ;;  %v1217_v59 = vmul.f32 %v1210_v63, %v3708_v41  ;;  %v1218_v29 = vmul.f32 %v1210_v63, %v3776_v27  ;;  %v1219_v20 = vmul.f32 %v1210_v63, %v3712_v10 }
 0x14c   : >> { %5507 = vst [vmem:[#allocation14_spill] sm:$0xff] %v3816_v35  ;;  %5508 = vst [vmem:[#allocation16_spill] sm:$0xff] %v3820_v54  ;;  %v1220_v44 = vmul.f32 %v1210_v63, %v3780_v5  ;;  %v1221_v24 = vmul.f32 %v1210_v63, %v3716_v19  ;;  %v1222_v38 = vmul.f32 %v1210_v63, %v3784_v55 }
 0x14d   : >> { %5509 = vst [vmem:[#allocation21_spill] sm:$0xff] %v3824_v22  ;;  %5515 = vst [vmem:[#allocation25_spill] sm:$0xff] %v3834_v13  ;;  %v1223_v1 = vmul.f32 %v1210_v63, %v3720_v39  ;;  %v1224_v56 = vmul.f32 %v1210_v63, %v3788_v21  ;;  %v1225_v42 = vmul.f32 %v1210_v63, %v3724_v33 }
 0x14e   : >> { %5518 = vst [vmem:[#allocation61_spill] sm:$0xff] %v3838_v3  ;;  %5520 = vst [vmem:[#allocation62_spill] sm:$0xff] %v3842_v36  ;;  %v1226_v2 = vmul.f32 %v1210_v63, %v3792_v6  ;;  %v1227_v53 = vmul.f32 %v1210_v63, %v3728_v61  ;;  %v1228_v34 = vmul.f32 %v1210_v63, %v3796_v52 }
 0x14f   : >> { %v1229_v9 = vmul.f32 %v1210_v63, %v3732_v58  ;;  %v1230_v37 = vmul.f32 %v1210_v63, %v3800_v46  ;;  %v1231_v22 = vmul.f32 %v1210_v63, %v3736_v15  ;;  %v1232_v12 = vmul.f32 %v1210_v63, %v3804_v50 }
 0x150   : >> { %v1233_v36 = vmul.f32 %v1210_v63, %v3740_v18  ;;  %v1234_v54 = vmul.f32 %v1210_v63, %v3808_v48  ;;  %v1235_v3 = vadd.f32 %v1211_v49, %v3612_v43  ;;  %v1236_v35 = vadd.f32 %v1212_v60, %v3614_v17  ;;  %v5521_v49 = vld [vmem:[#allocation44_spill] sm:$0xff]  ;;  %v5522_v60 = vld [vmem:[#allocation46_spill] sm:$0xff] }
 0x151   : >> { %v1237_v13 = vadd.f32 %v1213_v26, %v3616_v25  ;;  %v1238_v51 = vadd.f32 %v1214_v4, %v3618_v16  ;;  %v1239_v58 = vadd.f32 %v1215_v30, %v3620_v0  ;;  %v1240_v46 = vadd.f32 %v1216_v7, %v3622_v40  ;;  %v5523_v26 = vld [vmem:[#allocation28_spill] sm:$0xff]  ;;  %v5524_v4 = vld [vmem:[#allocation33_spill] sm:$0xff]  ;;  %v5525_v30 = vld [vmem:[#allocation30_spill] sm:$0xff] }
 0x152   : >> { %v1241_v15 = vadd.f32 %v1217_v59, %v3624_v57  ;;  %v1242_v50 = vadd.f32 %v1218_v29, %v3626_v11  ;;  %v1243_v18 = vadd.f32 %v1219_v20, %v3628_v31  ;;  %v1244_v63 = vadd.f32 %v1220_v44, %v3630_v28  ;;  %v5526_v7 = vld [vmem:[#allocation34_spill] sm:$0xff]  ;;  %v5527_v59 = vld [vmem:[#allocation36_spill] sm:$0xff]  ;;  %v5529_v20 = vld [vmem:[#allocation51_spill] sm:$0xff] }
 0x153   : >> { %v1245_v43 = vadd.f32 %v1221_v24, %v3632_v23  ;;  %v1246_v17 = vadd.f32 %v1222_v38, %v3634_v14  ;;  %v1247_v25 = vadd.f32 %v1223_v1, %v5521_v49  ;;  %v1248_v16 = vadd.f32 %v1224_v56, %v5522_v60  ;;  %v5528_v29 = vld [vmem:[#allocation50_spill] sm:$0xff]  ;;  %v5530_v44 = vld [vmem:[#allocation52_spill] sm:$0xff]  ;;  %v5531_v24 = vld [vmem:[#allocation53_spill] sm:$0xff] }
 0x154   : >> { %v1249_v0 = vadd.f32 %v1225_v42, %v5523_v26  ;;  %v1250_v40 = vadd.f32 %v1226_v2, %v5524_v4  ;;  %v1251_v57 = vadd.f32 %v1227_v53, %v5525_v30  ;;  %v1252_v11 = vadd.f32 %v1228_v34, %v5526_v7  ;;  %v5532_v38 = vld [vmem:[#allocation54_spill] sm:$0xff] }
 0x155   : >> { %v1253_v31 = vadd.f32 %v1229_v9, %v5527_v59  ;;  %v1254_v28 = vadd.f32 %v1230_v37, %v5528_v29  ;;  %v1255_v23 = vadd.f32 %v1231_v22, %v5529_v20  ;;  %v1256_v14 = vadd.f32 %v1232_v12, %v5530_v44  ;;  %v5533_v59 = vld [vmem:[#allocation15_spill] sm:$0xff]  ;;  %v5534_v20 = vld [vmem:[#allocation45_spill] sm:$0xff] }
 0x156   : >> { %v1257_v1 = vadd.f32 %v1233_v36, %v5531_v24  ;;  %v1258_v56 = vadd.f32 %v1234_v54, %v5532_v38  ;;  %v1263_v42 = vmul.f32 %v3830_v47, %v3700_v62  ;;  %v1264_v53 = vmul.f32 %v3830_v47, %v3768_v45  ;;  %v5535_v24 = vld [vmem:[#allocation64_spill] sm:$0xff]  ;;  %v5536_v45 = vld [vmem:[#allocation47_spill] sm:$0xff] }
 0x157   : >> { %v1265_v34 = vmul.f32 %v3830_v47, %v3704_v8  ;;  %v1266_v37 = vmul.f32 %v3830_v47, %v3772_v32  ;;  %v1267_v9 = vmul.f32 %v3830_v47, %v3708_v41  ;;  %v1268_v12 = vmul.f32 %v3830_v47, %v3776_v27 }
 0x158   : >> { %v1269_v54 = vmul.f32 %v3830_v47, %v3712_v10  ;;  %v1270_v22 = vmul.f32 %v3830_v47, %v3780_v5  ;;  %v1271_v2 = vmul.f32 %v3830_v47, %v3716_v19  ;;  %v1272_v36 = vmul.f32 %v3830_v47, %v3784_v55 }
 0x159   : >> { %v1273_v49 = vmul.f32 %v3830_v47, %v3720_v39  ;;  %v1274_v60 = vmul.f32 %v3830_v47, %v3788_v21  ;;  %v1275_v26 = vmul.f32 %v3830_v47, %v3724_v33  ;;  %v1276_v4 = vmul.f32 %v3830_v47, %v3792_v6  ;;  %v5537_v33 = vld [vmem:[#allocation60_spill] sm:$0xff]  ;;  %v5538_v21 = vld [vmem:[#allocation69_spill] sm:$0xff] }
 0x15a   : >> { %v1277_v30 = vmul.f32 %v3830_v47, %v3728_v61  ;;  %v1278_v7 = vmul.f32 %v3830_v47, %v3796_v52  ;;  %v1279_v29 = vmul.f32 %v3830_v47, %v5533_v59  ;;  %v1280_v44 = vmul.f32 %v3830_v47, %v5534_v20  ;;  %v5539_v39 = vld [vmem:[#allocation49_spill] sm:$0xff] }
 0x15b   : >> { %v1281_v38 = vmul.f32 %v3830_v47, %v5535_v24  ;;  %v1282_v62 = vmul.f32 %v3830_v47, %v5536_v45  ;;  %v1283_v6 = vmul.f32 %v3830_v47, %v5537_v33  ;;  %v1284_v61 = vmul.f32 %v3830_v47, %v3808_v48 }
 0x15c   : >> { %v1285_v52 = vmul.f32 %v3830_v47, %v5538_v21  ;;  %v1286_v59 = vmul.f32 %v3830_v47, %v5539_v39  ;;  %v1287_v55 = vadd.f32 %v1263_v42, %v1235_v3  ;;  %v1288_v20 = vadd.f32 %v1264_v53, %v1236_v35 }
 0x15d   : >> { %v1289_v19 = vadd.f32 %v1265_v34, %v1237_v13  ;;  %v1290_v5 = vadd.f32 %v1266_v37, %v1238_v51  ;;  %v1291_v24 = vadd.f32 %v1267_v9, %v1239_v58  ;;  %v1292_v10 = vadd.f32 %v1268_v12, %v1240_v46  ;;  %v5540_v58 = vld [vmem:[#allocation57_spill] sm:$0xff]  ;;  %v5553_v12 = vld [vmem:[#allocation71_spill] sm:$0xff] }
 0x15e   : >> { %v1293_v27 = vadd.f32 %v1269_v54, %v1241_v15  ;;  %v1294_v45 = vadd.f32 %v1270_v22, %v1242_v50  ;;  %v1295_v41 = vadd.f32 %v1271_v2, %v1243_v18  ;;  %v1296_v32 = vadd.f32 %v1272_v36, %v1244_v63  ;;  %v5541_v46 = vld [vmem:[#allocation25_spill] sm:$0xff]  ;;  %v5554_v22 = vld [vmem:[#allocation43_spill] sm:$0xff] }
 0x15f   : >> { %v1297_v33 = vadd.f32 %v1273_v49, %v1245_v43  ;;  %v1298_v8 = vadd.f32 %v1274_v60, %v1246_v17  ;;  %v1299_v48 = vadd.f32 %v1275_v26, %v1247_v25  ;;  %v1300_v21 = vadd.f32 %v1276_v4, %v1248_v16  ;;  %v5542_v50 = vld [vmem:[#allocation29_spill] sm:$0xff]  ;;  %v5544_v17 = vld [vmem:[#allocation31_spill] sm:$0xff]  ;;  %v5545_v16 = vld [vmem:[#allocation66_spill] sm:$0xff] }
 0x160   : >> { %v1301_v39 = vadd.f32 %v1277_v30, %v1249_v0  ;;  %v1302_v47 = vadd.f32 %v1278_v7, %v1250_v40  ;;  %v1303_v3 = vadd.f32 %v1279_v29, %v1251_v57  ;;  %v1304_v42 = vadd.f32 %v1280_v44, %v1252_v11  ;;  %v5543_v63 = vld [vmem:[#allocation65_spill] sm:$0xff]  ;;  %v5549_v11 = vld [vmem:[#allocation67_spill] sm:$0xff]  ;;  %v5557_v4 = vld [vmem:[#allocation64_spill] sm:$0xff] }
 0x161   : >> { %v1305_v35 = vadd.f32 %v1281_v38, %v1253_v31  ;;  %v1306_v53 = vadd.f32 %v1282_v62, %v1254_v28  ;;  %v1307_v13 = vadd.f32 %v1283_v6, %v1255_v23  ;;  %v1308_v34 = vadd.f32 %v1284_v61, %v1256_v14  ;;  %v5546_v62 = vld [vmem:[#allocation35_spill] sm:$0xff]  ;;  %v5547_v6 = vld [vmem:[#allocation70_spill] sm:$0xff]  ;;  %v5548_v40 = vld [vmem:[#allocation37_spill] sm:$0xff] }
 0x162   : >> { %v1309_v37 = vadd.f32 %v1285_v52, %v1257_v1  ;;  %v1310_v51 = vadd.f32 %v1286_v59, %v1258_v56  ;;  %v1315_v15 = vmul.f32 %v5541_v46, %v5540_v58  ;;  %v1316_v18 = vmul.f32 %v5541_v46, %v5542_v50  ;;  %v5550_v28 = vld [vmem:[#allocation39_spill] sm:$0xff]  ;;  %v5552_v56 = vld [vmem:[#allocation41_spill] sm:$0xff]  ;;  %v5559_v29 = vld [vmem:[#allocation60_spill] sm:$0xff] }
 0x163   : >> { %v1317_v43 = vmul.f32 %v5541_v46, %v5543_v63  ;;  %v1318_v25 = vmul.f32 %v5541_v46, %v5544_v17  ;;  %v1319_v0 = vmul.f32 %v5541_v46, %v5545_v16  ;;  %v1320_v61 = vmul.f32 %v5541_v46, %v5546_v62  ;;  %v5551_v14 = vld [vmem:[#allocation27_spill] sm:$0xff]  ;;  %v5556_v60 = vld [vmem:[#allocation45_spill] sm:$0xff]  ;;  %v5560_v38 = vld [vmem:[#allocation48_spill] sm:$0xff] }
 0x164   : >> { %v1321_v52 = vmul.f32 %v5541_v46, %v5547_v6  ;;  %v1322_v57 = vmul.f32 %v5541_v46, %v5548_v40  ;;  %v1323_v31 = vmul.f32 %v5541_v46, %v5549_v11  ;;  %v1324_v23 = vmul.f32 %v5541_v46, %v5550_v28  ;;  %v5555_v36 = vld [vmem:[#allocation15_spill] sm:$0xff]  ;;  %v5561_v58 = vld [vmem:[#allocation69_spill] sm:$0xff] }
 0x165   : >> { %v1325_v1 = vmul.f32 %v5541_v46, %v5551_v14  ;;  %v1326_v9 = vmul.f32 %v5541_v46, %v5552_v56  ;;  %v1327_v54 = vmul.f32 %v5541_v46, %v5553_v12  ;;  %v1328_v2 = vmul.f32 %v5541_v46, %v5554_v22  ;;  %v5558_v7 = vld [vmem:[#allocation47_spill] sm:$0xff]  ;;  %v5562_v12 = vld [vmem:[#allocation49_spill] sm:$0xff]  ;;  %v5563_v56 = vld [vmem:[#allocation20_spill] sm:$0xff] }
 0x166   : >> { %v1329_v49 = vmul.f32 %v5541_v46, %v5555_v36  ;;  %v1330_v26 = vmul.f32 %v5541_v46, %v5556_v60  ;;  %v1331_v30 = vmul.f32 %v5541_v46, %v5557_v4  ;;  %v1332_v59 = vmul.f32 %v5541_v46, %v5558_v7  ;;  %v5564_v14 = vld [vmem:[#allocation14_spill] sm:$0xff] }
 0x167   : >> { %v1333_v44 = vmul.f32 %v5541_v46, %v5559_v29  ;;  %v1334_v50 = vmul.f32 %v5541_v46, %v5560_v38  ;;  %v1335_v22 = vmul.f32 %v5541_v46, %v5561_v58  ;;  %v1336_v36 = vmul.f32 %v5541_v46, %v5562_v12 }
 0x168   : >> { %v1337_v60 = vmul.f32 %v5541_v46, %v5563_v56  ;;  %v1338_v4 = vmul.f32 %v5541_v46, %v5564_v14  ;;  %v1339_v28 = vadd.f32 %v1315_v15, %v1287_v55  ;;  %v1340_v7 = vadd.f32 %v1316_v18, %v1288_v20 }
 0x169   : >> { %v1341_v11 = vadd.f32 %v1317_v43, %v1289_v19  ;;  %v1342_v40 = vadd.f32 %v1318_v25, %v1290_v5  ;;  %v1343_v29 = vadd.f32 %v1319_v0, %v1291_v24  ;;  %v1344_v6 = vadd.f32 %v1320_v61, %v1292_v10  ;;  %v5565_v24 = vld [vmem:[#allocation65_spill] sm:$0xff]  ;;  %v5576_v0 = vld [vmem:[#allocation71_spill] sm:$0xff] }
 0x16a   : >> { %v1345_v62 = vadd.f32 %v1321_v52, %v1293_v27  ;;  %v1346_v38 = vadd.f32 %v1322_v57, %v1294_v45  ;;  %v1347_v16 = vadd.f32 %v1323_v31, %v1295_v41  ;;  %v1348_v17 = vadd.f32 %v1324_v23, %v1296_v32  ;;  %v5566_v10 = vld [vmem:[#allocation61_spill] sm:$0xff]  ;;  %v5567_v45 = vld [vmem:[#allocation31_spill] sm:$0xff]  ;;  %v5568_v41 = vld [vmem:[#allocation66_spill] sm:$0xff] }
 0x16b   : >> { %v1349_v58 = vadd.f32 %v1325_v1, %v1297_v33  ;;  %v1350_v63 = vadd.f32 %v1326_v9, %v1298_v8  ;;  %v1351_v12 = vadd.f32 %v1327_v54, %v1299_v48  ;;  %v1352_v56 = vadd.f32 %v1328_v2, %v1300_v21  ;;  %v5569_v33 = vld [vmem:[#allocation35_spill] sm:$0xff]  ;;  %v5570_v21 = vld [vmem:[#allocation70_spill] sm:$0xff]  ;;  %v5579_v1 = vld [vmem:[#allocation45_spill] sm:$0xff] }
 0x16c   : >> { %v1353_v14 = vadd.f32 %v1329_v49, %v1301_v39  ;;  %v1354_v46 = vadd.f32 %v1330_v26, %v1302_v47  ;;  %v1355_v15 = vadd.f32 %v1331_v30, %v1303_v3  ;;  %v1356_v55 = vadd.f32 %v1332_v59, %v1304_v42  ;;  %v5571_v47 = vld [vmem:[#allocation37_spill] sm:$0xff]  ;;  %v5572_v42 = vld [vmem:[#allocation67_spill] sm:$0xff]  ;;  %v5580_v54 = vld [vmem:[#allocation64_spill] sm:$0xff] }
 0x16d   : >> { %v1357_v18 = vadd.f32 %v1333_v44, %v1305_v35  ;;  %v1358_v20 = vadd.f32 %v1334_v50, %v1306_v53  ;;  %v1359_v19 = vadd.f32 %v1335_v22, %v1307_v13  ;;  %v1360_v43 = vadd.f32 %v1336_v36, %v1308_v34  ;;  %v5573_v53 = vld [vmem:[#allocation39_spill] sm:$0xff]  ;;  %v5582_v49 = vld [vmem:[#allocation60_spill] sm:$0xff]  ;;  %v5584_v30 = vld [vmem:[#allocation69_spill] sm:$0xff] }
 0x16e   : >> { %v1361_v5 = vadd.f32 %v1337_v60, %v1309_v37  ;;  %v1362_v25 = vadd.f32 %v1338_v4, %v1310_v51  ;;  %v1367_v27 = vmul.f32 %v5566_v10, %v5565_v24  ;;  %v1368_v32 = vmul.f32 %v5566_v10, %v5567_v45  ;;  %v5574_v34 = vld [vmem:[#allocation27_spill] sm:$0xff]  ;;  %v5575_v51 = vld [vmem:[#allocation41_spill] sm:$0xff]  ;;  %v5583_v26 = vld [vmem:[#allocation48_spill] sm:$0xff] }
 0x16f   : >> { %v1369_v8 = vmul.f32 %v5566_v10, %v5568_v41  ;;  %v1370_v39 = vmul.f32 %v5566_v10, %v5569_v33  ;;  %v1371_v48 = vmul.f32 %v5566_v10, %v5570_v21  ;;  %v1372_v3 = vmul.f32 %v5566_v10, %v5571_v47  ;;  %v5577_v52 = vld [vmem:[#allocation43_spill] sm:$0xff]  ;;  %v5585_v44 = vld [vmem:[#allocation49_spill] sm:$0xff]  ;;  %v5586_v24 = vld [vmem:[#allocation20_spill] sm:$0xff] }
 0x170   : >> { %v1373_v35 = vmul.f32 %v5566_v10, %v5572_v42  ;;  %v1374_v13 = vmul.f32 %v5566_v10, %v5573_v53  ;;  %v1375_v37 = vmul.f32 %v5566_v10, %v5574_v34  ;;  %v1376_v50 = vmul.f32 %v5566_v10, %v5575_v51  ;;  %v5578_v31 = vld [vmem:[#allocation15_spill] sm:$0xff] }
 0x171   : >> { %v1377_v61 = vmul.f32 %v5566_v10, %v5576_v0  ;;  %v1378_v57 = vmul.f32 %v5566_v10, %v5577_v52  ;;  %v1379_v23 = vmul.f32 %v5566_v10, %v5578_v31  ;;  %v1380_v9 = vmul.f32 %v5566_v10, %v5579_v1  ;;  %v5581_v2 = vld [vmem:[#allocation47_spill] sm:$0xff]  ;;  %v5587_v31 = vld [vmem:[#allocation14_spill] sm:$0xff]  ;;  %v5589_v0 = vld [vmem:[#allocation16_spill] sm:$0xff] }
 0x172   : >> { %v1381_v22 = vmul.f32 %v5566_v10, %v5580_v54  ;;  %v1382_v36 = vmul.f32 %v5566_v10, %v5581_v2  ;;  %v1383_v60 = vmul.f32 %v5566_v10, %v5582_v49  ;;  %v1384_v4 = vmul.f32 %v5566_v10, %v5583_v26  ;;  %v5588_v52 = vld [vmem:[#allocation22_spill] sm:$0xff] }
 0x173   : >> { %v1385_v59 = vmul.f32 %v5566_v10, %v5584_v30  ;;  %v1386_v45 = vmul.f32 %v5566_v10, %v5585_v44  ;;  %v1387_v1 = vmul.f32 %v5566_v10, %v5586_v24  ;;  %v1388_v54 = vmul.f32 %v5566_v10, %v5587_v31 }
 0x174   : >> { %v1389_v2 = vmul.f32 %v5566_v10, %v5588_v52  ;;  %v1390_v49 = vmul.f32 %v5566_v10, %v5589_v0  ;;  %v1391_v51 = vadd.f32 %v1367_v27, %v1339_v28  ;;  %v1392_v26 = vadd.f32 %v1368_v32, %v1340_v7 }
 0x175   : >> { %v1393_v34 = vadd.f32 %v1369_v8, %v1341_v11  ;;  %v1394_v53 = vadd.f32 %v1370_v39, %v1342_v40  ;;  %v1395_v30 = vadd.f32 %v1371_v48, %v1343_v29  ;;  %v1396_v42 = vadd.f32 %v1372_v3, %v1344_v6  ;;  %v5590_v29 = vld [vmem:[#allocation66_spill] sm:$0xff]  ;;  %v5601_v48 = vld [vmem:[#allocation15_spill] sm:$0xff] }
 0x176   : >> { %v1397_v47 = vadd.f32 %v1373_v35, %v1345_v62  ;;  %v1398_v44 = vadd.f32 %v1374_v13, %v1346_v38  ;;  %v1399_v21 = vadd.f32 %v1375_v37, %v1347_v16  ;;  %v1400_v33 = vadd.f32 %v1376_v50, %v1348_v17  ;;  %v5591_v6 = vld [vmem:[#allocation62_spill] sm:$0xff]  ;;  %v5592_v38 = vld [vmem:[#allocation35_spill] sm:$0xff]  ;;  %v5594_v16 = vld [vmem:[#allocation37_spill] sm:$0xff] }
 0x177   : >> { %v1401_v24 = vadd.f32 %v1377_v61, %v1349_v58  ;;  %v1402_v41 = vadd.f32 %v1378_v57, %v1350_v63  ;;  %v1403_v31 = vadd.f32 %v1379_v23, %v1351_v12  ;;  %v1404_v52 = vadd.f32 %v1380_v9, %v1352_v56  ;;  %v5593_v58 = vld [vmem:[#allocation70_spill] sm:$0xff]  ;;  %v5595_v56 = vld [vmem:[#allocation67_spill] sm:$0xff]  ;;  %v5602_v35 = vld [vmem:[#allocation45_spill] sm:$0xff] }
 0x178   : >> { %v1405_v0 = vadd.f32 %v1381_v22, %v1353_v14  ;;  %v1406_v10 = vadd.f32 %v1382_v36, %v1354_v46  ;;  %v1407_v27 = vadd.f32 %v1383_v60, %v1355_v15  ;;  %v1408_v28 = vadd.f32 %v1384_v4, %v1356_v55  ;;  %v5596_v46 = vld [vmem:[#allocation39_spill] sm:$0xff]  ;;  %v5603_v37 = vld [vmem:[#allocation64_spill] sm:$0xff]  ;;  %v5607_v22 = vld [vmem:[#allocation69_spill] sm:$0xff] }
 0x179   : >> { %v1409_v7 = vadd.f32 %v1385_v59, %v1357_v18  ;;  %v1410_v32 = vadd.f32 %v1386_v45, %v1358_v20  ;;  %v1411_v8 = vadd.f32 %v1387_v1, %v1359_v19  ;;  %v1412_v11 = vadd.f32 %v1388_v54, %v1360_v43  ;;  %v5597_v55 = vld [vmem:[#allocation27_spill] sm:$0xff]  ;;  %v5598_v20 = vld [vmem:[#allocation41_spill] sm:$0xff]  ;;  %v5605_v23 = vld [vmem:[#allocation60_spill] sm:$0xff] }
 0x17a   : >> { %v1413_v39 = vadd.f32 %v1389_v2, %v1361_v5  ;;  %v1414_v40 = vadd.f32 %v1390_v49, %v1362_v25  ;;  %v1419_v62 = vmul.f32 %v5591_v6, %v5590_v29  ;;  %v1420_v17 = vmul.f32 %v5591_v6, %v5592_v38  ;;  %v5599_v43 = vld [vmem:[#allocation71_spill] sm:$0xff]  ;;  %v5606_v9 = vld [vmem:[#allocation48_spill] sm:$0xff]  ;;  %v5608_v36 = vld [vmem:[#allocation49_spill] sm:$0xff] }
 0x17b   : >> { %v1421_v63 = vmul.f32 %v5591_v6, %v5593_v58  ;;  %v1422_v14 = vmul.f32 %v5591_v6, %v5594_v16  ;;  %v1423_v12 = vmul.f32 %v5591_v6, %v5595_v56  ;;  %v1424_v15 = vmul.f32 %v5591_v6, %v5596_v46  ;;  %v5600_v25 = vld [vmem:[#allocation43_spill] sm:$0xff]  ;;  %v5609_v60 = vld [vmem:[#allocation20_spill] sm:$0xff]  ;;  %v5610_v59 = vld [vmem:[#allocation14_spill] sm:$0xff] }
 0x17c   : >> { %v1425_v18 = vmul.f32 %v5591_v6, %v5597_v55  ;;  %v1426_v19 = vmul.f32 %v5591_v6, %v5598_v20  ;;  %v1427_v5 = vmul.f32 %v5591_v6, %v5599_v43  ;;  %v1428_v45 = vmul.f32 %v5591_v6, %v5600_v25  ;;  %v5604_v61 = vld [vmem:[#allocation47_spill] sm:$0xff]  ;;  %v5611_v25 = vld [vmem:[#allocation22_spill] sm:$0xff]  ;;  %v5612_v20 = vld [vmem:[#allocation16_spill] sm:$0xff] }
 0x17d   : >> { %v1429_v3 = vmul.f32 %v5591_v6, %v5601_v48  ;;  %v1430_v13 = vmul.f32 %v5591_v6, %v5602_v35  ;;  %v1431_v50 = vmul.f32 %v5591_v6, %v5603_v37  ;;  %v1432_v57 = vmul.f32 %v5591_v6, %v5604_v61  ;;  %v5613_v16 = vld [vmem:[#allocation68_spill] sm:$0xff]  ;;  %v5614_v38 = vld [vmem:[#allocation21_spill] sm:$0xff] }
 0x17e   : >> { %v1433_v1 = vmul.f32 %v5591_v6, %v5605_v23  ;;  %v1434_v54 = vmul.f32 %v5591_v6, %v5606_v9  ;;  %v1435_v2 = vmul.f32 %v5591_v6, %v5607_v22  ;;  %v1436_v49 = vmul.f32 %v5591_v6, %v5608_v36 }
 0x17f   : >> { %v1437_v4 = vmul.f32 %v5591_v6, %v5609_v60  ;;  %v1438_v35 = vmul.f32 %v5591_v6, %v5610_v59  ;;  %v1439_v61 = vmul.f32 %v5591_v6, %v5611_v25  ;;  %v1440_v46 = vmul.f32 %v5591_v6, %v5612_v20 }
 0x180   : >> { %v1441_v9 = vmul.f32 %v5591_v6, %v5613_v16  ;;  %v1442_v22 = vmul.f32 %v5591_v6, %v5614_v38  ;;  %v4085_v23 = vadd.f32 %v1419_v62, %v1391_v51  ;;  %v4087_v36 = vadd.f32 %v1420_v17, %v1392_v26 }
 0x181   : >> { %v4089_v60 = vadd.f32 %v1421_v63, %v1393_v34  ;;  %v4091_v37 = vadd.f32 %v1422_v14, %v1394_v53  ;;  %v4093_v59 = vadd.f32 %v1423_v12, %v1395_v30  ;;  %v4095_v25 = vadd.f32 %v1424_v15, %v1396_v42 }
 0x182   : >> { %v4097_v48 = vadd.f32 %v1425_v18, %v1397_v47  ;;  %v4099_v20 = vadd.f32 %v1426_v19, %v1398_v44  ;;  %v4101_v16 = vadd.f32 %v1427_v5, %v1399_v21  ;;  %v4103_v43 = vadd.f32 %v1428_v45, %v1400_v33  ;;  %v5633_v18 = vld [vmem:[#allocation69_spill] sm:$0xff]  ;;  %v5634_v5 = vld [vmem:[#allocation20_spill] sm:$0xff] }
 0x183   : >> { %v4105_v51 = vadd.f32 %v1429_v3, %v1401_v24  ;;  %v4107_v26 = vadd.f32 %v1430_v13, %v1402_v41  ;;  %v4109_v34 = vadd.f32 %v1431_v50, %v1403_v31  ;;  %v4111_v53 = vadd.f32 %v1432_v57, %v1404_v52  ;;  %v5635_v3 = vld [vmem:[#allocation22_spill] sm:$0xff]  ;;  %v5637_v13 = vld [vmem:[#allocation32_spill] sm:$0xff] }
 0x184   : >> { %v4113_v30 = vadd.f32 %v1433_v1, %v1405_v0  ;;  %v4115_v42 = vadd.f32 %v1434_v54, %v1406_v10  ;;  %v4117_v47 = vadd.f32 %v1435_v2, %v1407_v27  ;;  %v4119_v44 = vadd.f32 %v1436_v49, %v1408_v28  ;;  %v5626_v0 = vld [vmem:[#allocation56_spill] sm:$0xff]  ;;  %v5627_v10 = vld [vmem:[#allocation57_spill] sm:$0xff]  ;;  %v5638_v50 = vld [vmem:[#allocation26_spill] sm:$0xff] }
 0x185   : >> { %5615 = vst [vmem:[#allocation63_spill] sm:$0xff] %v4111_v53  ;;  %v4121_v21 = vadd.f32 %v1437_v4, %v1409_v7  ;;  %v4123_v33 = vadd.f32 %v1438_v35, %v1410_v32  ;;  %v4125_v24 = vadd.f32 %v1439_v61, %v1411_v8  ;;  %v4127_v41 = vadd.f32 %v1440_v46, %v1412_v11  ;;  %v5628_v27 = vld [vmem:[#allocation65_spill] sm:$0xff]  ;;  %v5629_v11 = vld [vmem:[#allocation71_spill] sm:$0xff]  ;;  %v5632_v46 = vld [vmem:[#allocation60_spill] sm:$0xff] }
 0x186   : >> { %5616 = vst [vmem:[#allocation58_spill] sm:$0xff] %v4113_v30  ;;  %5617 = vst [vmem:[#allocation59_spill] sm:$0xff] %v4115_v42  ;;  %v4129_v31 = vadd.f32 %v1441_v9, %v1413_v39  ;;  %v4131_v52 = vadd.f32 %v1442_v22, %v1414_v40  ;;  %v1468_v6 = vrot.slane %v5626_v0, 1  ;;  %v1469_v62 = vrot.slane %v5627_v10, 1  ;;  %v5630_v39 = vld [vmem:[#allocation15_spill] sm:$0xff]  ;;  %v5631_v40 = vld [vmem:[#allocation64_spill] sm:$0xff] }
 0x187   : >> { %5618 = vst [vmem:[#allocation17_spill] sm:$0xff] %v4117_v47  ;;  %5619 = vst [vmem:[#allocation18_spill] sm:$0xff] %v4119_v44  ;;  %v1470_v17 = vrot.slane %v5628_v27, 1  ;;  %v1471_v28 = vrot.slane %v5590_v29, 1  ;;  %v1472_v7 = vrot.slane %v5593_v58, 1  ;;  %v1473_v32 = vrot.slane %v5595_v56, 1 }
 0x188   : >> { %5620 = vst [vmem:[#allocation19_spill] sm:$0xff] %v4121_v21  ;;  %5621 = vst [vmem:[#allocation23_spill] sm:$0xff] %v4123_v33  ;;  %v1474_v8 = vrot.slane %v5597_v55, 1  ;;  %v1475_v63 = vrot.slane %v5629_v11, 1  ;;  %v1476_v14 = vrot.slane %v5630_v39, 1  ;;  %v1477_v12 = vrot.slane %v5631_v40, 1 }
 0x189   : >> { %5622 = vst [vmem:[#allocation44_spill] sm:$0xff] %v4125_v24  ;;  %5623 = vst [vmem:[#allocation46_spill] sm:$0xff] %v4127_v41  ;;  %v1478_v15 = vrot.slane %v5632_v46, 1  ;;  %v1479_v19 = vrot.slane %v5633_v18, 1  ;;  %v1480_v45 = vrot.slane %v5634_v5, 1  ;;  %v1481_v29 = vrot.slane %v5635_v3, 1 }
 0x18a   : >> { %5624 = vst [vmem:[#allocation28_spill] sm:$0xff] %v4129_v31  ;;  %5625 = vst [vmem:[#allocation33_spill] sm:$0xff] %v4131_v52  ;;  %v5636_v35 = vld [vmem:[#allocation68_spill] sm:$0xff]  ;;  %v1483_v56 = vrot.slane %v5637_v13, 1  ;;  %v1484_v55 = vrot.slane %v5638_v50, 1  ;;  %v5639_v61 = vld [vmem:[#allocation29_spill] sm:$0xff] }
 0x18b   : >> { %v1482_v58 = vrot.slane %v5636_v35, 1  ;;  %v1485_v57 = vrot.slane %v5639_v61, 1  ;;  %v5640_v1 = vld [vmem:[#allocation31_spill] sm:$0xff]  ;;  %v5642_v2 = vld [vmem:[#allocation37_spill] sm:$0xff]  ;;  %v5648_v3 = vld [vmem:[#allocation48_spill] sm:$0xff] }
 0x18c   : >> { %v1486_v9 = vrot.slane %v5640_v1, 1  ;;  %v5641_v54 = vld [vmem:[#allocation35_spill] sm:$0xff]  ;;  %v1488_v49 = vrot.slane %v5642_v2, 1  ;;  %v5644_v10 = vld [vmem:[#allocation41_spill] sm:$0xff]  ;;  %v1494_v35 = vrot.slane %v5648_v3, 1  ;;  %v5650_v61 = vld [vmem:[#allocation14_spill] sm:$0xff] }
 0x18d   : >> { %v1487_v22 = vrot.slane %v5641_v54, 1  ;;  %v5643_v4 = vld [vmem:[#allocation39_spill] sm:$0xff]  ;;  %v1490_v27 = vrot.slane %v5644_v10, 1  ;;  %v5646_v40 = vld [vmem:[#allocation45_spill] sm:$0xff]  ;;  %v1496_v1 = vrot.slane %v5650_v61, 1  ;;  %v5651_v52 = vld [vmem:[#allocation16_spill] sm:$0xff] }
 0x18e   : >> { %v1489_v0 = vrot.slane %v5643_v4, 1  ;;  %v5645_v11 = vld [vmem:[#allocation43_spill] sm:$0xff]  ;;  %v1492_v46 = vrot.slane %v5646_v40, 1  ;;  %v5649_v13 = vld [vmem:[#allocation49_spill] sm:$0xff]  ;;  %v1497_v54 = vrot.slane %v5651_v52, 1  ;;  %v1498_v2 = vrot.slane %v5614_v38, 1 }
 0x18f   : >> { %v1491_v39 = vrot.slane %v5645_v11, 1  ;;  %v5647_v18 = vld [vmem:[#allocation47_spill] sm:$0xff]  ;;  %v1495_v50 = vrot.slane %v5649_v13, 1  ;;  %v4170_v11 = vsel %vm526_vm0, %v1468_v6, %v1484_v55  ;;  %v4174_v40 = vsel %vm526_vm0, %v1469_v62, %v1485_v57 }
 0x190   : >> { %v1493_v5 = vrot.slane %v5647_v18, 1  ;;  %v5652_v31 = vld [vmem:[#allocation55_spill] sm:$0xff]  ;;  %5655 = vst [vmem:[#allocation30_spill] sm:$0xff] %v4174_v40  ;;  %v4178_v18 = vsel %vm526_vm0, %v1470_v17, %v1486_v9  ;;  %v4182_v38 = vsel %vm526_vm0, %v1471_v28, %v1487_v22  ;;  %v4186_v52 = vsel %vm526_vm0, %v1472_v7, %v1488_v49 }
 0x191   : >> { %v5653_v4 = vrot.slane %v5652_v31, 1  ;;  %5656 = vst [vmem:[#allocation34_spill] sm:$0xff] %v4178_v18  ;;  %5657 = vst [vmem:[#allocation36_spill] sm:$0xff] %v4182_v38  ;;  %v4190_v3 = vsel %vm526_vm0, %v1473_v32, %v1489_v0  ;;  %v4194_v13 = vsel %vm526_vm0, %v1474_v8, %v1490_v27  ;;  %v4198_v61 = vsel %vm526_vm0, %v1475_v63, %v1491_v39 }
 0x192   : >> { %5658 = vst [vmem:[#allocation50_spill] sm:$0xff] %v4186_v52  ;;  %5659 = vst [vmem:[#allocation51_spill] sm:$0xff] %v4190_v3  ;;  %v4206_v24 = vsel %vm526_vm0, %v1477_v12, %v1493_v5  ;;  %v4210_v33 = vsel %vm526_vm0, %v1478_v15, %v1494_v35  ;;  %v4214_v21 = vsel %vm526_vm0, %v1479_v19, %v1495_v50  ;;  %v5669_v30 = vrot.slane %v5652_v31, 1 }
 0x193   : >> { %v1499_v10 = vsel %vm526_vm0, %v5653_v4, %v1483_v56  ;;  %5660 = vst [vmem:[#allocation52_spill] sm:$0xff] %v4194_v13  ;;  %5661 = vst [vmem:[#allocation53_spill] sm:$0xff] %v4198_v61  ;;  %v4202_v4 = vsel %vm526_vm0, %v1476_v14, %v1492_v46  ;;  %v4218_v44 = vsel %vm526_vm0, %v1480_v45, %v1496_v1 }
 0x194   : >> { %5662 = vst [vmem:[#allocation54_spill] sm:$0xff] %v4202_v4  ;;  %5663 = vst [vmem:[#allocation25_spill] sm:$0xff] %v4206_v24  ;;  %v4222_v47 = vsel %vm526_vm0, %v1481_v29, %v1497_v54  ;;  %v4226_v42 = vsel %vm526_vm0, %v1482_v58, %v1498_v2  ;;  %v1515_v53 = vsel %vm526_vm0, %v1483_v56, %v5669_v30  ;;  %v5685_v56 = vld [vmem:[#allocation8_spill] sm:$0xff] }
 0x195   : >> { %5664 = vst [vmem:[#allocation61_spill] sm:$0xff] %v4210_v33  ;;  %5665 = vst [vmem:[#allocation66_spill] sm:$0xff] %v4214_v21  ;;  %v4234_v21 = vsel %vm526_vm0, %v1484_v55, %v1468_v6  ;;  %v4250_v31 = vsel %vm526_vm0, %v1488_v49, %v1472_v7  ;;  %v4254_v30 = vsel %vm526_vm0, %v1489_v0, %v1473_v32  ;;  %v5686_v55 = vld [vmem:[#allocation38_spill] sm:$0xff] }
 0x196   : >> { %5666 = vst [vmem:[#allocation62_spill] sm:$0xff] %v4218_v44  ;;  %5667 = vst [vmem:[#allocation70_spill] sm:$0xff] %v4222_v47  ;;  %v4238_v44 = vsel %vm526_vm0, %v1485_v57, %v1469_v62  ;;  %v4242_v47 = vsel %vm526_vm0, %v1486_v9, %v1470_v17  ;;  %v4258_v6 = vsel %vm526_vm0, %v1490_v27, %v1474_v8  ;;  %v5687_v57 = vld [vmem:[#allocation9_spill] sm:$0xff]  ;;  %v5691_v49 = vld [vmem:[#allocation10_spill] sm:$0xff] }
 0x197   : >> { %5668 = vst [vmem:[#allocation67_spill] sm:$0xff] %v4226_v42  ;;  %5670 = vst [vmem:[#allocation27_spill] sm:$0xff] %v4238_v44  ;;  %v4246_v42 = vsel %vm526_vm0, %v1487_v22, %v1471_v28  ;;  %v4262_v62 = vsel %vm526_vm0, %v1491_v39, %v1475_v63  ;;  %v4266_v17 = vsel %vm526_vm0, %v1492_v46, %v1476_v14 }
 0x198   : >> { %5671 = vst [vmem:[#allocation21_spill] sm:$0xff] %v4242_v47  ;;  %5672 = vst [vmem:[#allocation56_spill] sm:$0xff] %v4246_v42  ;;  %v4270_v28 = vsel %vm526_vm0, %v1493_v5, %v1477_v12  ;;  %v4274_v7 = vsel %vm526_vm0, %v1494_v35, %v1478_v15  ;;  %v4278_v32 = vsel %vm526_vm0, %v1495_v50, %v1479_v19  ;;  %v5684_v12 = vld [vmem:[#allocation24_spill] sm:$0xff] }
 0x199   : >> { %5673 = vst [vmem:[#allocation57_spill] sm:$0xff] %v4250_v31  ;;  %5674 = vst [vmem:[#allocation65_spill] sm:$0xff] %v4254_v30  ;;  %v4282_v8 = vsel %vm526_vm0, %v1496_v1, %v1480_v45  ;;  %v4286_v63 = vsel %vm526_vm0, %v1497_v54, %v1481_v29  ;;  %v4290_v14 = vsel %vm526_vm0, %v1498_v2, %v1482_v58  ;;  %v5688_v19 = vld [vmem:[#allocation40_spill] sm:$0xff]  ;;  %v5690_v45 = vld [vmem:[#allocation42_spill] sm:$0xff] }
 0x19a   : >> { %5675 = vst [vmem:[#allocation71_spill] sm:$0xff] %v4258_v6  ;;  %5676 = vst [vmem:[#allocation15_spill] sm:$0xff] %v4262_v62  ;;  %v1534_v15 = vrot.slane %v5685_v56, %v5684_v12  ;;  %v4296_v9 = vrot.slane %v5687_v57, %v5686_v55  ;;  %v4300_v22 = vrot.slane %v5687_v57, %v5688_v19  ;;  %v5693_v29 = vld [vmem:[#allocation11_spill] sm:$0xff] }
 0x19b   : >> { %5677 = vst [vmem:[#allocation64_spill] sm:$0xff] %v4266_v17  ;;  %5678 = vst [vmem:[#allocation60_spill] sm:$0xff] %v4270_v28  ;;  %v4304_v0 = vrot.slane %v5691_v49, %v5690_v45  ;;  %v4308_v41 = vmul.f32 %v5693_v29, %v4182_v38 }
 0x19c   : >> { %5679 = vst [vmem:[#allocation69_spill] sm:$0xff] %v4274_v7  ;;  %5680 = vst [vmem:[#allocation20_spill] sm:$0xff] %v4278_v32  ;;  %v1535_v58 = vmul.f32 %v1534_v15, %v1499_v10  ;;  %v1536_v27 = vmul.f32 %v1534_v15, %v1515_v53  ;;  %v1537_v39 = vmul.f32 %v1534_v15, %v4170_v11 }
 0x19d   : >> { %5681 = vst [vmem:[#allocation22_spill] sm:$0xff] %v4282_v8  ;;  %5682 = vst [vmem:[#allocation68_spill] sm:$0xff] %v4286_v63  ;;  %v1538_v46 = vmul.f32 %v1534_v15, %v4234_v21  ;;  %v1539_v5 = vmul.f32 %v1534_v15, %v4174_v40  ;;  %v1540_v35 = vmul.f32 %v1534_v15, %v4238_v44 }
 0x19e   : >> { %5683 = vst [vmem:[#allocation32_spill] sm:$0xff] %v4290_v14  ;;  %5689 = vst [vmem:[#allocation26_spill] sm:$0xff] %v4300_v22  ;;  %v1541_v50 = vmul.f32 %v1534_v15, %v4178_v18  ;;  %v1542_v1 = vmul.f32 %v1534_v15, %v4242_v47  ;;  %v1543_v54 = vmul.f32 %v1534_v15, %v4182_v38 }
 0x19f   : >> { %5692 = vst [vmem:[#allocation29_spill] sm:$0xff] %v4304_v0  ;;  %5694 = vst [vmem:[#allocation31_spill] sm:$0xff] %v4308_v41  ;;  %v1544_v2 = vmul.f32 %v1534_v15, %v4246_v42  ;;  %v1545_v12 = vmul.f32 %v1534_v15, %v4186_v52  ;;  %v1546_v53 = vmul.f32 %v1534_v15, %v4250_v31 }
 0x1a0   : >> { %v1547_v10 = vmul.f32 %v1534_v15, %v4190_v3  ;;  %v1548_v56 = vmul.f32 %v1534_v15, %v4254_v30  ;;  %v1549_v55 = vmul.f32 %v1534_v15, %v4194_v13  ;;  %v1550_v57 = vmul.f32 %v1534_v15, %v4258_v6 }
 0x1a1   : >> { %v1551_v19 = vmul.f32 %v1534_v15, %v4198_v61  ;;  %v1552_v45 = vmul.f32 %v1534_v15, %v4262_v62  ;;  %v1553_v49 = vmul.f32 %v1534_v15, %v4202_v4  ;;  %v1554_v41 = vmul.f32 %v1534_v15, %v4266_v17 }
 0x1a2   : >> { %v1555_v14 = vmul.f32 %v1534_v15, %v4206_v24  ;;  %v1556_v29 = vmul.f32 %v1534_v15, %v4270_v28  ;;  %v1557_v63 = vmul.f32 %v1534_v15, %v4210_v33  ;;  %v1558_v0 = vmul.f32 %v1534_v15, %v4274_v7 }
 0x1a3   : >> { %v1559_v8 = vadd.f32 %v1535_v58, %v4085_v23  ;;  %v1560_v22 = vadd.f32 %v1536_v27, %v4087_v36  ;;  %v1561_v32 = vadd.f32 %v1537_v39, %v4089_v60  ;;  %v1562_v62 = vadd.f32 %v1538_v46, %v4091_v37  ;;  %v5695_v58 = vld [vmem:[#allocation63_spill] sm:$0xff]  ;;  %v5696_v27 = vld [vmem:[#allocation58_spill] sm:$0xff]  ;;  %v5698_v46 = vld [vmem:[#allocation17_spill] sm:$0xff] }
 0x1a4   : >> { %v1563_v4 = vadd.f32 %v1539_v5, %v4093_v59  ;;  %v1564_v17 = vadd.f32 %v1540_v35, %v4095_v25  ;;  %v1565_v24 = vadd.f32 %v1541_v50, %v4097_v48  ;;  %v1566_v28 = vadd.f32 %v1542_v1, %v4099_v20  ;;  %v5697_v39 = vld [vmem:[#allocation59_spill] sm:$0xff]  ;;  %v5699_v5 = vld [vmem:[#allocation18_spill] sm:$0xff]  ;;  %v5702_v1 = vld [vmem:[#allocation44_spill] sm:$0xff] }
 0x1a5   : >> { %v1567_v33 = vadd.f32 %v1543_v54, %v4101_v16  ;;  %v1568_v15 = vadd.f32 %v1544_v2, %v4103_v43  ;;  %v1569_v23 = vadd.f32 %v1545_v12, %v4105_v51  ;;  %v1570_v36 = vadd.f32 %v1546_v53, %v4107_v26  ;;  %v5700_v35 = vld [vmem:[#allocation19_spill] sm:$0xff]  ;;  %v5703_v54 = vld [vmem:[#allocation46_spill] sm:$0xff]  ;;  %v5704_v2 = vld [vmem:[#allocation28_spill] sm:$0xff] }
 0x1a6   : >> { %v1571_v60 = vadd.f32 %v1547_v10, %v4109_v34  ;;  %v1572_v37 = vadd.f32 %v1548_v56, %v5695_v58  ;;  %v1573_v59 = vadd.f32 %v1549_v55, %v5696_v27  ;;  %v1574_v25 = vadd.f32 %v1550_v57, %v5697_v39  ;;  %v5701_v50 = vld [vmem:[#allocation23_spill] sm:$0xff]  ;;  %v5705_v12 = vld [vmem:[#allocation33_spill] sm:$0xff] }
 0x1a7   : >> { %v1575_v48 = vadd.f32 %v1551_v19, %v5698_v46  ;;  %v1576_v20 = vadd.f32 %v1552_v45, %v5699_v5  ;;  %v1577_v16 = vadd.f32 %v1553_v49, %v5700_v35  ;;  %v1578_v43 = vadd.f32 %v1554_v41, %v5701_v50  ;;  %v5706_v27 = vld [vmem:[#allocation15_spill] sm:$0xff]  ;;  %v5707_v46 = vld [vmem:[#allocation54_spill] sm:$0xff]  ;;  %v5708_v35 = vld [vmem:[#allocation64_spill] sm:$0xff] }
 0x1a8   : >> { %v1579_v51 = vadd.f32 %v1555_v14, %v5702_v1  ;;  %v1580_v26 = vadd.f32 %v1556_v29, %v5703_v54  ;;  %v1581_v34 = vadd.f32 %v1557_v63, %v5704_v2  ;;  %v1582_v53 = vadd.f32 %v1558_v0, %v5705_v12  ;;  %v5709_v1 = vld [vmem:[#allocation25_spill] sm:$0xff]  ;;  %v5710_v2 = vld [vmem:[#allocation60_spill] sm:$0xff] }
 0x1a9   : >> { %v1587_v10 = vmul.f32 %v4296_v9, %v4170_v11  ;;  %v1588_v56 = vmul.f32 %v4296_v9, %v4234_v21  ;;  %v1589_v55 = vmul.f32 %v4296_v9, %v4174_v40  ;;  %v1590_v41 = vmul.f32 %v4296_v9, %v4238_v44 }
 0x1aa   : >> { %v1591_v14 = vmul.f32 %v4296_v9, %v4178_v18  ;;  %v1592_v63 = vmul.f32 %v4296_v9, %v4242_v47  ;;  %v1593_v0 = vmul.f32 %v4296_v9, %v4182_v38  ;;  %v1594_v11 = vmul.f32 %v4296_v9, %v4246_v42 }
 0x1ab   : >> { %v1595_v21 = vmul.f32 %v4296_v9, %v4186_v52  ;;  %v1596_v29 = vmul.f32 %v4296_v9, %v4250_v31  ;;  %v1597_v57 = vmul.f32 %v4296_v9, %v4190_v3  ;;  %v1598_v19 = vmul.f32 %v4296_v9, %v4254_v30  ;;  %v5712_v30 = vld [vmem:[#allocation66_spill] sm:$0xff]  ;;  %v5713_v3 = vld [vmem:[#allocation20_spill] sm:$0xff] }
 0x1ac   : >> { %v1599_v45 = vmul.f32 %v4296_v9, %v4194_v13  ;;  %v1600_v49 = vmul.f32 %v4296_v9, %v4258_v6  ;;  %v1601_v58 = vmul.f32 %v4296_v9, %v4198_v61  ;;  %v1602_v39 = vmul.f32 %v4296_v9, %v5706_v27  ;;  %v5711_v13 = vld [vmem:[#allocation61_spill] sm:$0xff] }
 0x1ad   : >> { %v1603_v5 = vmul.f32 %v4296_v9, %v5707_v46  ;;  %v1604_v50 = vmul.f32 %v4296_v9, %v5708_v35  ;;  %v1605_v54 = vmul.f32 %v4296_v9, %v5709_v1  ;;  %v1606_v12 = vmul.f32 %v4296_v9, %v5710_v2 }
 0x1ae   : >> { %v1607_v6 = vmul.f32 %v4296_v9, %v5711_v13  ;;  %v1608_v61 = vmul.f32 %v4296_v9, %v4274_v7  ;;  %v1609_v27 = vmul.f32 %v4296_v9, %v5712_v30  ;;  %v1610_v46 = vmul.f32 %v4296_v9, %v5713_v3 }
 0x1af   : >> { %v1611_v31 = vadd.f32 %v1587_v10, %v1559_v8  ;;  %v1612_v35 = vadd.f32 %v1588_v56, %v1560_v22  ;;  %v1613_v52 = vadd.f32 %v1589_v55, %v1561_v32  ;;  %v1614_v42 = vadd.f32 %v1590_v41, %v1562_v62 }
 0x1b0   : >> { %v1615_v1 = vadd.f32 %v1591_v14, %v1563_v4  ;;  %v1616_v38 = vadd.f32 %v1592_v63, %v1564_v17  ;;  %v1617_v47 = vadd.f32 %v1593_v0, %v1565_v24  ;;  %v1618_v2 = vadd.f32 %v1594_v11, %v1566_v28  ;;  %v5714_v4 = vld [vmem:[#allocation30_spill] sm:$0xff]  ;;  %v5716_v28 = vld [vmem:[#allocation27_spill] sm:$0xff]  ;;  %v5727_v11 = vld [vmem:[#allocation53_spill] sm:$0xff] }
 0x1b1   : >> { %v1619_v18 = vadd.f32 %v1595_v21, %v1567_v33  ;;  %v1620_v44 = vadd.f32 %v1596_v29, %v1568_v15  ;;  %v1621_v13 = vadd.f32 %v1597_v57, %v1569_v23  ;;  %v1622_v40 = vadd.f32 %v1598_v19, %v1570_v36  ;;  %v5715_v17 = vld [vmem:[#allocation26_spill] sm:$0xff]  ;;  %v5718_v36 = vld [vmem:[#allocation21_spill] sm:$0xff]  ;;  %v5726_v63 = vld [vmem:[#allocation71_spill] sm:$0xff] }
 0x1b2   : >> { %v1623_v7 = vadd.f32 %v1599_v45, %v1571_v60  ;;  %v1624_v30 = vadd.f32 %v1600_v49, %v1572_v37  ;;  %v1625_v3 = vadd.f32 %v1601_v58, %v1573_v59  ;;  %v1626_v9 = vadd.f32 %v1602_v39, %v1574_v25  ;;  %v5717_v15 = vld [vmem:[#allocation34_spill] sm:$0xff]  ;;  %v5719_v37 = vld [vmem:[#allocation36_spill] sm:$0xff]  ;;  %v5728_v29 = vld [vmem:[#allocation15_spill] sm:$0xff] }
 0x1b3   : >> { %v1627_v8 = vadd.f32 %v1603_v5, %v1575_v48  ;;  %v1628_v10 = vadd.f32 %v1604_v50, %v1576_v20  ;;  %v1629_v22 = vadd.f32 %v1605_v54, %v1577_v16  ;;  %v1630_v56 = vadd.f32 %v1606_v12, %v1578_v43  ;;  %v5720_v25 = vld [vmem:[#allocation56_spill] sm:$0xff]  ;;  %v5722_v20 = vld [vmem:[#allocation57_spill] sm:$0xff]  ;;  %v5723_v43 = vld [vmem:[#allocation51_spill] sm:$0xff] }
 0x1b4   : >> { %v1631_v32 = vadd.f32 %v1607_v6, %v1579_v51  ;;  %v1632_v55 = vadd.f32 %v1608_v61, %v1580_v26  ;;  %v1633_v41 = vadd.f32 %v1609_v27, %v1581_v34  ;;  %v1634_v62 = vadd.f32 %v1610_v46, %v1582_v53  ;;  %v5721_v6 = vld [vmem:[#allocation50_spill] sm:$0xff]  ;;  %v5724_v26 = vld [vmem:[#allocation65_spill] sm:$0xff]  ;;  %v5725_v53 = vld [vmem:[#allocation52_spill] sm:$0xff] }
 0x1b5   : >> { %v1639_v24 = vmul.f32 %v5715_v17, %v5714_v4  ;;  %v1640_v33 = vmul.f32 %v5715_v17, %v5716_v28  ;;  %v1641_v23 = vmul.f32 %v5715_v17, %v5717_v15  ;;  %v1642_v60 = vmul.f32 %v5715_v17, %v5718_v36  ;;  %v5729_v19 = vld [vmem:[#allocation54_spill] sm:$0xff]  ;;  %v5730_v49 = vld [vmem:[#allocation64_spill] sm:$0xff]  ;;  %v5731_v27 = vld [vmem:[#allocation25_spill] sm:$0xff] }
 0x1b6   : >> { %v1643_v59 = vmul.f32 %v5715_v17, %v5719_v37  ;;  %v1644_v61 = vmul.f32 %v5715_v17, %v5720_v25  ;;  %v1645_v48 = vmul.f32 %v5715_v17, %v5721_v6  ;;  %v1646_v16 = vmul.f32 %v5715_v17, %v5722_v20  ;;  %v5732_v46 = vld [vmem:[#allocation60_spill] sm:$0xff]  ;;  %v5733_v50 = vld [vmem:[#allocation61_spill] sm:$0xff]  ;;  %v5735_v28 = vld [vmem:[#allocation66_spill] sm:$0xff] }
 0x1b7   : >> { %v1647_v51 = vmul.f32 %v5715_v17, %v5723_v43  ;;  %v1648_v34 = vmul.f32 %v5715_v17, %v5724_v26  ;;  %v1649_v14 = vmul.f32 %v5715_v17, %v5725_v53  ;;  %v1650_v0 = vmul.f32 %v5715_v17, %v5726_v63  ;;  %v5734_v12 = vld [vmem:[#allocation69_spill] sm:$0xff]  ;;  %v5737_v63 = vld [vmem:[#allocation62_spill] sm:$0xff] }
 0x1b8   : >> { %v1651_v21 = vmul.f32 %v5715_v17, %v5727_v11  ;;  %v1652_v57 = vmul.f32 %v5715_v17, %v5728_v29  ;;  %v1653_v45 = vmul.f32 %v5715_v17, %v5729_v19  ;;  %v1654_v58 = vmul.f32 %v5715_v17, %v5730_v49  ;;  %v5736_v11 = vld [vmem:[#allocation20_spill] sm:$0xff]  ;;  %v5738_v53 = vld [vmem:[#allocation22_spill] sm:$0xff] }
 0x1b9   : >> { %v1655_v39 = vmul.f32 %v5715_v17, %v5731_v27  ;;  %v1656_v5 = vmul.f32 %v5715_v17, %v5732_v46  ;;  %v1657_v54 = vmul.f32 %v5715_v17, %v5733_v50  ;;  %v1658_v4 = vmul.f32 %v5715_v17, %v5734_v12 }
 0x1ba   : >> { %v1659_v29 = vmul.f32 %v5715_v17, %v5735_v28  ;;  %v1660_v19 = vmul.f32 %v5715_v17, %v5736_v11  ;;  %v1661_v49 = vmul.f32 %v5715_v17, %v5737_v63  ;;  %v1662_v27 = vmul.f32 %v5715_v17, %v5738_v53 }
 0x1bb   : >> { %v1663_v26 = vadd.f32 %v1639_v24, %v1611_v31  ;;  %v1664_v46 = vadd.f32 %v1640_v33, %v1612_v35  ;;  %v1665_v43 = vadd.f32 %v1641_v23, %v1613_v52  ;;  %v1666_v20 = vadd.f32 %v1642_v60, %v1614_v42 }
 0x1bc   : >> { %v1667_v50 = vadd.f32 %v1643_v59, %v1615_v1  ;;  %v1668_v6 = vadd.f32 %v1644_v61, %v1616_v38  ;;  %v1669_v25 = vadd.f32 %v1645_v48, %v1617_v47  ;;  %v1670_v12 = vadd.f32 %v1646_v16, %v1618_v2  ;;  %v5739_v1 = vld [vmem:[#allocation34_spill] sm:$0xff]  ;;  %v5740_v38 = vld [vmem:[#allocation29_spill] sm:$0xff]  ;;  %v5751_v16 = vld [vmem:[#allocation15_spill] sm:$0xff] }
 0x1bd   : >> { %v1671_v37 = vadd.f32 %v1647_v51, %v1619_v18  ;;  %v1672_v36 = vadd.f32 %v1648_v34, %v1620_v44  ;;  %v1673_v28 = vadd.f32 %v1649_v14, %v1621_v13  ;;  %v1674_v15 = vadd.f32 %v1650_v0, %v1622_v40  ;;  %v5741_v2 = vld [vmem:[#allocation21_spill] sm:$0xff]  ;;  %v5742_v18 = vld [vmem:[#allocation36_spill] sm:$0xff]  ;;  %v5752_v34 = vld [vmem:[#allocation54_spill] sm:$0xff] }
 0x1be   : >> { %v1675_v11 = vadd.f32 %v1651_v21, %v1623_v7  ;;  %v1676_v63 = vadd.f32 %v1652_v57, %v1624_v30  ;;  %v1677_v17 = vadd.f32 %v1653_v45, %v1625_v3  ;;  %v1678_v53 = vadd.f32 %v1654_v58, %v1626_v9  ;;  %v5743_v13 = vld [vmem:[#allocation56_spill] sm:$0xff]  ;;  %v5744_v30 = vld [vmem:[#allocation50_spill] sm:$0xff]  ;;  %v5745_v9 = vld [vmem:[#allocation57_spill] sm:$0xff] }
 0x1bf   : >> { %v1679_v24 = vadd.f32 %v1655_v39, %v1627_v8  ;;  %v1680_v31 = vadd.f32 %v1656_v5, %v1628_v10  ;;  %v1681_v33 = vadd.f32 %v1657_v54, %v1629_v22  ;;  %v1682_v35 = vadd.f32 %v1658_v4, %v1630_v56  ;;  %v5746_v10 = vld [vmem:[#allocation51_spill] sm:$0xff]  ;;  %v5747_v56 = vld [vmem:[#allocation65_spill] sm:$0xff]  ;;  %v5753_v0 = vld [vmem:[#allocation64_spill] sm:$0xff] }
 0x1c0   : >> { %v1683_v23 = vadd.f32 %v1659_v29, %v1631_v32  ;;  %v1684_v52 = vadd.f32 %v1660_v19, %v1632_v55  ;;  %v1685_v42 = vadd.f32 %v1661_v49, %v1633_v41  ;;  %v1686_v60 = vadd.f32 %v1662_v27, %v1634_v62  ;;  %v5748_v55 = vld [vmem:[#allocation52_spill] sm:$0xff]  ;;  %v5749_v62 = vld [vmem:[#allocation71_spill] sm:$0xff]  ;;  %v5750_v61 = vld [vmem:[#allocation53_spill] sm:$0xff] }
 0x1c1   : >> { %v1691_v47 = vmul.f32 %v5740_v38, %v5739_v1  ;;  %v1692_v44 = vmul.f32 %v5740_v38, %v5741_v2  ;;  %v1693_v40 = vmul.f32 %v5740_v38, %v5742_v18  ;;  %v1694_v3 = vmul.f32 %v5740_v38, %v5743_v13  ;;  %v5754_v29 = vld [vmem:[#allocation25_spill] sm:$0xff]  ;;  %v5755_v19 = vld [vmem:[#allocation60_spill] sm:$0xff]  ;;  %v5758_v5 = vld [vmem:[#allocation66_spill] sm:$0xff] }
 0x1c2   : >> { %v1695_v7 = vmul.f32 %v5740_v38, %v5744_v30  ;;  %v1696_v8 = vmul.f32 %v5740_v38, %v5745_v9  ;;  %v1697_v22 = vmul.f32 %v5740_v38, %v5746_v10  ;;  %v1698_v32 = vmul.f32 %v5740_v38, %v5747_v56  ;;  %v5756_v49 = vld [vmem:[#allocation61_spill] sm:$0xff]  ;;  %v5759_v4 = vld [vmem:[#allocation20_spill] sm:$0xff]  ;;  %v5760_v2 = vld [vmem:[#allocation62_spill] sm:$0xff] }
 0x1c3   : >> { %v1699_v41 = vmul.f32 %v5740_v38, %v5748_v55  ;;  %v1700_v59 = vmul.f32 %v5740_v38, %v5749_v62  ;;  %v1701_v48 = vmul.f32 %v5740_v38, %v5750_v61  ;;  %v1702_v51 = vmul.f32 %v5740_v38, %v5751_v16  ;;  %v5757_v27 = vld [vmem:[#allocation69_spill] sm:$0xff]  ;;  %v5763_v16 = vld [vmem:[#allocation68_spill] sm:$0xff] }
 0x1c4   : >> { %v1703_v14 = vmul.f32 %v5740_v38, %v5752_v34  ;;  %v1704_v21 = vmul.f32 %v5740_v38, %v5753_v0  ;;  %v1705_v57 = vmul.f32 %v5740_v38, %v5754_v29  ;;  %v1706_v45 = vmul.f32 %v5740_v38, %v5755_v19  ;;  %v5761_v0 = vld [vmem:[#allocation22_spill] sm:$0xff] }
 0x1c5   : >> { %v1707_v58 = vmul.f32 %v5740_v38, %v5756_v49  ;;  %v1708_v39 = vmul.f32 %v5740_v38, %v5757_v27  ;;  %v1709_v54 = vmul.f32 %v5740_v38, %v5758_v5  ;;  %v1710_v1 = vmul.f32 %v5740_v38, %v5759_v4  ;;  %v5762_v34 = vld [vmem:[#allocation70_spill] sm:$0xff] }
 0x1c6   : >> { %v1711_v18 = vmul.f32 %v5740_v38, %v5760_v2  ;;  %v1712_v29 = vmul.f32 %v5740_v38, %v5761_v0  ;;  %v1713_v19 = vmul.f32 %v5740_v38, %v5762_v34  ;;  %v1714_v49 = vmul.f32 %v5740_v38, %v5763_v16 }
 0x1c7   : >> { %v1715_v61 = vadd.f32 %v1691_v47, %v1663_v26  ;;  %v1716_v27 = vadd.f32 %v1692_v44, %v1664_v46  ;;  %v1717_v62 = vadd.f32 %v1693_v40, %v1665_v43  ;;  %v1718_v55 = vadd.f32 %v1694_v3, %v1666_v20 }
 0x1c8   : >> { %v1719_v5 = vadd.f32 %v1695_v7, %v1667_v50  ;;  %v1720_v56 = vadd.f32 %v1696_v8, %v1668_v6  ;;  %v1721_v10 = vadd.f32 %v1697_v22, %v1669_v25  ;;  %v1722_v4 = vadd.f32 %v1698_v32, %v1670_v12  ;;  %v5764_v50 = vld [vmem:[#allocation56_spill] sm:$0xff]  ;;  %v5765_v6 = vld [vmem:[#allocation11_spill] sm:$0xff]  ;;  %v5766_v12 = vld [vmem:[#allocation50_spill] sm:$0xff] }
 0x1c9   : >> { %v1723_v9 = vadd.f32 %v1699_v41, %v1671_v37  ;;  %v1724_v30 = vadd.f32 %v1700_v59, %v1672_v36  ;;  %v1725_v2 = vadd.f32 %v1701_v48, %v1673_v28  ;;  %v1726_v13 = vadd.f32 %v1702_v51, %v1674_v15  ;;  %v5767_v37 = vld [vmem:[#allocation57_spill] sm:$0xff]  ;;  %v5775_v8 = vld [vmem:[#allocation64_spill] sm:$0xff] }
 0x1ca   : >> { %v1727_v0 = vadd.f32 %v1703_v14, %v1675_v11  ;;  %v1728_v34 = vadd.f32 %v1704_v21, %v1676_v63  ;;  %v1729_v16 = vadd.f32 %v1705_v57, %v1677_v17  ;;  %v1730_v38 = vadd.f32 %v1706_v45, %v1678_v53  ;;  %v5768_v63 = vld [vmem:[#allocation51_spill] sm:$0xff]  ;;  %v5769_v11 = vld [vmem:[#allocation65_spill] sm:$0xff]  ;;  %v5770_v17 = vld [vmem:[#allocation52_spill] sm:$0xff] }
 0x1cb   : >> { %v1731_v26 = vadd.f32 %v1707_v58, %v1679_v24  ;;  %v1732_v47 = vadd.f32 %v1708_v39, %v1680_v31  ;;  %v1733_v44 = vadd.f32 %v1709_v54, %v1681_v33  ;;  %v1734_v46 = vadd.f32 %v1710_v1, %v1682_v35  ;;  %v5771_v31 = vld [vmem:[#allocation71_spill] sm:$0xff]  ;;  %v5772_v35 = vld [vmem:[#allocation53_spill] sm:$0xff]  ;;  %v5777_v59 = vld [vmem:[#allocation60_spill] sm:$0xff] }
 0x1cc   : >> { %v1735_v40 = vadd.f32 %v1711_v18, %v1683_v23  ;;  %v1736_v43 = vadd.f32 %v1712_v29, %v1684_v52  ;;  %v1737_v3 = vadd.f32 %v1713_v19, %v1685_v42  ;;  %v1738_v20 = vadd.f32 %v1714_v49, %v1686_v60  ;;  %v5773_v52 = vld [vmem:[#allocation15_spill] sm:$0xff]  ;;  %v5774_v60 = vld [vmem:[#allocation54_spill] sm:$0xff]  ;;  %v5776_v32 = vld [vmem:[#allocation25_spill] sm:$0xff] }
 0x1cd   : >> { %v1744_v25 = vmul.f32 %v5765_v6, %v5764_v50  ;;  %v1745_v36 = vmul.f32 %v5765_v6, %v5766_v12  ;;  %v1746_v15 = vmul.f32 %v5765_v6, %v5767_v37  ;;  %v1747_v53 = vmul.f32 %v5765_v6, %v5768_v63  ;;  %v5778_v51 = vld [vmem:[#allocation61_spill] sm:$0xff]  ;;  %v5780_v57 = vld [vmem:[#allocation66_spill] sm:$0xff]  ;;  %v5781_v45 = vld [vmem:[#allocation20_spill] sm:$0xff] }
 0x1ce   : >> { %v1748_v28 = vmul.f32 %v5765_v6, %v5769_v11  ;;  %v1749_v24 = vmul.f32 %v5765_v6, %v5770_v17  ;;  %v1750_v33 = vmul.f32 %v5765_v6, %v5771_v31  ;;  %v1751_v23 = vmul.f32 %v5765_v6, %v5772_v35  ;;  %v5779_v21 = vld [vmem:[#allocation69_spill] sm:$0xff]  ;;  %v5782_v58 = vld [vmem:[#allocation62_spill] sm:$0xff]  ;;  %v5785_v12 = vld [vmem:[#allocation68_spill] sm:$0xff] }
 0x1cf   : >> { %v1752_v42 = vmul.f32 %v5765_v6, %v5773_v52  ;;  %v1753_v7 = vmul.f32 %v5765_v6, %v5774_v60  ;;  %v1754_v22 = vmul.f32 %v5765_v6, %v5775_v8  ;;  %v1755_v41 = vmul.f32 %v5765_v6, %v5776_v32  ;;  %v5783_v54 = vld [vmem:[#allocation22_spill] sm:$0xff]  ;;  %v5786_v63 = vld [vmem:[#allocation67_spill] sm:$0xff]  ;;  %v5787_v17 = vld [vmem:[#allocation32_spill] sm:$0xff] }
 0x1d0   : >> { %v1756_v48 = vmul.f32 %v5765_v6, %v5777_v59  ;;  %v1757_v14 = vmul.f32 %v5765_v6, %v5778_v51  ;;  %v1758_v29 = vmul.f32 %v5765_v6, %v5779_v21  ;;  %v1759_v19 = vmul.f32 %v5765_v6, %v5780_v57  ;;  %v5784_v18 = vld [vmem:[#allocation70_spill] sm:$0xff]  ;;  %v5788_v35 = vld [vmem:[#allocation31_spill] sm:$0xff] }
 0x1d1   : >> { %v1760_v49 = vmul.f32 %v5765_v6, %v5781_v45  ;;  %v1761_v39 = vmul.f32 %v5765_v6, %v5782_v58  ;;  %v1762_v1 = vmul.f32 %v5765_v6, %v5783_v54  ;;  %v1763_v50 = vmul.f32 %v5765_v6, %v5784_v18 }
 0x1d2   : >> { %v1764_v37 = vmul.f32 %v5765_v6, %v5785_v12  ;;  %v1765_v11 = vmul.f32 %v5765_v6, %v5786_v63  ;;  %v1766_v31 = vmul.f32 %v5765_v6, %v5787_v17  ;;  %v1767_v52 = vadd.f32 %v5788_v35, %v1715_v61 }
 0x1d3   : >> { %v1768_v60 = vadd.f32 %v1744_v25, %v1716_v27  ;;  %v1769_v8 = vadd.f32 %v1745_v36, %v1717_v62  ;;  %v1770_v32 = vadd.f32 %v1746_v15, %v1718_v55  ;;  %v1771_v59 = vadd.f32 %v1747_v53, %v1719_v5 }
 0x1d4   : >> { %v1772_v51 = vadd.f32 %v1748_v28, %v1720_v56  ;;  %v1773_v21 = vadd.f32 %v1749_v24, %v1721_v10  ;;  %v1774_v57 = vadd.f32 %v1750_v33, %v1722_v4  ;;  %v1775_v45 = vadd.f32 %v1751_v23, %v1723_v9  ;;  %v5789_v9 = vld [vmem:[#allocation12_spill] sm:$0xff] }
 0x1d5   : >> { %v1776_v58 = vadd.f32 %v1752_v42, %v1724_v30  ;;  %v1777_v54 = vadd.f32 %v1753_v7, %v1725_v2  ;;  %v1778_v18 = vadd.f32 %v1754_v22, %v1726_v13  ;;  %v1779_v12 = vadd.f32 %v1755_v41, %v1727_v0 }
 0x1d6   : >> { %v1780_v63 = vadd.f32 %v1756_v48, %v1728_v34  ;;  %v1781_v6 = vadd.f32 %v1757_v14, %v1729_v16  ;;  %v1782_v17 = vadd.f32 %v1758_v29, %v1730_v38  ;;  %v1783_v35 = vadd.f32 %v1759_v19, %v1731_v26 }
 0x1d7   : >> { %v1784_v61 = vadd.f32 %v1760_v49, %v1732_v47  ;;  %v1785_v25 = vadd.f32 %v1761_v39, %v1733_v44  ;;  %v1786_v27 = vadd.f32 %v1762_v1, %v1734_v46  ;;  %v1787_v62 = vadd.f32 %v1763_v50, %v1735_v40 }
 0x1d8   : >> { %v1788_v56 = vadd.f32 %v1764_v37, %v1736_v43  ;;  %v1789_v55 = vadd.f32 %v1765_v11, %v1737_v3  ;;  %v1790_v10 = vadd.f32 %v1766_v31, %v1738_v20  ;;  %v1797_v30 = vadd.f32 %v5789_v9, %v1767_v52 }
 0x1d9   : >> { %v1798_v13 = vadd.f32 %v5789_v9, %v1768_v60  ;;  %v1799_v16 = vadd.f32 %v5789_v9, %v1769_v8  ;;  %v1800_v34 = vadd.f32 %v5789_v9, %v1770_v32  ;;  %v1801_v0 = vadd.f32 %v5789_v9, %v1771_v59 }
 0x1da   : >> { %v1802_v5 = vadd.f32 %v5789_v9, %v1772_v51  ;;  %v1803_v4 = vadd.f32 %v5789_v9, %v1773_v21  ;;  %v1804_v2 = vadd.f32 %v5789_v9, %v1774_v57  ;;  %v1805_v38 = vadd.f32 %v5789_v9, %v1775_v45  ;;  %1823 = vst [vmem:[%s4549_s25] sm:$0xff] %v1797_v30 }
 0x1db   : >> { %v1806_v26 = vadd.f32 %v5789_v9, %v1776_v58  ;;  %v1807_v47 = vadd.f32 %v5789_v9, %v1777_v54  ;;  %v1808_v44 = vadd.f32 %v5789_v9, %v1778_v18  ;;  %v1809_v46 = vadd.f32 %v5789_v9, %v1779_v12  ;;  %1824 = vst [vmem:[%s4549_s25 + $0x8] sm:$0xf] %v1798_v13 }
 0x1dc   : >> { %1825 = vst [vmem:[%s4549_s25 + $0x10] sm:$0xff] %v1799_v16  ;;  %1826 = vst [vmem:[%s4549_s25 + $0x18] sm:$0xf] %v1800_v34  ;;  %v1810_v40 = vadd.f32 %v5789_v9, %v1780_v63  ;;  %v1811_v43 = vadd.f32 %v5789_v9, %v1781_v6  ;;  %v1812_v3 = vadd.f32 %v5789_v9, %v1782_v17 }
 0x1dd   : >> { %1827 = vst [vmem:[%s4549_s25 + $0x20] sm:$0xff] %v1801_v0  ;;  %v1813_v20 = vadd.f32 %v5789_v9, %v1783_v35  ;;  %1828 = vst [vmem:[%s4549_s25 + $0x28] sm:$0xf] %v1802_v5  ;;  %v1814_v36 = vadd.f32 %v5789_v9, %v1784_v61  ;;  %v1815_v15 = vadd.f32 %v5789_v9, %v1785_v25 }
 0x1de   : >> { %1829 = vst [vmem:[%s4549_s25 + $0x30] sm:$0xff] %v1803_v4  ;;  %1830 = vst [vmem:[%s4549_s25 + $0x38] sm:$0xf] %v1804_v2  ;;  %v1816_v6 = vadd.f32 %v5789_v9, %v1786_v27  ;;  %v1817_v53 = vadd.f32 %v5789_v9, %v1787_v62  ;;  %v1818_v28 = vadd.f32 %v5789_v9, %v1788_v56 }
 0x1df   : >> { %1831 = vst [vmem:[%s4549_s25 + $0x40] sm:$0xff] %v1805_v38  ;;  %1832 = vst [vmem:[%s4549_s25 + $0x48] sm:$0xf] %v1806_v26  ;;  %v1819_v24 = vadd.f32 %v5789_v9, %v1789_v55  ;;  %v1820_v33 = vadd.f32 %v5789_v9, %v1790_v10 }
 0x1e0   : >> { %1833 = vst [vmem:[%s4549_s25 + $0x50] sm:$0xff] %v1807_v47  ;;  %1834 = vst [vmem:[%s4549_s25 + $0x58] sm:$0xf] %v1808_v44 }
 0x1e1   : >> { %1835 = vst [vmem:[%s4549_s25 + $0x60] sm:$0xff] %v1809_v46  ;;  %1836 = vst [vmem:[%s4549_s25 + $0x68] sm:$0xf] %v1810_v40 }
 0x1e2   : >> { %1837 = vst [vmem:[%s4549_s25 + $0x70] sm:$0xff] %v1811_v43  ;;  %1838 = vst [vmem:[%s4549_s25 + $0x78] sm:$0xf] %v1812_v3  ;;  %220 = sbr.rel (!%p218_p7) target bundleno = 73 (0x49), region = 85 }
 0x1e3   : >> { %1839 = vst [vmem:[%s4549_s25 + $0x80] sm:$0xff] %v1813_v20  ;;  %1840 = vst [vmem:[%s4549_s25 + $0x88] sm:$0xf] %v1814_v36 }
 0x1e4   : >> { %1841 = vst [vmem:[%s4549_s25 + $0x90] sm:$0xff] %v1815_v15  ;;  %1842 = vst [vmem:[%s4549_s25 + $0x98] sm:$0xf] %v1816_v6 }
 0x1e5   : >> { %1843 = vst [vmem:[%s4549_s25 + $0xa0] sm:$0xff] %v1817_v53  ;;  %1844 = vst [vmem:[%s4549_s25 + $0xa8] sm:$0xf] %v1818_v28 }
 0x1e6   : >> { %1845 = vst [vmem:[%s4549_s25 + $0xb0] sm:$0xff] %v1819_v24  ;;  %1846 = vst [vmem:[%s4549_s25 + $0xb8] sm:$0xf] %v1820_v33 }
 0x1e7 PF: > { %p14_p0 = scmp.ge.s32.totalorder %s2190_s23, 4   ;;  %s5790_s12 = smov %s2105_s13 }
 0x1e8   : > { %s5791_s13 = smov %s2109_s14  ;;  %s5792_s14 = smov %s2210_s4 }
 0x1e9   : > { %s5793_s15 = smov %s2190_s23  ;;  %16 = sbr.rel (!%p14_p0) target bundleno = 4 (0x4), region = 96 }
 0x1ee   :  { %1871 = vsyncpa [#allocation3], 1 }
 0x1ef   :  { %1873 = vsyncpa [#allocation3 + $0x1], 1 }
 0x1f0   :  { %1874 = vsyncpa [#allocation5], 1 }

</bundles_post_ra>
